<compile_context>
chip_gen: v7x
topology: tpu7x:2x2x1
jax: 0.10.0
libtpu: 0.0.40
codegen_flags: <defaults>
</compile_context>

<pallas_src>
import functools

import jax
import jax.numpy as jnp
from jax.experimental import pallas as pl


# ---------------------------------------------------------------------------
# Fused kernel: all TransformerBlocks + output head, whole batch in one step
# ---------------------------------------------------------------------------
def _updet_transformer_kernel(x_ref,
                              wqkv_ref, wu_ref, bu_ref,
                              g1_ref, be1_ref, w1_ref, bf1_ref,
                              w2_ref, bf2_ref, g2_ref, be2_ref,
                              wp_ref, bp_ref,
                              probs_ref, dot_ref,
                              *, depth, heads, emb, seq, nbatch):
    """Fused UPDeT transformer forward.

    x_ref    : (B*T, E) f32              input tokens (batch stacked along rows)
    wqkv     : (D, E, 3*H*E) bf16        fused Q|K|V projection (q/k scale baked in)
    wu       : (D, H*E, E) bf16          unify-heads weight
    bu       : (D, 1, E) f32             unify-heads bias
    g1/be1   : (D, 1, E) f32             LayerNorm 1 gamma/beta
    w1/bf1   : (D, E, 4E) bf16 / (D,1,4E) f32   FF linear 1
    w2/bf2   : (D, 4E, E) bf16 / (D,1,E)  f32   FF linear 2
    g2/be2   : (D, 1, E) f32             LayerNorm 2 gamma/beta
    wp/bp    : (E, O) bf16 / (1, O) f32  toprobs head
    probs_ref: (B*T, O) f32              output logits
    dot_ref  : (B, H, T, T) f32          softmaxed attention of the LAST layer only
    """
    E, H, T, B = emb, heads, seq, nbatch
    HE = H * E
    f32 = jnp.float32
    bf16 = jnp.bfloat16

    x = x_ref[...]                                           # (B*T, E) f32

    for layer in range(depth):                               # static unroll over layers
        last = layer == depth - 1

        # ---- fused Q/K/V projection: ONE wide matmul (B*T, E) @ (E, 3*H*E) ----
        qkv = jnp.dot(x.astype(bf16), wqkv_ref[layer],
                      preferred_element_type=f32)            # (B*T, 3*H*E), scale baked in

        # ---- attention: heads batched per einsum, per-batch softmax ----
        outs = []
        for b in range(B):                                   # static unroll, B is tiny
            qkv_b = qkv[b * T:(b + 1) * T, :]                # (T, 3*H*E)
            q = jnp.stack([qkv_b[:, hh * E:(hh + 1) * E] for hh in range(H)], axis=0)
            k = jnp.stack([qkv_b[:, HE + hh * E:HE + (hh + 1) * E] for hh in range(H)], axis=0)
            v = jnp.stack([qkv_b[:, 2 * HE + hh * E:2 * HE + (hh + 1) * E] for hh in range(H)],
                          axis=0)                            # each (H, T, E)
            s = jnp.einsum('hqe,hke->hqk', q.astype(bf16), k.astype(bf16),
                           preferred_element_type=f32)       # (H, T, T)
            s = s - jnp.max(s, axis=-1, keepdims=True)
            es = jnp.exp(s)
            p = es * pl.reciprocal(jnp.sum(es, axis=-1, keepdims=True), approx=True)
            if last:                                         # only last layer's dot is consumed
                dot_ref[b] = p
            o = jnp.einsum('hqk,hke->hqe', p.astype(bf16), v.astype(bf16),
                           preferred_element_type=f32)       # (H, T, E)
            outs.append(jnp.concatenate([o[hh] for hh in range(H)], axis=1))   # (T, H*E)
        out = jnp.concatenate(outs, axis=0)                  # (B*T, H*E)

        # ---- unify heads: ONE (B*T, H*E) @ (H*E, E) matmul ----
        att = jnp.dot(out.astype(bf16), wu_ref[layer],
                      preferred_element_type=f32) + bu_ref[layer]

        # ---- residual + LayerNorm 1 ----
        h1 = att + x
        mu1 = jnp.mean(h1, axis=-1, keepdims=True)
        var1 = jnp.mean((h1 - mu1) ** 2, axis=-1, keepdims=True)
        x1 = (h1 - mu1) * jax.lax.rsqrt(var1 + 1e-5) * g1_ref[layer] + be1_ref[layer]

        # ---- feed-forward (Linear -> ReLU -> Linear) ----
        ff = jnp.dot(x1.astype(bf16), w1_ref[layer],
                     preferred_element_type=f32) + bf1_ref[layer]
        ff = jnp.maximum(ff, 0.0)
        ff = jnp.dot(ff.astype(bf16), w2_ref[layer],
                     preferred_element_type=f32) + bf2_ref[layer]

        # ---- residual + LayerNorm 2 ----
        h2 = ff + x1
        mu2 = jnp.mean(h2, axis=-1, keepdims=True)
        var2 = jnp.mean((h2 - mu2) ** 2, axis=-1, keepdims=True)
        x = (h2 - mu2) * jax.lax.rsqrt(var2 + 1e-5) * g2_ref[layer] + be2_ref[layer]

    # ---- fused toprobs head ----
    probs_ref[...] = (jnp.dot(x.astype(bf16), wp_ref[...], preferred_element_type=f32)
                      + bp_ref[...])


# ---------------------------------------------------------------------------
# Pallas wrapper
# ---------------------------------------------------------------------------
def transformer_forward(x, h, mask, packed, *, heads, emb, output_dim):
    """Matches Transformer.forward(x, h, mask) -> (probs, tokens, dot)."""
    if mask is not None:
        # UPDeT always passes mask=None; masked_fill path intentionally unimplemented.
        raise NotImplementedError("mask must be None")
    bn = x.shape[0]
    h = h.reshape(bn, 1, -1)
    tokens = jnp.concatenate([x, h], axis=1)                  # (B, T, E) f32
    B, T, E = tokens.shape
    depth = packed["wqkv"].shape[0]

    names = ["wqkv", "wu", "bu", "g1", "be1", "w1", "bf1",
             "w2", "bf2", "g2", "be2", "toprobs_w", "toprobs_b"]
    weights = [packed[n] for n in names]

    kern = functools.partial(_updet_transformer_kernel,
                             depth=depth, heads=heads, emb=E, seq=T, nbatch=B)

    # Single invocation (no grid): all inputs/outputs are whole arrays resident in VMEM
    # (total well under 1 MB), so there is no pipeline prologue and weights are DMA'd once.
    probs_flat, dot = pl.pallas_call(
        kern,
        out_shape=(jax.ShapeDtypeStruct((B * T, output_dim), jnp.float32),
                   jax.ShapeDtypeStruct((B, heads, T, T), jnp.float32)),
    )(tokens.reshape(B * T, E), *weights)

    probs = probs_flat.reshape(B, T, output_dim)
    dot = dot.reshape(B * heads, T, T)                        # like torch: (b*h, t, t)
    return probs, tokens, dot


# ---------------------------------------------------------------------------
# Parameters: torch-like layout + host-side packing for the kernel
# ---------------------------------------------------------------------------
def init_params(key, *, emb, heads, depth, output_dim):
    """Torch-layout parameters (weights as (in, out), heads flattened on the out axis)."""
    def lin(k, fan_in, fan_out):
        return 0.1 * jax.random.normal(k, (fan_in, fan_out), jnp.float32)

    blocks = []
    for d in range(depth):
        ks = jax.random.split(jax.random.fold_in(key, d), 8)
        blocks.append({
            "wq": lin(ks[0], emb, emb * heads),
            "wk": lin(ks[1], emb, emb * heads),
            "wv": lin(ks[2], emb, emb * heads),
            "wu": lin(ks[3], emb * heads, emb),
            "bu": 0.1 * jax.random.normal(ks[4], (1, emb), jnp.float32),
            "g1": jnp.ones((1, emb), jnp.float32),            # nn.LayerNorm default init
            "be1": jnp.zeros((1, emb), jnp.float32),
            "w1": lin(ks[5], emb, 4 * emb),
            "bf1": 0.1 * jax.random.normal(ks[6], (1, 4 * emb), jnp.float32),
            "w2": lin(ks[7], 4 * emb, emb),
            "bf2": jnp.zeros((1, emb), jnp.float32),
            "g2": jnp.ones((1, emb), jnp.float32),
            "be2": jnp.zeros((1, emb), jnp.float32),
        })
    kp, kb = jax.random.split(jax.random.fold_in(key, 999))
    return {
        "blocks": blocks,
        "toprobs_w": lin(kp, emb, output_dim),
        "toprobs_b": 0.1 * jax.random.normal(kb, (1, output_dim), jnp.float32),
    }


def pack_params(params, *, emb, heads):
    """Repack torch-layout params for the fused kernel:
       - fused lane-dense QKV weight (depth, E, 3*H*E), q/k scale emb**-0.25 baked in
       - unify / FF / head weights stored bf16 (half DMA, native MXU path)
       - biases / LayerNorm params kept f32 (added to f32 accumulators)."""
    scale = emb ** (-0.25)
    blocks = params["blocks"]
    wdt = jnp.bfloat16

    def stack(name):
        return jnp.stack([b[name] for b in blocks], axis=0)

    wqkv = jnp.stack(
        [jnp.concatenate([b["wq"] * scale, b["wk"] * scale, b["wv"]], axis=1)
         for b in blocks], axis=0).astype(wdt)                 # (D, E, 3*H*E)

    return {
        "wqkv": wqkv,
        "wu": stack("wu").astype(wdt),                         # (D, H*E, E)
        "bu": stack("bu"),
        "g1": stack("g1"), "be1": stack("be1"),
        "w1": stack("w1").astype(wdt), "bf1": stack("bf1"),
        "w2": stack("w2").astype(wdt), "bf2": stack("bf2"),
        "g2": stack("g2"), "be2": stack("be2"),
        "toprobs_w": params["toprobs_w"].astype(wdt),
        "toprobs_b": params["toprobs_b"],
    }


# ---------------------------------------------------------------------------
# Pure-JAX reference (torch-layout f32 params) for correctness check
# ---------------------------------------------------------------------------
def _ref_layernorm(x, g, b):
    mu = jnp.mean(x, axis=-1, keepdims=True)
    var = jnp.mean((x - mu) ** 2, axis=-1, keepdims=True)
    return (x - mu) * jax.lax.rsqrt(var + 1e-5) * g + b


def ref_forward(x, h, params, *, heads, emb, output_dim):
    bn = x.shape[0]
    h = h.reshape(bn, 1, -1)
    tokens = jnp.concatenate([x, h], axis=1)
    b, t, e = tokens.shape
    cur = tokens
    dot_last = None
    for p in params["blocks"]:
        q = (cur @ p["wq"]).reshape(b, t, heads, e).transpose(0, 2, 1, 3) / e ** 0.25
        k = (cur @ p["wk"]).reshape(b, t, heads, e).transpose(0, 2, 1, 3) / e ** 0.25
        v = (cur @ p["wv"]).reshape(b, t, heads, e).transpose(0, 2, 1, 3)
        dot = jnp.einsum("bhte,bhse->bhts", q, k)
        dot = jax.nn.softmax(dot, axis=-1)
        out = jnp.einsum("bhts,bhse->bhte", dot, v)
        out = out.transpose(0, 2, 1, 3).reshape(b, t, heads * e)
        att = out @ p["wu"] + p["bu"]
        x1 = _ref_layernorm(att + cur, p["g1"], p["be1"])
        ff = jnp.maximum(x1 @ p["w1"] + p["bf1"], 0.0) @ p["w2"] + p["bf2"]
        cur = _ref_layernorm(ff + x1, p["g2"], p["be2"])
        dot_last = dot
    probs = cur @ params["toprobs_w"] + params["toprobs_b"]
    return probs, tokens, dot_last.reshape(b * heads, t, t)


# ---------------------------------------------------------------------------
if __name__ == "__main__":
    # small shapes: batch=2, 8 observation tokens (+1 hidden token), emb=32, heads=8,
    # depth=2, output_dim=6
    BN, TX, EMB, HEADS, DEPTH, OUT = 2, 8, 32, 8, 2, 6

    key = jax.random.PRNGKey(0)
    kx, kh, kp = jax.random.split(key, 3)
    x = jax.random.normal(kx, (BN, TX, EMB), jnp.float32)
    h = jax.random.normal(kh, (BN, EMB), jnp.float32)
    params = init_params(kp, emb=EMB, heads=HEADS, depth=DEPTH, output_dim=OUT)
    packed = pack_params(params, emb=EMB, heads=HEADS)

    probs, tokens, dot = transformer_forward(
        x, h, None, packed, heads=HEADS, emb=EMB, output_dim=OUT)
    jax.block_until_ready((probs, tokens, dot))

    # sanity check against pure-JAX f32 reference (bf16 weight storage + bf16 matmul
    # operands with f32 accumulation introduce ~1e-3..1e-2 absolute error)
    r_probs, r_tokens, r_dot = ref_forward(
        x, h, params, heads=HEADS, emb=EMB, output_dim=OUT)
    assert probs.shape == (BN, TX + 1, OUT)
    assert tokens.shape == (BN, TX + 1, EMB)
    assert dot.shape == (BN * HEADS, TX + 1, TX + 1)
    assert jnp.allclose(probs, r_probs, atol=3e-2, rtol=3e-2), \
        float(jnp.max(jnp.abs(probs - r_probs)))
    assert jnp.allclose(tokens, r_tokens, atol=1e-6)
    assert jnp.allclose(dot, r_dot, atol=2e-2, rtol=2e-2), \
        float(jnp.max(jnp.abs(dot - r_dot)))

    print("KERNEL_OK")
</pallas_src>

<mosaic_0001>
module attributes {stable_mosaic.version = 11 : i64} {
  func.func @_updet_transformer_kernel(%arg0: memref<18x32xf32, #tpu.memory_space<vmem>>, %arg1: memref<2x32x768xbf16, #tpu.memory_space<vmem>>, %arg2: memref<2x256x32xbf16, #tpu.memory_space<vmem>>, %arg3: memref<2x1x32xf32, #tpu.memory_space<vmem>>, %arg4: memref<2x1x32xf32, #tpu.memory_space<vmem>>, %arg5: memref<2x1x32xf32, #tpu.memory_space<vmem>>, %arg6: memref<2x32x128xbf16, #tpu.memory_space<vmem>>, %arg7: memref<2x1x128xf32, #tpu.memory_space<vmem>>, %arg8: memref<2x128x32xbf16, #tpu.memory_space<vmem>>, %arg9: memref<2x1x32xf32, #tpu.memory_space<vmem>>, %arg10: memref<2x1x32xf32, #tpu.memory_space<vmem>>, %arg11: memref<2x1x32xf32, #tpu.memory_space<vmem>>, %arg12: memref<32x6xbf16, #tpu.memory_space<vmem>>, %arg13: memref<1x6xf32, #tpu.memory_space<vmem>>, %arg14: memref<18x6xf32, #tpu.memory_space<vmem>>, %arg15: memref<2x8x9x9xf32, #tpu.memory_space<vmem>>) attributes {dimension_semantics = [], scalar_prefetch = 0 : i64, scratch_operands = 0 : i64, tpu.core_type = #tpu.core_type<tc>} {
    %c0 = arith.constant 0 : index
    %c0_0 = arith.constant 0 : index
    %0 = vector.load %arg0[%c0, %c0_0] : memref<18x32xf32, #tpu.memory_space<vmem>>, vector<18x32xf32>
    %1 = arith.truncf %0 : vector<18x32xf32> to vector<18x32xbf16>
    %c0_1 = arith.constant 0 : index
    %c0_2 = arith.constant 0 : index
    %c0_3 = arith.constant 0 : index
    %2 = vector.load %arg1[%c0_1, %c0_2, %c0_3] : memref<2x32x768xbf16, #tpu.memory_space<vmem>>, vector<1x32x768xbf16>
    %3 = vector.shape_cast %2 : vector<1x32x768xbf16> to vector<32x768xbf16>
    %cst = arith.constant dense<0.000000e+00> : vector<18x768xf32>
    %4 = tpu.matmul %1, %3, %cst {dimension_numbers = #tpu.dot_dimension_numbers<[1], [0], [0], [1], [0, 0, 1, 1], [], []>} : vector<18x32xbf16>, vector<32x768xbf16>, vector<18x768xf32> -> vector<18x768xf32>
    %5 = vector.extract_strided_slice %4 {offsets = [0, 0], sizes = [9, 768], strides = [1, 1]} : vector<18x768xf32> to vector<9x768xf32>
    %6 = vector.extract_strided_slice %5 {offsets = [0, 0], sizes = [9, 32], strides = [1, 1]} : vector<9x768xf32> to vector<9x32xf32>
    %7 = vector.extract_strided_slice %5 {offsets = [0, 32], sizes = [9, 32], strides = [1, 1]} : vector<9x768xf32> to vector<9x32xf32>
    %8 = vector.extract_strided_slice %5 {offsets = [0, 64], sizes = [9, 32], strides = [1, 1]} : vector<9x768xf32> to vector<9x32xf32>
    %9 = vector.extract_strided_slice %5 {offsets = [0, 96], sizes = [9, 32], strides = [1, 1]} : vector<9x768xf32> to vector<9x32xf32>
    %10 = vector.extract_strided_slice %5 {offsets = [0, 128], sizes = [9, 32], strides = [1, 1]} : vector<9x768xf32> to vector<9x32xf32>
    %11 = vector.extract_strided_slice %5 {offsets = [0, 160], sizes = [9, 32], strides = [1, 1]} : vector<9x768xf32> to vector<9x32xf32>
    %12 = vector.extract_strided_slice %5 {offsets = [0, 192], sizes = [9, 32], strides = [1, 1]} : vector<9x768xf32> to vector<9x32xf32>
    %13 = vector.extract_strided_slice %5 {offsets = [0, 224], sizes = [9, 32], strides = [1, 1]} : vector<9x768xf32> to vector<9x32xf32>
    %14 = vector.shape_cast %6 : vector<9x32xf32> to vector<1x9x32xf32>
    %15 = vector.shape_cast %7 : vector<9x32xf32> to vector<1x9x32xf32>
    %16 = vector.shape_cast %8 : vector<9x32xf32> to vector<1x9x32xf32>
    %17 = vector.shape_cast %9 : vector<9x32xf32> to vector<1x9x32xf32>
    %18 = vector.shape_cast %10 : vector<9x32xf32> to vector<1x9x32xf32>
    %19 = vector.shape_cast %11 : vector<9x32xf32> to vector<1x9x32xf32>
    %20 = vector.shape_cast %12 : vector<9x32xf32> to vector<1x9x32xf32>
    %21 = vector.shape_cast %13 : vector<9x32xf32> to vector<1x9x32xf32>
    %22 = tpu.concatenate %14, %15, %16, %17, %18, %19, %20, %21 in 0 : vector<1x9x32xf32>, vector<1x9x32xf32>, vector<1x9x32xf32>, vector<1x9x32xf32>, vector<1x9x32xf32>, vector<1x9x32xf32>, vector<1x9x32xf32>, vector<1x9x32xf32> -> vector<8x9x32xf32>
    %23 = vector.extract_strided_slice %5 {offsets = [0, 256], sizes = [9, 32], strides = [1, 1]} : vector<9x768xf32> to vector<9x32xf32>
    %24 = vector.extract_strided_slice %5 {offsets = [0, 288], sizes = [9, 32], strides = [1, 1]} : vector<9x768xf32> to vector<9x32xf32>
    %25 = vector.extract_strided_slice %5 {offsets = [0, 320], sizes = [9, 32], strides = [1, 1]} : vector<9x768xf32> to vector<9x32xf32>
    %26 = vector.extract_strided_slice %5 {offsets = [0, 352], sizes = [9, 32], strides = [1, 1]} : vector<9x768xf32> to vector<9x32xf32>
    %27 = vector.extract_strided_slice %5 {offsets = [0, 384], sizes = [9, 32], strides = [1, 1]} : vector<9x768xf32> to vector<9x32xf32>
    %28 = vector.extract_strided_slice %5 {offsets = [0, 416], sizes = [9, 32], strides = [1, 1]} : vector<9x768xf32> to vector<9x32xf32>
    %29 = vector.extract_strided_slice %5 {offsets = [0, 448], sizes = [9, 32], strides = [1, 1]} : vector<9x768xf32> to vector<9x32xf32>
    %30 = vector.extract_strided_slice %5 {offsets = [0, 480], sizes = [9, 32], strides = [1, 1]} : vector<9x768xf32> to vector<9x32xf32>
    %31 = vector.shape_cast %23 : vector<9x32xf32> to vector<1x9x32xf32>
    %32 = vector.shape_cast %24 : vector<9x32xf32> to vector<1x9x32xf32>
    %33 = vector.shape_cast %25 : vector<9x32xf32> to vector<1x9x32xf32>
    %34 = vector.shape_cast %26 : vector<9x32xf32> to vector<1x9x32xf32>
    %35 = vector.shape_cast %27 : vector<9x32xf32> to vector<1x9x32xf32>
    %36 = vector.shape_cast %28 : vector<9x32xf32> to vector<1x9x32xf32>
    %37 = vector.shape_cast %29 : vector<9x32xf32> to vector<1x9x32xf32>
    %38 = vector.shape_cast %30 : vector<9x32xf32> to vector<1x9x32xf32>
    %39 = tpu.concatenate %31, %32, %33, %34, %35, %36, %37, %38 in 0 : vector<1x9x32xf32>, vector<1x9x32xf32>, vector<1x9x32xf32>, vector<1x9x32xf32>, vector<1x9x32xf32>, vector<1x9x32xf32>, vector<1x9x32xf32>, vector<1x9x32xf32> -> vector<8x9x32xf32>
    %40 = vector.extract_strided_slice %5 {offsets = [0, 512], sizes = [9, 32], strides = [1, 1]} : vector<9x768xf32> to vector<9x32xf32>
    %41 = vector.extract_strided_slice %5 {offsets = [0, 544], sizes = [9, 32], strides = [1, 1]} : vector<9x768xf32> to vector<9x32xf32>
    %42 = vector.extract_strided_slice %5 {offsets = [0, 576], sizes = [9, 32], strides = [1, 1]} : vector<9x768xf32> to vector<9x32xf32>
    %43 = vector.extract_strided_slice %5 {offsets = [0, 608], sizes = [9, 32], strides = [1, 1]} : vector<9x768xf32> to vector<9x32xf32>
    %44 = vector.extract_strided_slice %5 {offsets = [0, 640], sizes = [9, 32], strides = [1, 1]} : vector<9x768xf32> to vector<9x32xf32>
    %45 = vector.extract_strided_slice %5 {offsets = [0, 672], sizes = [9, 32], strides = [1, 1]} : vector<9x768xf32> to vector<9x32xf32>
    %46 = vector.extract_strided_slice %5 {offsets = [0, 704], sizes = [9, 32], strides = [1, 1]} : vector<9x768xf32> to vector<9x32xf32>
    %47 = vector.extract_strided_slice %5 {offsets = [0, 736], sizes = [9, 32], strides = [1, 1]} : vector<9x768xf32> to vector<9x32xf32>
    %48 = vector.shape_cast %40 : vector<9x32xf32> to vector<1x9x32xf32>
    %49 = vector.shape_cast %41 : vector<9x32xf32> to vector<1x9x32xf32>
    %50 = vector.shape_cast %42 : vector<9x32xf32> to vector<1x9x32xf32>
    %51 = vector.shape_cast %43 : vector<9x32xf32> to vector<1x9x32xf32>
    %52 = vector.shape_cast %44 : vector<9x32xf32> to vector<1x9x32xf32>
    %53 = vector.shape_cast %45 : vector<9x32xf32> to vector<1x9x32xf32>
    %54 = vector.shape_cast %46 : vector<9x32xf32> to vector<1x9x32xf32>
    %55 = vector.shape_cast %47 : vector<9x32xf32> to vector<1x9x32xf32>
    %56 = tpu.concatenate %48, %49, %50, %51, %52, %53, %54, %55 in 0 : vector<1x9x32xf32>, vector<1x9x32xf32>, vector<1x9x32xf32>, vector<1x9x32xf32>, vector<1x9x32xf32>, vector<1x9x32xf32>, vector<1x9x32xf32>, vector<1x9x32xf32> -> vector<8x9x32xf32>
    %57 = arith.truncf %22 : vector<8x9x32xf32> to vector<8x9x32xbf16>
    %58 = arith.truncf %39 : vector<8x9x32xf32> to vector<8x9x32xbf16>
    "tpu.trace_start"() <{level = 10 : i32, message = "hqe,hke->hqk"}> : () -> ()
    %cst_4 = arith.constant dense<0.000000e+00> : vector<8x9x9xf32>
    %59 = tpu.matmul %57, %58, %cst_4 {dimension_numbers = #tpu.dot_dimension_numbers<[2], [2], [1], [1], [0, 0, 0, 1, 1, 1], [0], [0]>} : vector<8x9x32xbf16>, vector<8x9x32xbf16>, vector<8x9x9xf32> -> vector<8x9x9xf32>
    "tpu.trace_stop"() : () -> ()
    %cst_5 = arith.constant dense<0xFF800000> : vector<8x9xf32>
    %60 = vector.multi_reduction <maximumf>, %59, %cst_5 [2] : vector<8x9x9xf32> to vector<8x9xf32>
    %61 = vector.shape_cast %60 : vector<8x9xf32> to vector<8x9x1xf32>
    %62 = vector.broadcast %61 : vector<8x9x1xf32> to vector<8x9x9xf32>
    %63 = arith.subf %59, %62 : vector<8x9x9xf32>
    %64 = math.exp %63 : vector<8x9x9xf32>
    %cst_6 = arith.constant dense<0.000000e+00> : vector<8x9xf32>
    %65 = vector.multi_reduction <add>, %64, %cst_6 [2] : vector<8x9x9xf32> to vector<8x9xf32>
    %66 = vector.shape_cast %65 : vector<8x9xf32> to vector<8x9x1xf32>
    %67 = tpu.reciprocal %66 {approx = true} : vector<8x9x1xf32> -> vector<8x9x1xf32>
    %68 = vector.broadcast %67 : vector<8x9x1xf32> to vector<8x9x9xf32>
    %69 = arith.mulf %64, %68 : vector<8x9x9xf32>
    %70 = arith.truncf %69 : vector<8x9x9xf32> to vector<8x9x9xbf16>
    %71 = arith.truncf %56 : vector<8x9x32xf32> to vector<8x9x32xbf16>
    "tpu.trace_start"() <{level = 10 : i32, message = "hqk,hke->hqe"}> : () -> ()
    %cst_7 = arith.constant dense<0.000000e+00> : vector<8x9x32xf32>
    %72 = tpu.matmul %70, %71, %cst_7 {dimension_numbers = #tpu.dot_dimension_numbers<[2], [1], [1], [2], [0, 0, 0, 1, 1, 2], [0], [0]>} : vector<8x9x9xbf16>, vector<8x9x32xbf16>, vector<8x9x32xf32> -> vector<8x9x32xf32>
    "tpu.trace_stop"() : () -> ()
    %73 = vector.extract_strided_slice %72 {offsets = [0, 0, 0], sizes = [1, 9, 32], strides = [1, 1, 1]} : vector<8x9x32xf32> to vector<1x9x32xf32>
    %74 = vector.shape_cast %73 : vector<1x9x32xf32> to vector<9x32xf32>
    %75 = vector.extract_strided_slice %72 {offsets = [1, 0, 0], sizes = [1, 9, 32], strides = [1, 1, 1]} : vector<8x9x32xf32> to vector<1x9x32xf32>
    %76 = vector.shape_cast %75 : vector<1x9x32xf32> to vector<9x32xf32>
    %77 = vector.extract_strided_slice %72 {offsets = [2, 0, 0], sizes = [1, 9, 32], strides = [1, 1, 1]} : vector<8x9x32xf32> to vector<1x9x32xf32>
    %78 = vector.shape_cast %77 : vector<1x9x32xf32> to vector<9x32xf32>
    %79 = vector.extract_strided_slice %72 {offsets = [3, 0, 0], sizes = [1, 9, 32], strides = [1, 1, 1]} : vector<8x9x32xf32> to vector<1x9x32xf32>
    %80 = vector.shape_cast %79 : vector<1x9x32xf32> to vector<9x32xf32>
    %81 = vector.extract_strided_slice %72 {offsets = [4, 0, 0], sizes = [1, 9, 32], strides = [1, 1, 1]} : vector<8x9x32xf32> to vector<1x9x32xf32>
    %82 = vector.shape_cast %81 : vector<1x9x32xf32> to vector<9x32xf32>
    %83 = vector.extract_strided_slice %72 {offsets = [5, 0, 0], sizes = [1, 9, 32], strides = [1, 1, 1]} : vector<8x9x32xf32> to vector<1x9x32xf32>
    %84 = vector.shape_cast %83 : vector<1x9x32xf32> to vector<9x32xf32>
    %85 = vector.extract_strided_slice %72 {offsets = [6, 0, 0], sizes = [1, 9, 32], strides = [1, 1, 1]} : vector<8x9x32xf32> to vector<1x9x32xf32>
    %86 = vector.shape_cast %85 : vector<1x9x32xf32> to vector<9x32xf32>
    %87 = vector.extract_strided_slice %72 {offsets = [7, 0, 0], sizes = [1, 9, 32], strides = [1, 1, 1]} : vector<8x9x32xf32> to vector<1x9x32xf32>
    %88 = vector.shape_cast %87 : vector<1x9x32xf32> to vector<9x32xf32>
    %89 = tpu.concatenate %74, %76, %78, %80, %82, %84, %86, %88 in 1 : vector<9x32xf32>, vector<9x32xf32>, vector<9x32xf32>, vector<9x32xf32>, vector<9x32xf32>, vector<9x32xf32>, vector<9x32xf32>, vector<9x32xf32> -> vector<9x256xf32>
    %90 = vector.extract_strided_slice %4 {offsets = [9, 0], sizes = [9, 768], strides = [1, 1]} : vector<18x768xf32> to vector<9x768xf32>
    %91 = vector.extract_strided_slice %90 {offsets = [0, 0], sizes = [9, 32], strides = [1, 1]} : vector<9x768xf32> to vector<9x32xf32>
    %92 = vector.extract_strided_slice %90 {offsets = [0, 32], sizes = [9, 32], strides = [1, 1]} : vector<9x768xf32> to vector<9x32xf32>
    %93 = vector.extract_strided_slice %90 {offsets = [0, 64], sizes = [9, 32], strides = [1, 1]} : vector<9x768xf32> to vector<9x32xf32>
    %94 = vector.extract_strided_slice %90 {offsets = [0, 96], sizes = [9, 32], strides = [1, 1]} : vector<9x768xf32> to vector<9x32xf32>
    %95 = vector.extract_strided_slice %90 {offsets = [0, 128], sizes = [9, 32], strides = [1, 1]} : vector<9x768xf32> to vector<9x32xf32>
    %96 = vector.extract_strided_slice %90 {offsets = [0, 160], sizes = [9, 32], strides = [1, 1]} : vector<9x768xf32> to vector<9x32xf32>
    %97 = vector.extract_strided_slice %90 {offsets = [0, 192], sizes = [9, 32], strides = [1, 1]} : vector<9x768xf32> to vector<9x32xf32>
    %98 = vector.extract_strided_slice %90 {offsets = [0, 224], sizes = [9, 32], strides = [1, 1]} : vector<9x768xf32> to vector<9x32xf32>
    %99 = vector.shape_cast %91 : vector<9x32xf32> to vector<1x9x32xf32>
    %100 = vector.shape_cast %92 : vector<9x32xf32> to vector<1x9x32xf32>
    %101 = vector.shape_cast %93 : vector<9x32xf32> to vector<1x9x32xf32>
    %102 = vector.shape_cast %94 : vector<9x32xf32> to vector<1x9x32xf32>
    %103 = vector.shape_cast %95 : vector<9x32xf32> to vector<1x9x32xf32>
    %104 = vector.shape_cast %96 : vector<9x32xf32> to vector<1x9x32xf32>
    %105 = vector.shape_cast %97 : vector<9x32xf32> to vector<1x9x32xf32>
    %106 = vector.shape_cast %98 : vector<9x32xf32> to vector<1x9x32xf32>
    %107 = tpu.concatenate %99, %100, %101, %102, %103, %104, %105, %106 in 0 : vector<1x9x32xf32>, vector<1x9x32xf32>, vector<1x9x32xf32>, vector<1x9x32xf32>, vector<1x9x32xf32>, vector<1x9x32xf32>, vector<1x9x32xf32>, vector<1x9x32xf32> -> vector<8x9x32xf32>
    %108 = vector.extract_strided_slice %90 {offsets = [0, 256], sizes = [9, 32], strides = [1, 1]} : vector<9x768xf32> to vector<9x32xf32>
    %109 = vector.extract_strided_slice %90 {offsets = [0, 288], sizes = [9, 32], strides = [1, 1]} : vector<9x768xf32> to vector<9x32xf32>
    %110 = vector.extract_strided_slice %90 {offsets = [0, 320], sizes = [9, 32], strides = [1, 1]} : vector<9x768xf32> to vector<9x32xf32>
    %111 = vector.extract_strided_slice %90 {offsets = [0, 352], sizes = [9, 32], strides = [1, 1]} : vector<9x768xf32> to vector<9x32xf32>
    %112 = vector.extract_strided_slice %90 {offsets = [0, 384], sizes = [9, 32], strides = [1, 1]} : vector<9x768xf32> to vector<9x32xf32>
    %113 = vector.extract_strided_slice %90 {offsets = [0, 416], sizes = [9, 32], strides = [1, 1]} : vector<9x768xf32> to vector<9x32xf32>
    %114 = vector.extract_strided_slice %90 {offsets = [0, 448], sizes = [9, 32], strides = [1, 1]} : vector<9x768xf32> to vector<9x32xf32>
    %115 = vector.extract_strided_slice %90 {offsets = [0, 480], sizes = [9, 32], strides = [1, 1]} : vector<9x768xf32> to vector<9x32xf32>
    %116 = vector.shape_cast %108 : vector<9x32xf32> to vector<1x9x32xf32>
    %117 = vector.shape_cast %109 : vector<9x32xf32> to vector<1x9x32xf32>
    %118 = vector.shape_cast %110 : vector<9x32xf32> to vector<1x9x32xf32>
    %119 = vector.shape_cast %111 : vector<9x32xf32> to vector<1x9x32xf32>
    %120 = vector.shape_cast %112 : vector<9x32xf32> to vector<1x9x32xf32>
    %121 = vector.shape_cast %113 : vector<9x32xf32> to vector<1x9x32xf32>
    %122 = vector.shape_cast %114 : vector<9x32xf32> to vector<1x9x32xf32>
    %123 = vector.shape_cast %115 : vector<9x32xf32> to vector<1x9x32xf32>
    %124 = tpu.concatenate %116, %117, %118, %119, %120, %121, %122, %123 in 0 : vector<1x9x32xf32>, vector<1x9x32xf32>, vector<1x9x32xf32>, vector<1x9x32xf32>, vector<1x9x32xf32>, vector<1x9x32xf32>, vector<1x9x32xf32>, vector<1x9x32xf32> -> vector<8x9x32xf32>
    %125 = vector.extract_strided_slice %90 {offsets = [0, 512], sizes = [9, 32], strides = [1, 1]} : vector<9x768xf32> to vector<9x32xf32>
    %126 = vector.extract_strided_slice %90 {offsets = [0, 544], sizes = [9, 32], strides = [1, 1]} : vector<9x768xf32> to vector<9x32xf32>
    %127 = vector.extract_strided_slice %90 {offsets = [0, 576], sizes = [9, 32], strides = [1, 1]} : vector<9x768xf32> to vector<9x32xf32>
    %128 = vector.extract_strided_slice %90 {offsets = [0, 608], sizes = [9, 32], strides = [1, 1]} : vector<9x768xf32> to vector<9x32xf32>
    %129 = vector.extract_strided_slice %90 {offsets = [0, 640], sizes = [9, 32], strides = [1, 1]} : vector<9x768xf32> to vector<9x32xf32>
    %130 = vector.extract_strided_slice %90 {offsets = [0, 672], sizes = [9, 32], strides = [1, 1]} : vector<9x768xf32> to vector<9x32xf32>
    %131 = vector.extract_strided_slice %90 {offsets = [0, 704], sizes = [9, 32], strides = [1, 1]} : vector<9x768xf32> to vector<9x32xf32>
    %132 = vector.extract_strided_slice %90 {offsets = [0, 736], sizes = [9, 32], strides = [1, 1]} : vector<9x768xf32> to vector<9x32xf32>
    %133 = vector.shape_cast %125 : vector<9x32xf32> to vector<1x9x32xf32>
    %134 = vector.shape_cast %126 : vector<9x32xf32> to vector<1x9x32xf32>
    %135 = vector.shape_cast %127 : vector<9x32xf32> to vector<1x9x32xf32>
    %136 = vector.shape_cast %128 : vector<9x32xf32> to vector<1x9x32xf32>
    %137 = vector.shape_cast %129 : vector<9x32xf32> to vector<1x9x32xf32>
    %138 = vector.shape_cast %130 : vector<9x32xf32> to vector<1x9x32xf32>
    %139 = vector.shape_cast %131 : vector<9x32xf32> to vector<1x9x32xf32>
    %140 = vector.shape_cast %132 : vector<9x32xf32> to vector<1x9x32xf32>
    %141 = tpu.concatenate %133, %134, %135, %136, %137, %138, %139, %140 in 0 : vector<1x9x32xf32>, vector<1x9x32xf32>, vector<1x9x32xf32>, vector<1x9x32xf32>, vector<1x9x32xf32>, vector<1x9x32xf32>, vector<1x9x32xf32>, vector<1x9x32xf32> -> vector<8x9x32xf32>
    %142 = arith.truncf %107 : vector<8x9x32xf32> to vector<8x9x32xbf16>
    %143 = arith.truncf %124 : vector<8x9x32xf32> to vector<8x9x32xbf16>
    "tpu.trace_start"() <{level = 10 : i32, message = "hqe,hke->hqk"}> : () -> ()
    %cst_8 = arith.constant dense<0.000000e+00> : vector<8x9x9xf32>
    %144 = tpu.matmul %142, %143, %cst_8 {dimension_numbers = #tpu.dot_dimension_numbers<[2], [2], [1], [1], [0, 0, 0, 1, 1, 1], [0], [0]>} : vector<8x9x32xbf16>, vector<8x9x32xbf16>, vector<8x9x9xf32> -> vector<8x9x9xf32>
    "tpu.trace_stop"() : () -> ()
    %cst_9 = arith.constant dense<0xFF800000> : vector<8x9xf32>
    %145 = vector.multi_reduction <maximumf>, %144, %cst_9 [2] : vector<8x9x9xf32> to vector<8x9xf32>
    %146 = vector.shape_cast %145 : vector<8x9xf32> to vector<8x9x1xf32>
    %147 = vector.broadcast %146 : vector<8x9x1xf32> to vector<8x9x9xf32>
    %148 = arith.subf %144, %147 : vector<8x9x9xf32>
    %149 = math.exp %148 : vector<8x9x9xf32>
    %cst_10 = arith.constant dense<0.000000e+00> : vector<8x9xf32>
    %150 = vector.multi_reduction <add>, %149, %cst_10 [2] : vector<8x9x9xf32> to vector<8x9xf32>
    %151 = vector.shape_cast %150 : vector<8x9xf32> to vector<8x9x1xf32>
    %152 = tpu.reciprocal %151 {approx = true} : vector<8x9x1xf32> -> vector<8x9x1xf32>
    %153 = vector.broadcast %152 : vector<8x9x1xf32> to vector<8x9x9xf32>
    %154 = arith.mulf %149, %153 : vector<8x9x9xf32>
    %155 = arith.truncf %154 : vector<8x9x9xf32> to vector<8x9x9xbf16>
    %156 = arith.truncf %141 : vector<8x9x32xf32> to vector<8x9x32xbf16>
    "tpu.trace_start"() <{level = 10 : i32, message = "hqk,hke->hqe"}> : () -> ()
    %cst_11 = arith.constant dense<0.000000e+00> : vector<8x9x32xf32>
    %157 = tpu.matmul %155, %156, %cst_11 {dimension_numbers = #tpu.dot_dimension_numbers<[2], [1], [1], [2], [0, 0, 0, 1, 1, 2], [0], [0]>} : vector<8x9x9xbf16>, vector<8x9x32xbf16>, vector<8x9x32xf32> -> vector<8x9x32xf32>
    "tpu.trace_stop"() : () -> ()
    %158 = vector.extract_strided_slice %157 {offsets = [0, 0, 0], sizes = [1, 9, 32], strides = [1, 1, 1]} : vector<8x9x32xf32> to vector<1x9x32xf32>
    %159 = vector.shape_cast %158 : vector<1x9x32xf32> to vector<9x32xf32>
    %160 = vector.extract_strided_slice %157 {offsets = [1, 0, 0], sizes = [1, 9, 32], strides = [1, 1, 1]} : vector<8x9x32xf32> to vector<1x9x32xf32>
    %161 = vector.shape_cast %160 : vector<1x9x32xf32> to vector<9x32xf32>
    %162 = vector.extract_strided_slice %157 {offsets = [2, 0, 0], sizes = [1, 9, 32], strides = [1, 1, 1]} : vector<8x9x32xf32> to vector<1x9x32xf32>
    %163 = vector.shape_cast %162 : vector<1x9x32xf32> to vector<9x32xf32>
    %164 = vector.extract_strided_slice %157 {offsets = [3, 0, 0], sizes = [1, 9, 32], strides = [1, 1, 1]} : vector<8x9x32xf32> to vector<1x9x32xf32>
    %165 = vector.shape_cast %164 : vector<1x9x32xf32> to vector<9x32xf32>
    %166 = vector.extract_strided_slice %157 {offsets = [4, 0, 0], sizes = [1, 9, 32], strides = [1, 1, 1]} : vector<8x9x32xf32> to vector<1x9x32xf32>
    %167 = vector.shape_cast %166 : vector<1x9x32xf32> to vector<9x32xf32>
    %168 = vector.extract_strided_slice %157 {offsets = [5, 0, 0], sizes = [1, 9, 32], strides = [1, 1, 1]} : vector<8x9x32xf32> to vector<1x9x32xf32>
    %169 = vector.shape_cast %168 : vector<1x9x32xf32> to vector<9x32xf32>
    %170 = vector.extract_strided_slice %157 {offsets = [6, 0, 0], sizes = [1, 9, 32], strides = [1, 1, 1]} : vector<8x9x32xf32> to vector<1x9x32xf32>
    %171 = vector.shape_cast %170 : vector<1x9x32xf32> to vector<9x32xf32>
    %172 = vector.extract_strided_slice %157 {offsets = [7, 0, 0], sizes = [1, 9, 32], strides = [1, 1, 1]} : vector<8x9x32xf32> to vector<1x9x32xf32>
    %173 = vector.shape_cast %172 : vector<1x9x32xf32> to vector<9x32xf32>
    %174 = tpu.concatenate %159, %161, %163, %165, %167, %169, %171, %173 in 1 : vector<9x32xf32>, vector<9x32xf32>, vector<9x32xf32>, vector<9x32xf32>, vector<9x32xf32>, vector<9x32xf32>, vector<9x32xf32>, vector<9x32xf32> -> vector<9x256xf32>
    %175 = tpu.concatenate %89, %174 in 0 : vector<9x256xf32>, vector<9x256xf32> -> vector<18x256xf32>
    %176 = arith.truncf %175 : vector<18x256xf32> to vector<18x256xbf16>
    %c0_12 = arith.constant 0 : index
    %c0_13 = arith.constant 0 : index
    %c0_14 = arith.constant 0 : index
    %177 = vector.load %arg2[%c0_12, %c0_13, %c0_14] : memref<2x256x32xbf16, #tpu.memory_space<vmem>>, vector<1x256x32xbf16>
    %178 = vector.shape_cast %177 : vector<1x256x32xbf16> to vector<256x32xbf16>
    %cst_15 = arith.constant dense<0.000000e+00> : vector<18x32xf32>
    %179 = tpu.matmul %176, %178, %cst_15 {dimension_numbers = #tpu.dot_dimension_numbers<[1], [0], [0], [1], [0, 0, 1, 1], [], []>} : vector<18x256xbf16>, vector<256x32xbf16>, vector<18x32xf32> -> vector<18x32xf32>
    %c0_16 = arith.constant 0 : index
    %c0_17 = arith.constant 0 : index
    %c0_18 = arith.constant 0 : index
    %180 = vector.load %arg3[%c0_16, %c0_17, %c0_18] : memref<2x1x32xf32, #tpu.memory_space<vmem>>, vector<1x1x32xf32>
    %181 = vector.shape_cast %180 : vector<1x1x32xf32> to vector<1x32xf32>
    %182 = vector.broadcast %181 : vector<1x32xf32> to vector<18x32xf32>
    %183 = arith.addf %179, %182 : vector<18x32xf32>
    %184 = arith.addf %183, %0 : vector<18x32xf32>
    %cst_19 = arith.constant dense<0.000000e+00> : vector<18xf32>
    %185 = vector.multi_reduction <add>, %184, %cst_19 [1] : vector<18x32xf32> to vector<18xf32>
    %186 = vector.shape_cast %185 : vector<18xf32> to vector<18x1xf32>
    %cst_20 = arith.constant 3.200000e+01 : f32
    %187 = vector.broadcast %cst_20 : f32 to vector<18x1xf32>
    %188 = arith.divf %186, %187 : vector<18x1xf32>
    %189 = vector.broadcast %188 : vector<18x1xf32> to vector<18x32xf32>
    %190 = arith.subf %184, %189 : vector<18x32xf32>
    %191 = arith.mulf %190, %190 : vector<18x32xf32>
    %cst_21 = arith.constant dense<0.000000e+00> : vector<18xf32>
    %192 = vector.multi_reduction <add>, %191, %cst_21 [1] : vector<18x32xf32> to vector<18xf32>
    %193 = vector.shape_cast %192 : vector<18xf32> to vector<18x1xf32>
    %cst_22 = arith.constant 3.200000e+01 : f32
    %194 = vector.broadcast %cst_22 : f32 to vector<18x1xf32>
    %195 = arith.divf %193, %194 : vector<18x1xf32>
    %196 = vector.broadcast %188 : vector<18x1xf32> to vector<18x32xf32>
    %197 = arith.subf %184, %196 : vector<18x32xf32>
    %cst_23 = arith.constant 9.99999974E-6 : f32
    %198 = vector.broadcast %cst_23 : f32 to vector<18x1xf32>
    %199 = arith.addf %195, %198 : vector<18x1xf32>
    %200 = math.rsqrt %199 : vector<18x1xf32>
    %201 = vector.broadcast %200 : vector<18x1xf32> to vector<18x32xf32>
    %202 = arith.mulf %197, %201 : vector<18x32xf32>
    %c0_24 = arith.constant 0 : index
    %c0_25 = arith.constant 0 : index
    %c0_26 = arith.constant 0 : index
    %203 = vector.load %arg4[%c0_24, %c0_25, %c0_26] : memref<2x1x32xf32, #tpu.memory_space<vmem>>, vector<1x1x32xf32>
    %204 = vector.shape_cast %203 : vector<1x1x32xf32> to vector<1x32xf32>
    %205 = vector.broadcast %204 : vector<1x32xf32> to vector<18x32xf32>
    %206 = arith.mulf %202, %205 : vector<18x32xf32>
    %c0_27 = arith.constant 0 : index
    %c0_28 = arith.constant 0 : index
    %c0_29 = arith.constant 0 : index
    %207 = vector.load %arg5[%c0_27, %c0_28, %c0_29] : memref<2x1x32xf32, #tpu.memory_space<vmem>>, vector<1x1x32xf32>
    %208 = vector.shape_cast %207 : vector<1x1x32xf32> to vector<1x32xf32>
    %209 = vector.broadcast %208 : vector<1x32xf32> to vector<18x32xf32>
    %210 = arith.addf %206, %209 : vector<18x32xf32>
    %211 = arith.truncf %210 : vector<18x32xf32> to vector<18x32xbf16>
    %c0_30 = arith.constant 0 : index
    %c0_31 = arith.constant 0 : index
    %c0_32 = arith.constant 0 : index
    %212 = vector.load %arg6[%c0_30, %c0_31, %c0_32] : memref<2x32x128xbf16, #tpu.memory_space<vmem>>, vector<1x32x128xbf16>
    %213 = vector.shape_cast %212 : vector<1x32x128xbf16> to vector<32x128xbf16>
    %cst_33 = arith.constant dense<0.000000e+00> : vector<18x128xf32>
    %214 = tpu.matmul %211, %213, %cst_33 {dimension_numbers = #tpu.dot_dimension_numbers<[1], [0], [0], [1], [0, 0, 1, 1], [], []>} : vector<18x32xbf16>, vector<32x128xbf16>, vector<18x128xf32> -> vector<18x128xf32>
    %c0_34 = arith.constant 0 : index
    %c0_35 = arith.constant 0 : index
    %c0_36 = arith.constant 0 : index
    %215 = vector.load %arg7[%c0_34, %c0_35, %c0_36] : memref<2x1x128xf32, #tpu.memory_space<vmem>>, vector<1x1x128xf32>
    %216 = vector.shape_cast %215 : vector<1x1x128xf32> to vector<1x128xf32>
    %217 = vector.broadcast %216 : vector<1x128xf32> to vector<18x128xf32>
    %218 = arith.addf %214, %217 : vector<18x128xf32>
    %cst_37 = arith.constant 0.000000e+00 : f32
    %219 = vector.broadcast %cst_37 : f32 to vector<18x128xf32>
    %220 = arith.maximumf %218, %219 : vector<18x128xf32>
    %221 = arith.truncf %220 : vector<18x128xf32> to vector<18x128xbf16>
    %c0_38 = arith.constant 0 : index
    %c0_39 = arith.constant 0 : index
    %c0_40 = arith.constant 0 : index
    %222 = vector.load %arg8[%c0_38, %c0_39, %c0_40] : memref<2x128x32xbf16, #tpu.memory_space<vmem>>, vector<1x128x32xbf16>
    %223 = vector.shape_cast %222 : vector<1x128x32xbf16> to vector<128x32xbf16>
    %cst_41 = arith.constant dense<0.000000e+00> : vector<18x32xf32>
    %224 = tpu.matmul %221, %223, %cst_41 {dimension_numbers = #tpu.dot_dimension_numbers<[1], [0], [0], [1], [0, 0, 1, 1], [], []>} : vector<18x128xbf16>, vector<128x32xbf16>, vector<18x32xf32> -> vector<18x32xf32>
    %c0_42 = arith.constant 0 : index
    %c0_43 = arith.constant 0 : index
    %c0_44 = arith.constant 0 : index
    %225 = vector.load %arg9[%c0_42, %c0_43, %c0_44] : memref<2x1x32xf32, #tpu.memory_space<vmem>>, vector<1x1x32xf32>
    %226 = vector.shape_cast %225 : vector<1x1x32xf32> to vector<1x32xf32>
    %227 = vector.broadcast %226 : vector<1x32xf32> to vector<18x32xf32>
    %228 = arith.addf %224, %227 : vector<18x32xf32>
    %229 = arith.addf %228, %210 : vector<18x32xf32>
    %cst_45 = arith.constant dense<0.000000e+00> : vector<18xf32>
    %230 = vector.multi_reduction <add>, %229, %cst_45 [1] : vector<18x32xf32> to vector<18xf32>
    %231 = vector.shape_cast %230 : vector<18xf32> to vector<18x1xf32>
    %cst_46 = arith.constant 3.200000e+01 : f32
    %232 = vector.broadcast %cst_46 : f32 to vector<18x1xf32>
    %233 = arith.divf %231, %232 : vector<18x1xf32>
    %234 = vector.broadcast %233 : vector<18x1xf32> to vector<18x32xf32>
    %235 = arith.subf %229, %234 : vector<18x32xf32>
    %236 = arith.mulf %235, %235 : vector<18x32xf32>
    %cst_47 = arith.constant dense<0.000000e+00> : vector<18xf32>
    %237 = vector.multi_reduction <add>, %236, %cst_47 [1] : vector<18x32xf32> to vector<18xf32>
    %238 = vector.shape_cast %237 : vector<18xf32> to vector<18x1xf32>
    %cst_48 = arith.constant 3.200000e+01 : f32
    %239 = vector.broadcast %cst_48 : f32 to vector<18x1xf32>
    %240 = arith.divf %238, %239 : vector<18x1xf32>
    %241 = vector.broadcast %233 : vector<18x1xf32> to vector<18x32xf32>
    %242 = arith.subf %229, %241 : vector<18x32xf32>
    %cst_49 = arith.constant 9.99999974E-6 : f32
    %243 = vector.broadcast %cst_49 : f32 to vector<18x1xf32>
    %244 = arith.addf %240, %243 : vector<18x1xf32>
    %245 = math.rsqrt %244 : vector<18x1xf32>
    %246 = vector.broadcast %245 : vector<18x1xf32> to vector<18x32xf32>
    %247 = arith.mulf %242, %246 : vector<18x32xf32>
    %c0_50 = arith.constant 0 : index
    %c0_51 = arith.constant 0 : index
    %c0_52 = arith.constant 0 : index
    %248 = vector.load %arg10[%c0_50, %c0_51, %c0_52] : memref<2x1x32xf32, #tpu.memory_space<vmem>>, vector<1x1x32xf32>
    %249 = vector.shape_cast %248 : vector<1x1x32xf32> to vector<1x32xf32>
    %250 = vector.broadcast %249 : vector<1x32xf32> to vector<18x32xf32>
    %251 = arith.mulf %247, %250 : vector<18x32xf32>
    %c0_53 = arith.constant 0 : index
    %c0_54 = arith.constant 0 : index
    %c0_55 = arith.constant 0 : index
    %252 = vector.load %arg11[%c0_53, %c0_54, %c0_55] : memref<2x1x32xf32, #tpu.memory_space<vmem>>, vector<1x1x32xf32>
    %253 = vector.shape_cast %252 : vector<1x1x32xf32> to vector<1x32xf32>
    %254 = vector.broadcast %253 : vector<1x32xf32> to vector<18x32xf32>
    %255 = arith.addf %251, %254 : vector<18x32xf32>
    %256 = arith.truncf %255 : vector<18x32xf32> to vector<18x32xbf16>
    %c1 = arith.constant 1 : index
    %c0_56 = arith.constant 0 : index
    %c0_57 = arith.constant 0 : index
    %257 = vector.load %arg1[%c1, %c0_56, %c0_57] : memref<2x32x768xbf16, #tpu.memory_space<vmem>>, vector<1x32x768xbf16>
    %258 = vector.shape_cast %257 : vector<1x32x768xbf16> to vector<32x768xbf16>
    %cst_58 = arith.constant dense<0.000000e+00> : vector<18x768xf32>
    %259 = tpu.matmul %256, %258, %cst_58 {dimension_numbers = #tpu.dot_dimension_numbers<[1], [0], [0], [1], [0, 0, 1, 1], [], []>} : vector<18x32xbf16>, vector<32x768xbf16>, vector<18x768xf32> -> vector<18x768xf32>
    %260 = vector.extract_strided_slice %259 {offsets = [0, 0], sizes = [9, 768], strides = [1, 1]} : vector<18x768xf32> to vector<9x768xf32>
    %261 = vector.extract_strided_slice %260 {offsets = [0, 0], sizes = [9, 32], strides = [1, 1]} : vector<9x768xf32> to vector<9x32xf32>
    %262 = vector.extract_strided_slice %260 {offsets = [0, 32], sizes = [9, 32], strides = [1, 1]} : vector<9x768xf32> to vector<9x32xf32>
    %263 = vector.extract_strided_slice %260 {offsets = [0, 64], sizes = [9, 32], strides = [1, 1]} : vector<9x768xf32> to vector<9x32xf32>
    %264 = vector.extract_strided_slice %260 {offsets = [0, 96], sizes = [9, 32], strides = [1, 1]} : vector<9x768xf32> to vector<9x32xf32>
    %265 = vector.extract_strided_slice %260 {offsets = [0, 128], sizes = [9, 32], strides = [1, 1]} : vector<9x768xf32> to vector<9x32xf32>
    %266 = vector.extract_strided_slice %260 {offsets = [0, 160], sizes = [9, 32], strides = [1, 1]} : vector<9x768xf32> to vector<9x32xf32>
    %267 = vector.extract_strided_slice %260 {offsets = [0, 192], sizes = [9, 32], strides = [1, 1]} : vector<9x768xf32> to vector<9x32xf32>
    %268 = vector.extract_strided_slice %260 {offsets = [0, 224], sizes = [9, 32], strides = [1, 1]} : vector<9x768xf32> to vector<9x32xf32>
    %269 = vector.shape_cast %261 : vector<9x32xf32> to vector<1x9x32xf32>
    %270 = vector.shape_cast %262 : vector<9x32xf32> to vector<1x9x32xf32>
    %271 = vector.shape_cast %263 : vector<9x32xf32> to vector<1x9x32xf32>
    %272 = vector.shape_cast %264 : vector<9x32xf32> to vector<1x9x32xf32>
    %273 = vector.shape_cast %265 : vector<9x32xf32> to vector<1x9x32xf32>
    %274 = vector.shape_cast %266 : vector<9x32xf32> to vector<1x9x32xf32>
    %275 = vector.shape_cast %267 : vector<9x32xf32> to vector<1x9x32xf32>
    %276 = vector.shape_cast %268 : vector<9x32xf32> to vector<1x9x32xf32>
    %277 = tpu.concatenate %269, %270, %271, %272, %273, %274, %275, %276 in 0 : vector<1x9x32xf32>, vector<1x9x32xf32>, vector<1x9x32xf32>, vector<1x9x32xf32>, vector<1x9x32xf32>, vector<1x9x32xf32>, vector<1x9x32xf32>, vector<1x9x32xf32> -> vector<8x9x32xf32>
    %278 = vector.extract_strided_slice %260 {offsets = [0, 256], sizes = [9, 32], strides = [1, 1]} : vector<9x768xf32> to vector<9x32xf32>
    %279 = vector.extract_strided_slice %260 {offsets = [0, 288], sizes = [9, 32], strides = [1, 1]} : vector<9x768xf32> to vector<9x32xf32>
    %280 = vector.extract_strided_slice %260 {offsets = [0, 320], sizes = [9, 32], strides = [1, 1]} : vector<9x768xf32> to vector<9x32xf32>
    %281 = vector.extract_strided_slice %260 {offsets = [0, 352], sizes = [9, 32], strides = [1, 1]} : vector<9x768xf32> to vector<9x32xf32>
    %282 = vector.extract_strided_slice %260 {offsets = [0, 384], sizes = [9, 32], strides = [1, 1]} : vector<9x768xf32> to vector<9x32xf32>
    %283 = vector.extract_strided_slice %260 {offsets = [0, 416], sizes = [9, 32], strides = [1, 1]} : vector<9x768xf32> to vector<9x32xf32>
    %284 = vector.extract_strided_slice %260 {offsets = [0, 448], sizes = [9, 32], strides = [1, 1]} : vector<9x768xf32> to vector<9x32xf32>
    %285 = vector.extract_strided_slice %260 {offsets = [0, 480], sizes = [9, 32], strides = [1, 1]} : vector<9x768xf32> to vector<9x32xf32>
    %286 = vector.shape_cast %278 : vector<9x32xf32> to vector<1x9x32xf32>
    %287 = vector.shape_cast %279 : vector<9x32xf32> to vector<1x9x32xf32>
    %288 = vector.shape_cast %280 : vector<9x32xf32> to vector<1x9x32xf32>
    %289 = vector.shape_cast %281 : vector<9x32xf32> to vector<1x9x32xf32>
    %290 = vector.shape_cast %282 : vector<9x32xf32> to vector<1x9x32xf32>
    %291 = vector.shape_cast %283 : vector<9x32xf32> to vector<1x9x32xf32>
    %292 = vector.shape_cast %284 : vector<9x32xf32> to vector<1x9x32xf32>
    %293 = vector.shape_cast %285 : vector<9x32xf32> to vector<1x9x32xf32>
    %294 = tpu.concatenate %286, %287, %288, %289, %290, %291, %292, %293 in 0 : vector<1x9x32xf32>, vector<1x9x32xf32>, vector<1x9x32xf32>, vector<1x9x32xf32>, vector<1x9x32xf32>, vector<1x9x32xf32>, vector<1x9x32xf32>, vector<1x9x32xf32> -> vector<8x9x32xf32>
    %295 = vector.extract_strided_slice %260 {offsets = [0, 512], sizes = [9, 32], strides = [1, 1]} : vector<9x768xf32> to vector<9x32xf32>
    %296 = vector.extract_strided_slice %260 {offsets = [0, 544], sizes = [9, 32], strides = [1, 1]} : vector<9x768xf32> to vector<9x32xf32>
    %297 = vector.extract_strided_slice %260 {offsets = [0, 576], sizes = [9, 32], strides = [1, 1]} : vector<9x768xf32> to vector<9x32xf32>
    %298 = vector.extract_strided_slice %260 {offsets = [0, 608], sizes = [9, 32], strides = [1, 1]} : vector<9x768xf32> to vector<9x32xf32>
    %299 = vector.extract_strided_slice %260 {offsets = [0, 640], sizes = [9, 32], strides = [1, 1]} : vector<9x768xf32> to vector<9x32xf32>
    %300 = vector.extract_strided_slice %260 {offsets = [0, 672], sizes = [9, 32], strides = [1, 1]} : vector<9x768xf32> to vector<9x32xf32>
    %301 = vector.extract_strided_slice %260 {offsets = [0, 704], sizes = [9, 32], strides = [1, 1]} : vector<9x768xf32> to vector<9x32xf32>
    %302 = vector.extract_strided_slice %260 {offsets = [0, 736], sizes = [9, 32], strides = [1, 1]} : vector<9x768xf32> to vector<9x32xf32>
    %303 = vector.shape_cast %295 : vector<9x32xf32> to vector<1x9x32xf32>
    %304 = vector.shape_cast %296 : vector<9x32xf32> to vector<1x9x32xf32>
    %305 = vector.shape_cast %297 : vector<9x32xf32> to vector<1x9x32xf32>
    %306 = vector.shape_cast %298 : vector<9x32xf32> to vector<1x9x32xf32>
    %307 = vector.shape_cast %299 : vector<9x32xf32> to vector<1x9x32xf32>
    %308 = vector.shape_cast %300 : vector<9x32xf32> to vector<1x9x32xf32>
    %309 = vector.shape_cast %301 : vector<9x32xf32> to vector<1x9x32xf32>
    %310 = vector.shape_cast %302 : vector<9x32xf32> to vector<1x9x32xf32>
    %311 = tpu.concatenate %303, %304, %305, %306, %307, %308, %309, %310 in 0 : vector<1x9x32xf32>, vector<1x9x32xf32>, vector<1x9x32xf32>, vector<1x9x32xf32>, vector<1x9x32xf32>, vector<1x9x32xf32>, vector<1x9x32xf32>, vector<1x9x32xf32> -> vector<8x9x32xf32>
    %312 = arith.truncf %277 : vector<8x9x32xf32> to vector<8x9x32xbf16>
    %313 = arith.truncf %294 : vector<8x9x32xf32> to vector<8x9x32xbf16>
    "tpu.trace_start"() <{level = 10 : i32, message = "hqe,hke->hqk"}> : () -> ()
    %cst_59 = arith.constant dense<0.000000e+00> : vector<8x9x9xf32>
    %314 = tpu.matmul %312, %313, %cst_59 {dimension_numbers = #tpu.dot_dimension_numbers<[2], [2], [1], [1], [0, 0, 0, 1, 1, 1], [0], [0]>} : vector<8x9x32xbf16>, vector<8x9x32xbf16>, vector<8x9x9xf32> -> vector<8x9x9xf32>
    "tpu.trace_stop"() : () -> ()
    %cst_60 = arith.constant dense<0xFF800000> : vector<8x9xf32>
    %315 = vector.multi_reduction <maximumf>, %314, %cst_60 [2] : vector<8x9x9xf32> to vector<8x9xf32>
    %316 = vector.shape_cast %315 : vector<8x9xf32> to vector<8x9x1xf32>
    %317 = vector.broadcast %316 : vector<8x9x1xf32> to vector<8x9x9xf32>
    %318 = arith.subf %314, %317 : vector<8x9x9xf32>
    %319 = math.exp %318 : vector<8x9x9xf32>
    %cst_61 = arith.constant dense<0.000000e+00> : vector<8x9xf32>
    %320 = vector.multi_reduction <add>, %319, %cst_61 [2] : vector<8x9x9xf32> to vector<8x9xf32>
    %321 = vector.shape_cast %320 : vector<8x9xf32> to vector<8x9x1xf32>
    %322 = tpu.reciprocal %321 {approx = true} : vector<8x9x1xf32> -> vector<8x9x1xf32>
    %323 = vector.broadcast %322 : vector<8x9x1xf32> to vector<8x9x9xf32>
    %324 = arith.mulf %319, %323 : vector<8x9x9xf32>
    %c0_62 = arith.constant 0 : index
    %c0_63 = arith.constant 0 : index
    %c0_64 = arith.constant 0 : index
    %c0_65 = arith.constant 0 : index
    %325 = vector.load %arg15[%c0_62, %c0_63, %c0_64, %c0_65] : memref<2x8x9x9xf32, #tpu.memory_space<vmem>>, vector<1x8x9x9xf32>
    %326 = vector.shape_cast %325 : vector<1x8x9x9xf32> to vector<8x9x9xf32>
    %327 = vector.shape_cast %324 : vector<8x9x9xf32> to vector<1x8x9x9xf32>
    tpu.vector_store %arg15[%c0_62, %c0_63, %c0_64, %c0_65], %327 {strides = array<i32>} : memref<2x8x9x9xf32, #tpu.memory_space<vmem>>, vector<1x8x9x9xf32>,
    %328 = arith.truncf %324 : vector<8x9x9xf32> to vector<8x9x9xbf16>
    %329 = arith.truncf %311 : vector<8x9x32xf32> to vector<8x9x32xbf16>
    "tpu.trace_start"() <{level = 10 : i32, message = "hqk,hke->hqe"}> : () -> ()
    %cst_66 = arith.constant dense<0.000000e+00> : vector<8x9x32xf32>
    %330 = tpu.matmul %328, %329, %cst_66 {dimension_numbers = #tpu.dot_dimension_numbers<[2], [1], [1], [2], [0, 0, 0, 1, 1, 2], [0], [0]>} : vector<8x9x9xbf16>, vector<8x9x32xbf16>, vector<8x9x32xf32> -> vector<8x9x32xf32>
    "tpu.trace_stop"() : () -> ()
    %331 = vector.extract_strided_slice %330 {offsets = [0, 0, 0], sizes = [1, 9, 32], strides = [1, 1, 1]} : vector<8x9x32xf32> to vector<1x9x32xf32>
    %332 = vector.shape_cast %331 : vector<1x9x32xf32> to vector<9x32xf32>
    %333 = vector.extract_strided_slice %330 {offsets = [1, 0, 0], sizes = [1, 9, 32], strides = [1, 1, 1]} : vector<8x9x32xf32> to vector<1x9x32xf32>
    %334 = vector.shape_cast %333 : vector<1x9x32xf32> to vector<9x32xf32>
    %335 = vector.extract_strided_slice %330 {offsets = [2, 0, 0], sizes = [1, 9, 32], strides = [1, 1, 1]} : vector<8x9x32xf32> to vector<1x9x32xf32>
    %336 = vector.shape_cast %335 : vector<1x9x32xf32> to vector<9x32xf32>
    %337 = vector.extract_strided_slice %330 {offsets = [3, 0, 0], sizes = [1, 9, 32], strides = [1, 1, 1]} : vector<8x9x32xf32> to vector<1x9x32xf32>
    %338 = vector.shape_cast %337 : vector<1x9x32xf32> to vector<9x32xf32>
    %339 = vector.extract_strided_slice %330 {offsets = [4, 0, 0], sizes = [1, 9, 32], strides = [1, 1, 1]} : vector<8x9x32xf32> to vector<1x9x32xf32>
    %340 = vector.shape_cast %339 : vector<1x9x32xf32> to vector<9x32xf32>
    %341 = vector.extract_strided_slice %330 {offsets = [5, 0, 0], sizes = [1, 9, 32], strides = [1, 1, 1]} : vector<8x9x32xf32> to vector<1x9x32xf32>
    %342 = vector.shape_cast %341 : vector<1x9x32xf32> to vector<9x32xf32>
    %343 = vector.extract_strided_slice %330 {offsets = [6, 0, 0], sizes = [1, 9, 32], strides = [1, 1, 1]} : vector<8x9x32xf32> to vector<1x9x32xf32>
    %344 = vector.shape_cast %343 : vector<1x9x32xf32> to vector<9x32xf32>
    %345 = vector.extract_strided_slice %330 {offsets = [7, 0, 0], sizes = [1, 9, 32], strides = [1, 1, 1]} : vector<8x9x32xf32> to vector<1x9x32xf32>
    %346 = vector.shape_cast %345 : vector<1x9x32xf32> to vector<9x32xf32>
    %347 = tpu.concatenate %332, %334, %336, %338, %340, %342, %344, %346 in 1 : vector<9x32xf32>, vector<9x32xf32>, vector<9x32xf32>, vector<9x32xf32>, vector<9x32xf32>, vector<9x32xf32>, vector<9x32xf32>, vector<9x32xf32> -> vector<9x256xf32>
    %348 = vector.extract_strided_slice %259 {offsets = [9, 0], sizes = [9, 768], strides = [1, 1]} : vector<18x768xf32> to vector<9x768xf32>
    %349 = vector.extract_strided_slice %348 {offsets = [0, 0], sizes = [9, 32], strides = [1, 1]} : vector<9x768xf32> to vector<9x32xf32>
    %350 = vector.extract_strided_slice %348 {offsets = [0, 32], sizes = [9, 32], strides = [1, 1]} : vector<9x768xf32> to vector<9x32xf32>
    %351 = vector.extract_strided_slice %348 {offsets = [0, 64], sizes = [9, 32], strides = [1, 1]} : vector<9x768xf32> to vector<9x32xf32>
    %352 = vector.extract_strided_slice %348 {offsets = [0, 96], sizes = [9, 32], strides = [1, 1]} : vector<9x768xf32> to vector<9x32xf32>
    %353 = vector.extract_strided_slice %348 {offsets = [0, 128], sizes = [9, 32], strides = [1, 1]} : vector<9x768xf32> to vector<9x32xf32>
    %354 = vector.extract_strided_slice %348 {offsets = [0, 160], sizes = [9, 32], strides = [1, 1]} : vector<9x768xf32> to vector<9x32xf32>
    %355 = vector.extract_strided_slice %348 {offsets = [0, 192], sizes = [9, 32], strides = [1, 1]} : vector<9x768xf32> to vector<9x32xf32>
    %356 = vector.extract_strided_slice %348 {offsets = [0, 224], sizes = [9, 32], strides = [1, 1]} : vector<9x768xf32> to vector<9x32xf32>
    %357 = vector.shape_cast %349 : vector<9x32xf32> to vector<1x9x32xf32>
    %358 = vector.shape_cast %350 : vector<9x32xf32> to vector<1x9x32xf32>
    %359 = vector.shape_cast %351 : vector<9x32xf32> to vector<1x9x32xf32>
    %360 = vector.shape_cast %352 : vector<9x32xf32> to vector<1x9x32xf32>
    %361 = vector.shape_cast %353 : vector<9x32xf32> to vector<1x9x32xf32>
    %362 = vector.shape_cast %354 : vector<9x32xf32> to vector<1x9x32xf32>
    %363 = vector.shape_cast %355 : vector<9x32xf32> to vector<1x9x32xf32>
    %364 = vector.shape_cast %356 : vector<9x32xf32> to vector<1x9x32xf32>
    %365 = tpu.concatenate %357, %358, %359, %360, %361, %362, %363, %364 in 0 : vector<1x9x32xf32>, vector<1x9x32xf32>, vector<1x9x32xf32>, vector<1x9x32xf32>, vector<1x9x32xf32>, vector<1x9x32xf32>, vector<1x9x32xf32>, vector<1x9x32xf32> -> vector<8x9x32xf32>
    %366 = vector.extract_strided_slice %348 {offsets = [0, 256], sizes = [9, 32], strides = [1, 1]} : vector<9x768xf32> to vector<9x32xf32>
    %367 = vector.extract_strided_slice %348 {offsets = [0, 288], sizes = [9, 32], strides = [1, 1]} : vector<9x768xf32> to vector<9x32xf32>
    %368 = vector.extract_strided_slice %348 {offsets = [0, 320], sizes = [9, 32], strides = [1, 1]} : vector<9x768xf32> to vector<9x32xf32>
    %369 = vector.extract_strided_slice %348 {offsets = [0, 352], sizes = [9, 32], strides = [1, 1]} : vector<9x768xf32> to vector<9x32xf32>
    %370 = vector.extract_strided_slice %348 {offsets = [0, 384], sizes = [9, 32], strides = [1, 1]} : vector<9x768xf32> to vector<9x32xf32>
    %371 = vector.extract_strided_slice %348 {offsets = [0, 416], sizes = [9, 32], strides = [1, 1]} : vector<9x768xf32> to vector<9x32xf32>
    %372 = vector.extract_strided_slice %348 {offsets = [0, 448], sizes = [9, 32], strides = [1, 1]} : vector<9x768xf32> to vector<9x32xf32>
    %373 = vector.extract_strided_slice %348 {offsets = [0, 480], sizes = [9, 32], strides = [1, 1]} : vector<9x768xf32> to vector<9x32xf32>
    %374 = vector.shape_cast %366 : vector<9x32xf32> to vector<1x9x32xf32>
    %375 = vector.shape_cast %367 : vector<9x32xf32> to vector<1x9x32xf32>
    %376 = vector.shape_cast %368 : vector<9x32xf32> to vector<1x9x32xf32>
    %377 = vector.shape_cast %369 : vector<9x32xf32> to vector<1x9x32xf32>
    %378 = vector.shape_cast %370 : vector<9x32xf32> to vector<1x9x32xf32>
    %379 = vector.shape_cast %371 : vector<9x32xf32> to vector<1x9x32xf32>
    %380 = vector.shape_cast %372 : vector<9x32xf32> to vector<1x9x32xf32>
    %381 = vector.shape_cast %373 : vector<9x32xf32> to vector<1x9x32xf32>
    %382 = tpu.concatenate %374, %375, %376, %377, %378, %379, %380, %381 in 0 : vector<1x9x32xf32>, vector<1x9x32xf32>, vector<1x9x32xf32>, vector<1x9x32xf32>, vector<1x9x32xf32>, vector<1x9x32xf32>, vector<1x9x32xf32>, vector<1x9x32xf32> -> vector<8x9x32xf32>
    %383 = vector.extract_strided_slice %348 {offsets = [0, 512], sizes = [9, 32], strides = [1, 1]} : vector<9x768xf32> to vector<9x32xf32>
    %384 = vector.extract_strided_slice %348 {offsets = [0, 544], sizes = [9, 32], strides = [1, 1]} : vector<9x768xf32> to vector<9x32xf32>
    %385 = vector.extract_strided_slice %348 {offsets = [0, 576], sizes = [9, 32], strides = [1, 1]} : vector<9x768xf32> to vector<9x32xf32>
    %386 = vector.extract_strided_slice %348 {offsets = [0, 608], sizes = [9, 32], strides = [1, 1]} : vector<9x768xf32> to vector<9x32xf32>
    %387 = vector.extract_strided_slice %348 {offsets = [0, 640], sizes = [9, 32], strides = [1, 1]} : vector<9x768xf32> to vector<9x32xf32>
    %388 = vector.extract_strided_slice %348 {offsets = [0, 672], sizes = [9, 32], strides = [1, 1]} : vector<9x768xf32> to vector<9x32xf32>
    %389 = vector.extract_strided_slice %348 {offsets = [0, 704], sizes = [9, 32], strides = [1, 1]} : vector<9x768xf32> to vector<9x32xf32>
    %390 = vector.extract_strided_slice %348 {offsets = [0, 736], sizes = [9, 32], strides = [1, 1]} : vector<9x768xf32> to vector<9x32xf32>
    %391 = vector.shape_cast %383 : vector<9x32xf32> to vector<1x9x32xf32>
    %392 = vector.shape_cast %384 : vector<9x32xf32> to vector<1x9x32xf32>
    %393 = vector.shape_cast %385 : vector<9x32xf32> to vector<1x9x32xf32>
    %394 = vector.shape_cast %386 : vector<9x32xf32> to vector<1x9x32xf32>
    %395 = vector.shape_cast %387 : vector<9x32xf32> to vector<1x9x32xf32>
    %396 = vector.shape_cast %388 : vector<9x32xf32> to vector<1x9x32xf32>
    %397 = vector.shape_cast %389 : vector<9x32xf32> to vector<1x9x32xf32>
    %398 = vector.shape_cast %390 : vector<9x32xf32> to vector<1x9x32xf32>
    %399 = tpu.concatenate %391, %392, %393, %394, %395, %396, %397, %398 in 0 : vector<1x9x32xf32>, vector<1x9x32xf32>, vector<1x9x32xf32>, vector<1x9x32xf32>, vector<1x9x32xf32>, vector<1x9x32xf32>, vector<1x9x32xf32>, vector<1x9x32xf32> -> vector<8x9x32xf32>
    %400 = arith.truncf %365 : vector<8x9x32xf32> to vector<8x9x32xbf16>
    %401 = arith.truncf %382 : vector<8x9x32xf32> to vector<8x9x32xbf16>
    "tpu.trace_start"() <{level = 10 : i32, message = "hqe,hke->hqk"}> : () -> ()
    %cst_67 = arith.constant dense<0.000000e+00> : vector<8x9x9xf32>
    %402 = tpu.matmul %400, %401, %cst_67 {dimension_numbers = #tpu.dot_dimension_numbers<[2], [2], [1], [1], [0, 0, 0, 1, 1, 1], [0], [0]>} : vector<8x9x32xbf16>, vector<8x9x32xbf16>, vector<8x9x9xf32> -> vector<8x9x9xf32>
    "tpu.trace_stop"() : () -> ()
    %cst_68 = arith.constant dense<0xFF800000> : vector<8x9xf32>
    %403 = vector.multi_reduction <maximumf>, %402, %cst_68 [2] : vector<8x9x9xf32> to vector<8x9xf32>
    %404 = vector.shape_cast %403 : vector<8x9xf32> to vector<8x9x1xf32>
    %405 = vector.broadcast %404 : vector<8x9x1xf32> to vector<8x9x9xf32>
    %406 = arith.subf %402, %405 : vector<8x9x9xf32>
    %407 = math.exp %406 : vector<8x9x9xf32>
    %cst_69 = arith.constant dense<0.000000e+00> : vector<8x9xf32>
    %408 = vector.multi_reduction <add>, %407, %cst_69 [2] : vector<8x9x9xf32> to vector<8x9xf32>
    %409 = vector.shape_cast %408 : vector<8x9xf32> to vector<8x9x1xf32>
    %410 = tpu.reciprocal %409 {approx = true} : vector<8x9x1xf32> -> vector<8x9x1xf32>
    %411 = vector.broadcast %410 : vector<8x9x1xf32> to vector<8x9x9xf32>
    %412 = arith.mulf %407, %411 : vector<8x9x9xf32>
    %c1_70 = arith.constant 1 : index
    %c0_71 = arith.constant 0 : index
    %c0_72 = arith.constant 0 : index
    %c0_73 = arith.constant 0 : index
    %413 = vector.load %arg15[%c1_70, %c0_71, %c0_72, %c0_73] : memref<2x8x9x9xf32, #tpu.memory_space<vmem>>, vector<1x8x9x9xf32>
    %414 = vector.shape_cast %413 : vector<1x8x9x9xf32> to vector<8x9x9xf32>
    %415 = vector.shape_cast %412 : vector<8x9x9xf32> to vector<1x8x9x9xf32>
    tpu.vector_store %arg15[%c1_70, %c0_71, %c0_72, %c0_73], %415 {strides = array<i32>} : memref<2x8x9x9xf32, #tpu.memory_space<vmem>>, vector<1x8x9x9xf32>,
    %416 = arith.truncf %412 : vector<8x9x9xf32> to vector<8x9x9xbf16>
    %417 = arith.truncf %399 : vector<8x9x32xf32> to vector<8x9x32xbf16>
    "tpu.trace_start"() <{level = 10 : i32, message = "hqk,hke->hqe"}> : () -> ()
    %cst_74 = arith.constant dense<0.000000e+00> : vector<8x9x32xf32>
    %418 = tpu.matmul %416, %417, %cst_74 {dimension_numbers = #tpu.dot_dimension_numbers<[2], [1], [1], [2], [0, 0, 0, 1, 1, 2], [0], [0]>} : vector<8x9x9xbf16>, vector<8x9x32xbf16>, vector<8x9x32xf32> -> vector<8x9x32xf32>
    "tpu.trace_stop"() : () -> ()
    %419 = vector.extract_strided_slice %418 {offsets = [0, 0, 0], sizes = [1, 9, 32], strides = [1, 1, 1]} : vector<8x9x32xf32> to vector<1x9x32xf32>
    %420 = vector.shape_cast %419 : vector<1x9x32xf32> to vector<9x32xf32>
    %421 = vector.extract_strided_slice %418 {offsets = [1, 0, 0], sizes = [1, 9, 32], strides = [1, 1, 1]} : vector<8x9x32xf32> to vector<1x9x32xf32>
    %422 = vector.shape_cast %421 : vector<1x9x32xf32> to vector<9x32xf32>
    %423 = vector.extract_strided_slice %418 {offsets = [2, 0, 0], sizes = [1, 9, 32], strides = [1, 1, 1]} : vector<8x9x32xf32> to vector<1x9x32xf32>
    %424 = vector.shape_cast %423 : vector<1x9x32xf32> to vector<9x32xf32>
    %425 = vector.extract_strided_slice %418 {offsets = [3, 0, 0], sizes = [1, 9, 32], strides = [1, 1, 1]} : vector<8x9x32xf32> to vector<1x9x32xf32>
    %426 = vector.shape_cast %425 : vector<1x9x32xf32> to vector<9x32xf32>
    %427 = vector.extract_strided_slice %418 {offsets = [4, 0, 0], sizes = [1, 9, 32], strides = [1, 1, 1]} : vector<8x9x32xf32> to vector<1x9x32xf32>
    %428 = vector.shape_cast %427 : vector<1x9x32xf32> to vector<9x32xf32>
    %429 = vector.extract_strided_slice %418 {offsets = [5, 0, 0], sizes = [1, 9, 32], strides = [1, 1, 1]} : vector<8x9x32xf32> to vector<1x9x32xf32>
    %430 = vector.shape_cast %429 : vector<1x9x32xf32> to vector<9x32xf32>
    %431 = vector.extract_strided_slice %418 {offsets = [6, 0, 0], sizes = [1, 9, 32], strides = [1, 1, 1]} : vector<8x9x32xf32> to vector<1x9x32xf32>
    %432 = vector.shape_cast %431 : vector<1x9x32xf32> to vector<9x32xf32>
    %433 = vector.extract_strided_slice %418 {offsets = [7, 0, 0], sizes = [1, 9, 32], strides = [1, 1, 1]} : vector<8x9x32xf32> to vector<1x9x32xf32>
    %434 = vector.shape_cast %433 : vector<1x9x32xf32> to vector<9x32xf32>
    %435 = tpu.concatenate %420, %422, %424, %426, %428, %430, %432, %434 in 1 : vector<9x32xf32>, vector<9x32xf32>, vector<9x32xf32>, vector<9x32xf32>, vector<9x32xf32>, vector<9x32xf32>, vector<9x32xf32>, vector<9x32xf32> -> vector<9x256xf32>
    %436 = tpu.concatenate %347, %435 in 0 : vector<9x256xf32>, vector<9x256xf32> -> vector<18x256xf32>
    %437 = arith.truncf %436 : vector<18x256xf32> to vector<18x256xbf16>
    %c1_75 = arith.constant 1 : index
    %c0_76 = arith.constant 0 : index
    %c0_77 = arith.constant 0 : index
    %438 = vector.load %arg2[%c1_75, %c0_76, %c0_77] : memref<2x256x32xbf16, #tpu.memory_space<vmem>>, vector<1x256x32xbf16>
    %439 = vector.shape_cast %438 : vector<1x256x32xbf16> to vector<256x32xbf16>
    %cst_78 = arith.constant dense<0.000000e+00> : vector<18x32xf32>
    %440 = tpu.matmul %437, %439, %cst_78 {dimension_numbers = #tpu.dot_dimension_numbers<[1], [0], [0], [1], [0, 0, 1, 1], [], []>} : vector<18x256xbf16>, vector<256x32xbf16>, vector<18x32xf32> -> vector<18x32xf32>
    %c1_79 = arith.constant 1 : index
    %c0_80 = arith.constant 0 : index
    %c0_81 = arith.constant 0 : index
    %441 = vector.load %arg3[%c1_79, %c0_80, %c0_81] : memref<2x1x32xf32, #tpu.memory_space<vmem>>, vector<1x1x32xf32>
    %442 = vector.shape_cast %441 : vector<1x1x32xf32> to vector<1x32xf32>
    %443 = vector.broadcast %442 : vector<1x32xf32> to vector<18x32xf32>
    %444 = arith.addf %440, %443 : vector<18x32xf32>
    %445 = arith.addf %444, %255 : vector<18x32xf32>
    %cst_82 = arith.constant dense<0.000000e+00> : vector<18xf32>
    %446 = vector.multi_reduction <add>, %445, %cst_82 [1] : vector<18x32xf32> to vector<18xf32>
    %447 = vector.shape_cast %446 : vector<18xf32> to vector<18x1xf32>
    %cst_83 = arith.constant 3.200000e+01 : f32
    %448 = vector.broadcast %cst_83 : f32 to vector<18x1xf32>
    %449 = arith.divf %447, %448 : vector<18x1xf32>
    %450 = vector.broadcast %449 : vector<18x1xf32> to vector<18x32xf32>
    %451 = arith.subf %445, %450 : vector<18x32xf32>
    %452 = arith.mulf %451, %451 : vector<18x32xf32>
    %cst_84 = arith.constant dense<0.000000e+00> : vector<18xf32>
    %453 = vector.multi_reduction <add>, %452, %cst_84 [1] : vector<18x32xf32> to vector<18xf32>
    %454 = vector.shape_cast %453 : vector<18xf32> to vector<18x1xf32>
    %cst_85 = arith.constant 3.200000e+01 : f32
    %455 = vector.broadcast %cst_85 : f32 to vector<18x1xf32>
    %456 = arith.divf %454, %455 : vector<18x1xf32>
    %457 = vector.broadcast %449 : vector<18x1xf32> to vector<18x32xf32>
    %458 = arith.subf %445, %457 : vector<18x32xf32>
    %cst_86 = arith.constant 9.99999974E-6 : f32
    %459 = vector.broadcast %cst_86 : f32 to vector<18x1xf32>
    %460 = arith.addf %456, %459 : vector<18x1xf32>
    %461 = math.rsqrt %460 : vector<18x1xf32>
    %462 = vector.broadcast %461 : vector<18x1xf32> to vector<18x32xf32>
    %463 = arith.mulf %458, %462 : vector<18x32xf32>
    %c1_87 = arith.constant 1 : index
    %c0_88 = arith.constant 0 : index
    %c0_89 = arith.constant 0 : index
    %464 = vector.load %arg4[%c1_87, %c0_88, %c0_89] : memref<2x1x32xf32, #tpu.memory_space<vmem>>, vector<1x1x32xf32>
    %465 = vector.shape_cast %464 : vector<1x1x32xf32> to vector<1x32xf32>
    %466 = vector.broadcast %465 : vector<1x32xf32> to vector<18x32xf32>
    %467 = arith.mulf %463, %466 : vector<18x32xf32>
    %c1_90 = arith.constant 1 : index
    %c0_91 = arith.constant 0 : index
    %c0_92 = arith.constant 0 : index
    %468 = vector.load %arg5[%c1_90, %c0_91, %c0_92] : memref<2x1x32xf32, #tpu.memory_space<vmem>>, vector<1x1x32xf32>
    %469 = vector.shape_cast %468 : vector<1x1x32xf32> to vector<1x32xf32>
    %470 = vector.broadcast %469 : vector<1x32xf32> to vector<18x32xf32>
    %471 = arith.addf %467, %470 : vector<18x32xf32>
    %472 = arith.truncf %471 : vector<18x32xf32> to vector<18x32xbf16>
    %c1_93 = arith.constant 1 : index
    %c0_94 = arith.constant 0 : index
    %c0_95 = arith.constant 0 : index
    %473 = vector.load %arg6[%c1_93, %c0_94, %c0_95] : memref<2x32x128xbf16, #tpu.memory_space<vmem>>, vector<1x32x128xbf16>
    %474 = vector.shape_cast %473 : vector<1x32x128xbf16> to vector<32x128xbf16>
    %cst_96 = arith.constant dense<0.000000e+00> : vector<18x128xf32>
    %475 = tpu.matmul %472, %474, %cst_96 {dimension_numbers = #tpu.dot_dimension_numbers<[1], [0], [0], [1], [0, 0, 1, 1], [], []>} : vector<18x32xbf16>, vector<32x128xbf16>, vector<18x128xf32> -> vector<18x128xf32>
    %c1_97 = arith.constant 1 : index
    %c0_98 = arith.constant 0 : index
    %c0_99 = arith.constant 0 : index
    %476 = vector.load %arg7[%c1_97, %c0_98, %c0_99] : memref<2x1x128xf32, #tpu.memory_space<vmem>>, vector<1x1x128xf32>
    %477 = vector.shape_cast %476 : vector<1x1x128xf32> to vector<1x128xf32>
    %478 = vector.broadcast %477 : vector<1x128xf32> to vector<18x128xf32>
    %479 = arith.addf %475, %478 : vector<18x128xf32>
    %cst_100 = arith.constant 0.000000e+00 : f32
    %480 = vector.broadcast %cst_100 : f32 to vector<18x128xf32>
    %481 = arith.maximumf %479, %480 : vector<18x128xf32>
    %482 = arith.truncf %481 : vector<18x128xf32> to vector<18x128xbf16>
    %c1_101 = arith.constant 1 : index
    %c0_102 = arith.constant 0 : index
    %c0_103 = arith.constant 0 : index
    %483 = vector.load %arg8[%c1_101, %c0_102, %c0_103] : memref<2x128x32xbf16, #tpu.memory_space<vmem>>, vector<1x128x32xbf16>
    %484 = vector.shape_cast %483 : vector<1x128x32xbf16> to vector<128x32xbf16>
    %cst_104 = arith.constant dense<0.000000e+00> : vector<18x32xf32>
    %485 = tpu.matmul %482, %484, %cst_104 {dimension_numbers = #tpu.dot_dimension_numbers<[1], [0], [0], [1], [0, 0, 1, 1], [], []>} : vector<18x128xbf16>, vector<128x32xbf16>, vector<18x32xf32> -> vector<18x32xf32>
    %c1_105 = arith.constant 1 : index
    %c0_106 = arith.constant 0 : index
    %c0_107 = arith.constant 0 : index
    %486 = vector.load %arg9[%c1_105, %c0_106, %c0_107] : memref<2x1x32xf32, #tpu.memory_space<vmem>>, vector<1x1x32xf32>
    %487 = vector.shape_cast %486 : vector<1x1x32xf32> to vector<1x32xf32>
    %488 = vector.broadcast %487 : vector<1x32xf32> to vector<18x32xf32>
    %489 = arith.addf %485, %488 : vector<18x32xf32>
    %490 = arith.addf %489, %471 : vector<18x32xf32>
    %cst_108 = arith.constant dense<0.000000e+00> : vector<18xf32>
    %491 = vector.multi_reduction <add>, %490, %cst_108 [1] : vector<18x32xf32> to vector<18xf32>
    %492 = vector.shape_cast %491 : vector<18xf32> to vector<18x1xf32>
    %cst_109 = arith.constant 3.200000e+01 : f32
    %493 = vector.broadcast %cst_109 : f32 to vector<18x1xf32>
    %494 = arith.divf %492, %493 : vector<18x1xf32>
    %495 = vector.broadcast %494 : vector<18x1xf32> to vector<18x32xf32>
    %496 = arith.subf %490, %495 : vector<18x32xf32>
    %497 = arith.mulf %496, %496 : vector<18x32xf32>
    %cst_110 = arith.constant dense<0.000000e+00> : vector<18xf32>
    %498 = vector.multi_reduction <add>, %497, %cst_110 [1] : vector<18x32xf32> to vector<18xf32>
    %499 = vector.shape_cast %498 : vector<18xf32> to vector<18x1xf32>
    %cst_111 = arith.constant 3.200000e+01 : f32
    %500 = vector.broadcast %cst_111 : f32 to vector<18x1xf32>
    %501 = arith.divf %499, %500 : vector<18x1xf32>
    %502 = vector.broadcast %494 : vector<18x1xf32> to vector<18x32xf32>
    %503 = arith.subf %490, %502 : vector<18x32xf32>
    %cst_112 = arith.constant 9.99999974E-6 : f32
    %504 = vector.broadcast %cst_112 : f32 to vector<18x1xf32>
    %505 = arith.addf %501, %504 : vector<18x1xf32>
    %506 = math.rsqrt %505 : vector<18x1xf32>
    %507 = vector.broadcast %506 : vector<18x1xf32> to vector<18x32xf32>
    %508 = arith.mulf %503, %507 : vector<18x32xf32>
    %c1_113 = arith.constant 1 : index
    %c0_114 = arith.constant 0 : index
    %c0_115 = arith.constant 0 : index
    %509 = vector.load %arg10[%c1_113, %c0_114, %c0_115] : memref<2x1x32xf32, #tpu.memory_space<vmem>>, vector<1x1x32xf32>
    %510 = vector.shape_cast %509 : vector<1x1x32xf32> to vector<1x32xf32>
    %511 = vector.broadcast %510 : vector<1x32xf32> to vector<18x32xf32>
    %512 = arith.mulf %508, %511 : vector<18x32xf32>
    %c1_116 = arith.constant 1 : index
    %c0_117 = arith.constant 0 : index
    %c0_118 = arith.constant 0 : index
    %513 = vector.load %arg11[%c1_116, %c0_117, %c0_118] : memref<2x1x32xf32, #tpu.memory_space<vmem>>, vector<1x1x32xf32>
    %514 = vector.shape_cast %513 : vector<1x1x32xf32> to vector<1x32xf32>
    %515 = vector.broadcast %514 : vector<1x32xf32> to vector<18x32xf32>
    %516 = arith.addf %512, %515 : vector<18x32xf32>
    %517 = arith.truncf %516 : vector<18x32xf32> to vector<18x32xbf16>
    %c0_119 = arith.constant 0 : index
    %c0_120 = arith.constant 0 : index
    %518 = vector.load %arg12[%c0_119, %c0_120] : memref<32x6xbf16, #tpu.memory_space<vmem>>, vector<32x6xbf16>
    %cst_121 = arith.constant dense<0.000000e+00> : vector<18x6xf32>
    %519 = tpu.matmul %517, %518, %cst_121 {dimension_numbers = #tpu.dot_dimension_numbers<[1], [0], [0], [1], [0, 0, 1, 1], [], []>} : vector<18x32xbf16>, vector<32x6xbf16>, vector<18x6xf32> -> vector<18x6xf32>
    %c0_122 = arith.constant 0 : index
    %c0_123 = arith.constant 0 : index
    %520 = vector.load %arg13[%c0_122, %c0_123] : memref<1x6xf32, #tpu.memory_space<vmem>>, vector<1x6xf32>
    %521 = vector.broadcast %520 : vector<1x6xf32> to vector<18x6xf32>
    %522 = arith.addf %519, %521 : vector<18x6xf32>
    %c0_124 = arith.constant 0 : index
    %c0_125 = arith.constant 0 : index
    %523 = vector.load %arg14[%c0_124, %c0_125] : memref<18x6xf32, #tpu.memory_space<vmem>>, vector<18x6xf32>
    tpu.vector_store %arg14[%c0_124, %c0_125], %522 {strides = array<i32>} : memref<18x6xf32, #tpu.memory_space<vmem>>, vector<18x6xf32>,
    return
  }
}

</mosaic_0001>

<bundles_post_ra>
// kernel: tpu_custom_call.1
= control target key start
LH: loop header
LB: loop body
LE: loop exit
PB: predicated region body
PF: predicated region fallthrough
CT: control target
= control target key end

     0   :  { %v10516_v1 = vmov 0   ;;  %vm127_vm0 = vcmask 261120   ;;  %v10546_v18 = vmov 0.0   ;;  %vm8111_vm1 = vmmov 0   ;;  %s8112_s18 = smov 96   ;;  %s8113_s19 = smov 64   ;;  %s10500_s1 = inlined_call_operand.vmem [shape: bf16[2,32,768], index: 1, kind: input, shape index: {}]   ;;  %s10501_s0 = inlined_call_operand.vmem [shape: f32[18,32], index: 0, kind: input, shape index: {}]   ;;  %s10502_s2 = inlined_call_operand.vmem [shape: bf16[2,256,32], index: 2, kind: input, shape index: {}]   ;;  %s10503_s3 = inlined_call_operand.vmem [shape: f32[2,1,32], index: 3, kind: input, shape index: {}]   ;;  %s10504_s6 = inlined_call_operand.vmem [shape: bf16[2,32,128], index: 6, kind: input, shape index: {}]   ;;  %s10505_s8 = inlined_call_operand.vmem [shape: bf16[2,128,32], index: 8, kind: input, shape index: {}]   ;;  %s10506_s4 = inlined_call_operand.vmem [shape: f32[2,1,32], index: 4, kind: input, shape index: {}]   ;;  %s10507_s5 = inlined_call_operand.vmem [shape: f32[2,1,32], index: 5, kind: input, shape index: {}]   ;;  %s10508_s7 = inlined_call_operand.vmem [shape: f32[2,1,128], index: 7, kind: input, shape index: {}]   ;;  %s10509_s9 = inlined_call_operand.vmem [shape: f32[2,1,32], index: 9, kind: input, shape index: {}]   ;;  %s10510_s10 = inlined_call_operand.vmem [shape: f32[2,1,32], index: 10, kind: input, shape index: {}]   ;;  %s10511_s11 = inlined_call_operand.vmem [shape: f32[2,1,32], index: 11, kind: input, shape index: {}]   ;;  %s10512_s15 = inlined_call_operand.vmem [shape: f32[2,8,9,9], index: 15, kind: output, shape index: {1}]   ;;  %s10513_s12 = inlined_call_operand.vmem [shape: bf16[32,6], index: 12, kind: input, shape index: {}]   ;;  %s10514_s13 = inlined_call_operand.vmem [shape: f32[1,6], index: 13, kind: input, shape index: {}]   ;;  %s10515_s14 = inlined_call_operand.vmem [shape: f32[18,6], index: 14, kind: output, shape index: {0}]  }
   0x1   :  { %v7736_v0 = vld [vmem:[%s10500_s1 + $0x4] ss:$24 sps:$4 sm:$0xff]   ;;  %166 = vmatprep.mubr.bf16.mxu0 %v10516_v1  ;;  %217 = vmatprep.mubr.bf16.mxu1 %v10516_v1  ;;  %v7740_v3 = vld [vmem:[%s10500_s1] ss:$24 sps:$4 sm:$0xff]   ;;  %v7742_v5 = vld [vmem:[%s10500_s1 + $0x34] ss:$24 sps:$4 sm:$0xff]  }
   0x2   :  { %v7738_v2 = vld [vmem:[%s10500_s1 + $0xc] ss:$24 sps:$4 sm:$0xff]   ;;  %134 = vmatprep.subr.bf16.mxu0 %v7736_v0  ;;  %v7741_v4 = vld [vmem:[%s10500_s1 + $0x8] ss:$24 sps:$4 sm:$0xff]   ;;  %v7744_v6 = vld [vmem:[%s10500_s1 + $0x3c] ss:$24 sps:$4 sm:$0xff]  }
   0x3   :  { %185 = vmatprep.subr.bf16.mxu1 %v7738_v2  ;;  %135 = vmatpush1.bf16.msra.mxu0 %v7740_v3  ;;  %v7746_v7 = vld [vmem:[%s10500_s1 + $0x30] ss:$24 sps:$4 sm:$0xff]   ;;  %v50_v9 = vld [vmem:[%s10501_s0] sm:$0xff]  ;;  %v7750_v12 = vld [vmem:[%s10500_s1 + $0x14] ss:$24 sps:$4 sm:$0xff]   ;;  %s8114_s20 = smov 32  }
   0x4   :  { %186 = vmatpush1.bf16.msra.mxu1 %v7741_v4  ;;  %136 = vmatprep.subr.bf16.mxu0 %v7742_v5  ;;  %v7747_v8 = vld [vmem:[%s10500_s1 + $0x38] ss:$24 sps:$4 sm:$0xff]   ;;  %v51_v10 = vld [vmem:[%s10501_s0 + $0x8] sm:$0xff]  ;;  %v7753_v14 = vld [vmem:[%s10500_s1 + $0x44] ss:$24 sps:$4 sm:$0xff]   ;;  %vm996_vm2 = vcmask 1043456  }
   0x5   :  { %187 = vmatprep.subr.bf16.mxu1 %v7744_v6  ;;  %v53_v11 = vpack.c.bf16 %v51_v10, %v50_v9  ;;  %v7748_v13 = vld [vmem:[%s10500_s1 + $0x10] ss:$24 sps:$4 sm:$0xff]   ;;  %v7751_v16 = vld [vmem:[%s10500_s1 + $0x40] ss:$24 sps:$4 sm:$0xff]   ;;  %vm997_vm3 = vcmask 1044480   ;;  %vm799_vm4 = vcmask 72704  }
   0x6   :  { %v52_v15 = vld [vmem:[%s10501_s0 + $0x10] sm:$0x3]  ;;  %vm803_vm5 = vcmask 65536   ;;  %vm1423_vm6 = vcmask 523264   ;;  %vm1426_vm7 = vcmask 785408   ;;  %vm2687_vm8 = vcmask 1040384  }
   0x7   :  { %137 = vmatpush1.bf16.msra.mxu0 %v7746_v7  ;;  %v54_v17 = vpack.c.bf16 %v52_v15, %v52_v15  ;;  %vm2896_vm9 = vcmask 254976   ;;  %vm6493_vm10 = vcmask 41984   ;;  %vm6490_vm11 = vcmask 48128  }
   0x8   :  { %188 = vmatpush1.bf16.msra.mxu1 %v7747_v8  ;;  %236 = vmatprep.subr.bf16.mxu0 %v7750_v12 }
   0x9   :  { %6981 = vmatprep.subr.bf16.mxu1 %v10546_v18 }
   0xa   :  { %6515 = vmatmul.mubr.msk.bf16.vlgmr.msra.gmra.mrb[0].mxu0 %vm127_vm0, %v53_v11 }
   0xb   :  { %6517 = vmatmul.mubr.msk.bf16.vlgmr.msra.gmra.mrb[0].mxu1 %vm127_vm0, %v53_v11  ;;  %176 = vmatprep.mubr.bf16.mxu0 %v10516_v1 }
   0xc   :  { %227 = vmatprep.mubr.bf16.mxu1 %v10516_v1  ;;  %237 = vmatpush1.bf16.msra.mxu0 %v7748_v13 }
   0xd   :  { %238 = vmatprep.subr.bf16.mxu0 %v7753_v14 }
  0x10   :  { %239 = vmatpush1.bf16.msra.mxu0 %v7751_v16 }
  0x11   :  { %6993 = vmatprep.subr.bf16.mxu0 %v10546_v18 }
  0x12   :  { %6516 = vmatmul.mubr.msk.bf16.gmra.mrb[4].mxu0 %vm127_vm0, %v54_v17 }
  0x13   :  { %6518 = vmatmul.mubr.msk.bf16.gmra.mrb[4].mxu1 %vm127_vm0, %v54_v17  ;;  %268 = vmatprep.mubr.bf16.mxu0 %v10516_v1 }
  0x14   :  { %6983 = vmatprep.mubr.msk.bf16.mxu1 %vm8111_vm1, %v10546_v18 }
  0x1a   :  { %6519 = vmatmul.mubr.msk.bf16.vlgmr.msra.gmra.mrb[8].mxu0 %vm127_vm0, %v53_v11 }
  0x1b   :  { %278 = vmatprep.mubr.bf16.mxu0 %v10516_v1 }
  0x22   :  { %6520 = vmatmul.mubr.msk.bf16.gmra.mrb[12].mxu0 %vm127_vm0, %v54_v17 }
  0x23   :  { %6995 = vmatprep.mubr.msk.bf16.mxu0 %vm8111_vm1, %v10546_v18 }
  0xdd   :  { %v168_v19 = vpop.f32.mrb[0].mxu0 }
  0xde   :  { %v219_v20 = vpop.f32.mrb[0].mxu1  ;;  %v8259_v21 = vpop.f32.mrb[1].mxu0 }
  0xdf   :  { %v8261_v22 = vpop.f32.mrb[1].mxu1  ;;  %v172_v23 = vpop.f32.mrb[2].mxu0 }
  0xe0   :  { %v223_v24 = vpop.f32.mrb[2].mxu1  ;;  %v407_v25 = vpack.c.bf16 %v172_v23, %v168_v19  ;;  %v7446_v28 = vpack.i.bf16 %v172_v23, %v168_v19  ;;  %v8265_v30 = vpop.f32.mrb[3].mxu0 }
  0xe1   :  { %v8263_v26 = vpop.f32.mrb[3].mxu1  ;;  %v7436_v27 = vpack.i.bf16 %v223_v24, %v219_v20  ;;  %v415_v29 = vpack.c.bf16 %v223_v24, %v219_v20  ;;  %v411_v31 = vpack.c.bf16 %v8265_v30, %v8259_v21  ;;  %v7476_v34 = vpack.i.bf16 %v8265_v30, %v8259_v21 }
  0xe2   :  { %7447 = vrot.lane.b32.xlu1 %v7446_v28, %s8112_s18  ;;  %v7466_v33 = vpack.i.bf16 %v8263_v26, %v8261_v22  ;;  %v419_v35 = vpack.c.bf16 %v8263_v26, %v8261_v22 }
  0xe3   :  { %7437 = vrot.lane.b32.xlu0 %v7436_v27, %s8112_s18  ;;  %v427_v32 = vsel %vm127_vm0, %v415_v29, 0 }
  0xe4   :  { %6982 = vmatpush3.bf16.xpose.msra.mxu1 %v427_v32 }
  0xe5   :  { %6987 = vmatprep.subr.bf16.mxu1 %v10546_v18  ;;  %v8279_v36 = vpop.f32.mrb[4].mxu0 }
  0xe6   :  { %v8281_v37 = vpop.f32.mrb[4].mxu1  ;;  %v8284_v38 = vpack.c.bf16 %v8279_v36, %v172_v23  ;;  %7452 = vrot.lane.b32.xlu1 %v7436_v27, %s8114_s20  ;;  %v8293_v41 = vpop.f32.mrb[5].mxu0 }
  0xe7   :  { %v8287_v39 = vpack.c.bf16 %v8281_v37, %v223_v24  ;;  %7442 = vrot.lane.b32.xlu0 %v7436_v27, %s8113_s19  ;;  %v8290_v40 = vpop.f32.mrb[5].mxu1  ;;  %v8301_v43 = vpack.c.bf16 %v8293_v41, %v8265_v30  ;;  %v182_v44 = vpop.f32.mrb[6].mxu0 }
  0xe8   :  { %v8297_v42 = vpack.c.bf16 %v8290_v40, %v8263_v26  ;;  %v233_v45 = vpop.f32.mrb[6].mxu1  ;;  %v183_v46 = vpop.f32.mrb[7].mxu0 }
  0xe9   :  { %v234_v47 = vpop.f32.mrb[7].mxu1  ;;  %v615_v45 = vsel %vm127_vm0, %v419_v35, 0 }
  0xea   :  { %7462 = vrot.lane.b32.xlu1 %v7446_v28, %s8114_s20 }
  0xeb   :  { %7457 = vrot.lane.b32.xlu0 %v7446_v28, %s8113_s19  ;;  %6984 = vmatmul.mubr.msk.bf16.vlgmr.msra.gmra.mrb[8].mxu1 %vm127_vm0, %v407_v25 }
  0xec   :  { %6989 = vmatprep.mubr.msk.bf16.mxu1 %vm8111_vm1, %v10546_v18 }
  0xed   :  { %v8314_v48 = vpop.f32.mrb[8].mxu0 }
  0xee   :  { %7472 = vrot.lane.b32.xlu1 %v7466_v33, %s8113_s19  ;;  %v8316_v49 = vpop.f32.mrb[9].mxu0 }
  0xef   :  { %7467 = vrot.lane.b32.xlu0 %v7466_v33, %s8112_s18  ;;  %v8318_v50 = vpop.f32.mrb[10].mxu0 }
  0xf0   :  { %v985_v51 = vpack.c.bf16 %v8318_v50, %v8314_v48  ;;  %v8324_v52 = vpack.i.bf16 %v8318_v50, %v8314_v48  ;;  %v8330_v53 = vpop.f32.mrb[11].mxu0 }
  0xf1   :  { %v989_v54 = vpack.c.bf16 %v8330_v53, %v8316_v49 }
  0xf2   :  { %7482 = vrot.lane.b32.xlu1 %v7466_v33, %s8114_s20 }
  0xf3   :  { %7477 = vrot.lane.b32.xlu0 %v7476_v34, %s8112_s18 }
  0xf5   :  { %v8334_v55 = vpop.f32.mrb[12].mxu0 }
  0xf6   :  { %7492 = vrot.lane.b32.xlu1 %v7476_v34, %s8114_s20  ;;  %v8338_v56 = vpack.c.bf16 %v8334_v55, %v8318_v50  ;;  %v8340_v57 = vpop.f32.mrb[13].mxu0  ;;  %v8468_v50 = vpack.i.bf16 %v8330_v53, %v8316_v49 }
  0xf7   :  { %7487 = vrot.lane.b32.xlu0 %v7476_v34, %s8113_s19  ;;  %v8344_v58 = vpack.c.bf16 %v8340_v57, %v8330_v53  ;;  %v284_v59 = vpop.f32.mrb[14].mxu0 }
  0xf8   :  { %v285_v60 = vpop.f32.mrb[15].mxu0 }
  0xfa   :  { %7497 = vrot.lane.b32.xlu1 %v8324_v52, %s8112_s18 }
  0xfe   :  { %7502 = vrot.lane.b32.xlu1 %v8324_v52, %s8113_s19 }
 0x154   :  { %v8348_v62 = vpop.permute.xlu1 %7447 }
 0x155   :  { %v8346_v61 = vpop.permute.xlu0 %7437  ;;  %v10527_v11 = vunpack.i.h.bf16 %v8348_v62  ;;  %v7449_v12 = vunpack.i.l.bf16 %v8348_v62 }
 0x156   :  { %v7440_v63 = vunpack.i.h.bf16 %v8346_v61  ;;  %v7439_v0 = vunpack.i.l.bf16 %v8346_v61 }
 0x157   :  { %v408_v17 = vpack.c.bf16 %v10527_v11, %v7449_v12 }
 0x158   :  { %v416_v2 = vpack.c.bf16 %v7440_v63, %v7439_v0  ;;  %v8356_v4 = vpop.permute.xlu1 %7452 }
 0x159   :  { %v8354_v3 = vpop.permute.xlu0 %7442  ;;  %v7455_v7 = vunpack.i.h.bf16 %v8356_v4  ;;  %v7454_v8 = vunpack.i.l.bf16 %v8356_v4 }
 0x15a   :  { %v7445_v5 = vunpack.i.h.bf16 %v8354_v3  ;;  %v7444_v6 = vunpack.i.l.bf16 %v8354_v3  ;;  %v474_v9 = vsel %vm127_vm0, %v416_v2, 0 }
 0x15b   :  { %6988 = vmatpush3.bf16.xpose.msra.mxu1 %v474_v9  ;;  %v418_v16 = vpack.c.bf16 %v7455_v7, %v7454_v8  ;;  %v8115_v9 = vmov 65535  }
 0x15c   :  { %v417_v10 = vpack.c.bf16 %v7445_v5, %v7444_v6  ;;  %v8369_v14 = vpop.permute.xlu1 %7462  ;;  %6999 = vmatprep.subr.bf16.mxu1 %v10546_v18 }
 0x15d   :  { %v8367_v13 = vpop.permute.xlu0 %7457  ;;  %v568_v28 = vsel %vm127_vm0, %v418_v16, 0  ;;  %v10523_v32 = vunpack.i.h.bf16 %v8369_v14  ;;  %v7464_v33 = vunpack.i.l.bf16 %v8369_v14 }
 0x15e   :  { %v521_v15 = vsel %vm127_vm0, %v417_v10, 0  ;;  %v10526_v19 = vunpack.i.h.bf16 %v8367_v13  ;;  %v7459_v20 = vunpack.i.l.bf16 %v8367_v13  ;;  %v998_v10 = vsel %vm996_vm2, 4294967295, %v8115_v9 }
 0x15f   :  { %6994 = vmatpush3.bf16.xpose.msra.mxu0 %v521_v15  ;;  %v410_v60 = vpack.c.bf16 %v10523_v32, %v7464_v33  ;;  %v8440_v21 = vsel %vm997_vm3, %v998_v10, 0 }
 0x160   :  { %7005 = vmatprep.subr.bf16.mxu0 %v10546_v18  ;;  %v8382_v24 = vpop.permute.xlu1 %7472  ;;  %v409_v29 = vpack.c.bf16 %v10526_v19, %v7459_v20 }
 0x161   :  { %v8379_v23 = vpop.permute.xlu0 %7467  ;;  %v10525_v34 = vunpack.i.h.bf16 %v8382_v24  ;;  %v7474_v44 = vunpack.i.l.bf16 %v8382_v24 }
 0x162   :  { %v10524_v25 = vunpack.i.h.bf16 %v8379_v23  ;;  %v7469_v27 = vunpack.i.l.bf16 %v8379_v23  ;;  %6990 = vmatmul.mubr.msk.bf16.vlgmr.msra.gmra.mrb[12].mxu1 %vm127_vm0, %v408_v17 }
 0x163   :  { %7000 = vmatpush3.bf16.xpose.msra.mxu1 %v568_v28  ;;  %7001 = vmatprep.mubr.msk.bf16.mxu1 %vm8111_vm1, %v10546_v18  ;;  %v421_v0 = vpack.c.bf16 %v10525_v34, %v7474_v44 }
 0x164   :  { %7011 = vmatprep.subr.bf16.mxu1 %v10546_v18  ;;  %v420_v46 = vpack.c.bf16 %v10524_v25, %v7469_v27  ;;  %v8404_v47 = vpop.permute.xlu1 %7482  ;;  %v1001_v27 = vand.u32 %v8440_v21, %v985_v51 }
 0x165   :  { %v8406_v59 = vpop.permute.xlu0 %7477  ;;  %v10522_v22 = vunpack.i.h.bf16 %v8404_v47  ;;  %v7484_v26 = vunpack.i.l.bf16 %v8404_v47  ;;  %v709_v12 = vsel %vm127_vm0, %v421_v0, 0 }
 0x166   :  { %6996 = vmatmul.mubr.msk.bf16.vlgmr.msra.gmra.mrb[16].mxu0 %vm127_vm0, %v409_v29  ;;  %v662_v35 = vsel %vm127_vm0, %v420_v46, 0  ;;  %v10521_v2 = vunpack.i.h.bf16 %v8406_v59  ;;  %v7479_v6 = vunpack.i.l.bf16 %v8406_v59 }
 0x167   :  { %7006 = vmatpush3.bf16.xpose.msra.mxu0 %v615_v45  ;;  %7007 = vmatprep.mubr.msk.bf16.mxu0 %vm8111_vm1, %v10546_v18  ;;  %v422_v15 = vpack.c.bf16 %v10522_v22, %v7484_v26 }
 0x168   :  { %7017 = vmatprep.subr.bf16.mxu0 %v10546_v18  ;;  %v412_v16 = vpack.c.bf16 %v10521_v2, %v7479_v6  ;;  %v8442_v30 = vpop.permute.xlu1 %7492 }
 0x169   :  { %v8424_v8 = vpop.permute.xlu0 %7487  ;;  %v10518_v28 = vunpack.i.h.bf16 %v8442_v30  ;;  %v7494_v29 = vunpack.i.l.bf16 %v8442_v30 }
 0x16a   :  { %7002 = vmatmul.mubr.msk.bf16.vlgmr.msra.gmra.mrb[16].mxu1 %vm127_vm0, %v410_v60  ;;  %v10520_v17 = vunpack.i.h.bf16 %v8424_v8  ;;  %v7489_v20 = vunpack.i.l.bf16 %v8424_v8 }
 0x16b   :  { %7012 = vmatpush3.bf16.xpose.msra.mxu1 %v662_v35  ;;  %7013 = vmatprep.mubr.msk.bf16.mxu1 %vm8111_vm1, %v10546_v18  ;;  %v414_v48 = vpack.c.bf16 %v10518_v28, %v7494_v29 }
 0x16c   :  { %7023 = vmatprep.subr.bf16.mxu1 %v10546_v18  ;;  %v413_v33 = vpack.c.bf16 %v10520_v17, %v7489_v20  ;;  %v8478_v35 = vpop.permute.xlu1 %7497 }
 0x16d   :  { %v10519_v0 = vunpack.i.h.bf16 %v8478_v35  ;;  %v7499_v6 = vunpack.i.l.bf16 %v8478_v35 }
 0x16e   :  { %7008 = vmatmul.mubr.msk.bf16.vlgmr.msra.gmra.mrb[20].mxu0 %vm127_vm0, %v411_v31  ;;  %v756_v31 = vsel %vm127_vm0, %v422_v15, 0 }
 0x16f   :  { %7018 = vmatpush3.bf16.xpose.msra.mxu0 %v709_v12  ;;  %7019 = vmatprep.mubr.msk.bf16.mxu0 %vm8111_vm1, %v10546_v18  ;;  %v986_v9 = vpack.c.bf16 %v10519_v0, %v7499_v6 }
 0x170   :  { %7029 = vmatprep.subr.bf16.mxu0 %v10546_v18 }
 0x171   :  { %v1048_v10 = vand.u32 %v8440_v21, %v986_v9 }
 0x172   :  { %7014 = vmatmul.mubr.msk.bf16.vlgmr.msra.gmra.mrb[20].mxu1 %vm127_vm0, %v412_v16 }
 0x173   :  { %7024 = vmatpush3.bf16.xpose.msra.mxu1 %v756_v31  ;;  %7025 = vmatprep.mubr.msk.bf16.mxu1 %vm8111_vm1, %v10546_v18 }
 0x174   :  { %7035 = vmatprep.subr.bf16.mxu1 %v10546_v18 }
 0x176   :  { %7020 = vmatmul.mubr.msk.bf16.vlgmr.msra.gmra.mrb[24].mxu0 %vm127_vm0, %v413_v33 }
 0x177   :  { %7030 = vmatpush3.bf16.msra.mxu0 %v1001_v27  ;;  %7031 = vmatprep.mubr.msk.bf16.mxu0 %vm8111_vm1, %v10546_v18 }
 0x178   :  { %7041 = vmatprep.subr.bf16.mxu0 %v10546_v18 }
 0x17a   :  { %7026 = vmatmul.mubr.msk.bf16.vlgmr.msra.gmra.mrb[24].mxu1 %vm127_vm0, %v414_v48 }
 0x17b   :  { %7037 = vmatprep.mubr.msk.bf16.mxu1 %vm8111_vm1, %v10546_v18  ;;  %7036 = vmatpush3.bf16.msra.mxu1 %v1048_v10 }
 0x17c   :  { %7047 = vmatprep.subr.bf16.mxu1 %v10546_v18 }
 0x1be   :  { %v8470_v51 = vpop.f32.mrb[8].mxu1 }
 0x1bf   :  { %v6985_v44 = vpop.f32.mrb[9].mxu1  ;;  %v800_v45 = vsel %vm799_vm4, %v8470_v51, -inf }
 0x1c0   :  { %v8474_v46 = vpop.f32.mrb[10].mxu1  ;;  %801 = vmax.xlane.f32.xlu0 %v800_v45 }
 0x1c1   :  { %v6986_v60 = vpop.f32.mrb[11].mxu1  ;;  %v804_v26 = vsel %vm803_vm5, %v8474_v46, -inf }
 0x1c2   :  { %805 = vmax.xlane.f32.xlu1 %v804_v26 }
 0x235   :  { %v8486_v12 = vpop.f32.mrb[12].mxu1 }
 0x236   :  { %v6991_v15 = vpop.f32.mrb[13].mxu1  ;;  %v807_v16 = vsel %vm799_vm4, %v8486_v12, -inf }
 0x237   :  { %v8490_v20 = vpop.f32.mrb[14].mxu1  ;;  %808 = vmax.xlane.f32.xlu0 %v807_v16 }
 0x238   :  { %v6992_v31 = vpop.f32.mrb[15].mxu1  ;;  %v810_v33 = vsel %vm803_vm5, %v8490_v20, -inf }
 0x239   :  { %v8492_v27 = vpop.f32.mrb[16].mxu0 }
 0x23a   :  { %v6997_v29 = vpop.f32.mrb[17].mxu0  ;;  %v813_v48 = vsel %vm799_vm4, %v8492_v27, -inf }
 0x23b   :  { %811 = vmax.xlane.f32.xlu0 %v810_v33  ;;  %814 = vmax.xlane.f32.xlu1 %v813_v48  ;;  %v8498_v44 = vpop.f32.mrb[18].mxu0 }
 0x23c   :  { %v6998_v45 = vpop.f32.mrb[19].mxu0  ;;  %v816_v9 = vsel %vm803_vm5, %v8498_v44, -inf }
 0x23d   :  { %v8500_v60 = vpop.f32.mrb[16].mxu1 }
 0x23e   :  { %v7003_v26 = vpop.f32.mrb[17].mxu1  ;;  %v819_v6 = vsel %vm799_vm4, %v8500_v60, -inf }
 0x23f   :  { %v8506_v10 = vpop.f32.mrb[18].mxu1  ;;  %820 = vmax.xlane.f32.xlu1 %v819_v6  ;;  %817 = vmax.xlane.f32.xlu0 %v816_v9 }
 0x240   :  { %v7004_v15 = vpop.f32.mrb[19].mxu1  ;;  %v822_v29 = vsel %vm803_vm5, %v8506_v10, -inf }
 0x241   :  { %v8508_v16 = vpop.f32.mrb[20].mxu0 }
 0x242   :  { %v7009_v31 = vpop.f32.mrb[21].mxu0  ;;  %v825_v33 = vsel %vm799_vm4, %v8508_v16, -inf }
 0x243   :  { %823 = vmax.xlane.f32.xlu0 %v822_v29  ;;  %826 = vmax.xlane.f32.xlu1 %v825_v33  ;;  %v8514_v48 = vpop.f32.mrb[22].mxu0 }
 0x244   :  { %v7010_v45 = vpop.f32.mrb[23].mxu0  ;;  %v828_v9 = vsel %vm803_vm5, %v8514_v48, -inf }
 0x245   :  { %v8516_v26 = vpop.f32.mrb[20].mxu1 }
 0x246   :  { %v7015_v1 = vpop.f32.mrb[21].mxu1  ;;  %v831_v6 = vsel %vm799_vm4, %v8516_v26, -inf }
 0x247   :  { %v8522_v15 = vpop.f32.mrb[22].mxu1  ;;  %832 = vmax.xlane.f32.xlu1 %v831_v6  ;;  %829 = vmax.xlane.f32.xlu0 %v828_v9 }
 0x248   :  { %v7016_v31 = vpop.f32.mrb[23].mxu1  ;;  %v834_v33 = vsel %vm803_vm5, %v8522_v15, -inf }
 0x249   :  { %v8524_v28 = vpop.f32.mrb[24].mxu0 }
 0x24a   :  { %v7021_v29 = vpop.f32.mrb[25].mxu0  ;;  %v837_v1 = vsel %vm799_vm4, %v8524_v28, -inf }
 0x24b   :  { %835 = vmax.xlane.f32.xlu0 %v834_v33  ;;  %838 = vmax.xlane.f32.xlu1 %v837_v1  ;;  %v8530_v45 = vpop.f32.mrb[26].mxu0 }
 0x24c   :  { %v7022_v0 = vpop.f32.mrb[27].mxu0  ;;  %v840_v9 = vsel %vm803_vm5, %v8530_v45, -inf }
 0x24d   :  { %v8532_v17 = vpop.f32.mrb[24].mxu1 }
 0x24e   :  { %v7027_v2 = vpop.f32.mrb[25].mxu1  ;;  %v843_v6 = vsel %vm799_vm4, %v8532_v17, -inf }
 0x24f   :  { %v8538_v31 = vpop.f32.mrb[26].mxu1  ;;  %844 = vmax.xlane.f32.xlu1 %v843_v6  ;;  %841 = vmax.xlane.f32.xlu0 %v840_v9  ;;  %v8548_v2 = vpop.permute.xlu1 %7502 }
 0x250   :  { %v7028_v29 = vpop.f32.mrb[27].mxu1  ;;  %v846_v33 = vsel %vm803_vm5, %v8538_v31, -inf  ;;  %v802_v9 = vpop.xlane.xlu0 %801 }
 0x251   :  { %v849_v29 = vsub.f32 %v8470_v51, %v802_v9 }
 0x253   :  { %847 = vmax.xlane.f32.xlu0 %v846_v33  ;;  %v806_v0 = vpop.xlane.xlu1 %805  ;;  %v865_v33 = vmul.f32 1.442695, %v849_v29 }
 0x254   :  { %v850_v1 = vsub.f32 %v8474_v46, %v806_v0 }
 0x256   :  { %v867_v6 = vmul.f32 1.442695, %v850_v1 }
 0x258   :  { %7826 = vpow2.f32 %v867_v6 }
 0x259   :  { %7828 = vpow2.f32 %v865_v33 }
 0x260   :  { %7512 = vrot.lane.b32.xlu1 %v8468_v50, %s8112_s18 }
 0x262   :  { %v8556_v22 = vpop.eup %7826 }
 0x264   :  { %7517 = vrot.lane.b32.xlu1 %v8468_v50, %s8113_s19 }
 0x268   :  { %7522 = vrot.lane.b32.xlu1 %v8468_v50, %s8114_s20  ;;  %v900_v50 = vsel %vm803_vm5, %v8556_v22, 0.0 }
 0x269   :  { %7507 = vrot.lane.b32.xlu0 %v8324_v52, %s8114_s20  ;;  %v8560_v52 = vpop.eup %7828 }
 0x26a   :  { %v897_v32 = vsel %vm799_vm4, %v8560_v52, 0.0 }
 0x26c   :  { %1456 = vrot.lane.b32.xlu1 %v8281_v37, %s8112_s18 }
 0x288   :  { %901 = vadd.xlane.f32.xlu0 %v900_v50 }
 0x290   :  { %898 = vadd.xlane.f32.xlu1 %v897_v32 }
 0x2c4   :  { %v809_v46 = vpop.xlane.xlu0 %808 }
 0x2c5   :  { %v851_v0 = vsub.f32 %v8486_v12, %v809_v46 }
 0x2c7   :  { %v869_v1 = vmul.f32 1.442695, %v851_v0 }
 0x2c8   :  { %v812_v51 = vpop.xlane.xlu0 %811  ;;  %v815_v6 = vpop.xlane.xlu1 %814 }
 0x2c9   :  { %7830 = vpow2.f32 %v869_v1  ;;  %v852_v9 = vsub.f32 %v8490_v20, %v812_v51  ;;  %v853_v29 = vsub.f32 %v8492_v27, %v815_v6 }
 0x2cb   :  { %v871_v33 = vmul.f32 1.442695, %v852_v9  ;;  %v873_v25 = vmul.f32 1.442695, %v853_v29 }
 0x2cc   :  { %v821_v50 = vpop.xlane.xlu1 %820  ;;  %v818_v34 = vpop.xlane.xlu0 %817 }
 0x2cd   :  { %7832 = vpow2.f32 %v871_v33  ;;  %v855_v19 = vsub.f32 %v8500_v60, %v821_v50  ;;  %v854_v32 = vsub.f32 %v8498_v44, %v818_v34 }
 0x2ce   :  { %7834 = vpow2.f32 %v873_v25 }
 0x2cf   :  { %v877_v11 = vmul.f32 1.442695, %v855_v19  ;;  %v875_v12 = vmul.f32 1.442695, %v854_v32 }
 0x2d0   :  { %v824_v46 = vpop.xlane.xlu0 %823  ;;  %v827_v0 = vpop.xlane.xlu1 %826 }
 0x2d1   :  { %7836 = vpow2.f32 %v877_v11  ;;  %v856_v1 = vsub.f32 %v8506_v10, %v824_v46  ;;  %v857_v20 = vsub.f32 %v8508_v16, %v827_v0 }
 0x2d2   :  { %7838 = vpow2.f32 %v875_v12 }
 0x2d3   :  { %v8571_v27 = vpop.eup %7830  ;;  %v879_v51 = vmul.f32 1.442695, %v856_v1  ;;  %v881_v6 = vmul.f32 1.442695, %v857_v20 }
 0x2d4   :  { %v833_v9 = vpop.xlane.xlu1 %832  ;;  %v830_v29 = vpop.xlane.xlu0 %829  ;;  %v903_v34 = vsel %vm799_vm4, %v8571_v27, 0.0 }
 0x2d5   :  { %7840 = vpow2.f32 %v879_v51  ;;  %v859_v19 = vsub.f32 %v8516_v26, %v833_v9  ;;  %v858_v25 = vsub.f32 %v8514_v48, %v830_v29  ;;  %904 = vadd.xlane.f32.xlu1 %v903_v34 }
 0x2d6   :  { %7842 = vpow2.f32 %v881_v6 }
 0x2d7   :  { %v8577_v11 = vpop.eup %7832  ;;  %v885_v44 = vmul.f32 1.442695, %v859_v19  ;;  %v883_v60 = vmul.f32 1.442695, %v858_v25 }
 0x2d8   :  { %v8579_v10 = vpop.eup %7834  ;;  %v836_v16 = vpop.xlane.xlu0 %835  ;;  %v906_v50 = vsel %vm803_vm5, %v8577_v11, 0.0 }
 0x2d9   :  { %v839_v33 = vpop.xlane.xlu1 %838  ;;  %7844 = vpow2.f32 %v885_v44  ;;  %v860_v32 = vsub.f32 %v8522_v15, %v836_v16  ;;  %v909_v48 = vsel %vm799_vm4, %v8579_v10, 0.0  ;;  %907 = vadd.xlane.f32.xlu0 %v906_v50 }
 0x2da   :  { %v861_v26 = vsub.f32 %v8524_v28, %v839_v33  ;;  %7846 = vpow2.f32 %v883_v60  ;;  %910 = vadd.xlane.f32.xlu1 %v909_v48 }
 0x2db   :  { %v8587_v12 = vpop.eup %7836  ;;  %v887_v51 = vmul.f32 1.442695, %v860_v32 }
 0x2dc   :  { %v889_v46 = vmul.f32 1.442695, %v861_v26  ;;  %v8589_v0 = vpop.eup %7838  ;;  %v842_v1 = vpop.xlane.xlu0 %841  ;;  %v915_v20 = vsel %vm799_vm4, %v8587_v12, 0.0 }
 0x2dd   :  { %v862_v15 = vsub.f32 %v8530_v45, %v842_v1  ;;  %v912_v28 = vsel %vm803_vm5, %v8589_v0, 0.0  ;;  %v845_v6 = vpop.xlane.xlu1 %844 }
 0x2de   :  { %7848 = vpow2.f32 %v889_v46  ;;  %916 = vadd.xlane.f32.xlu1 %v915_v20  ;;  %913 = vadd.xlane.f32.xlu0 %v912_v28  ;;  %v863_v19 = vsub.f32 %v8532_v17, %v845_v6 }
 0x2df   :  { %v8596_v9 = vpop.eup %7840  ;;  %7850 = vpow2.f32 %v887_v51  ;;  %v891_v25 = vmul.f32 1.442695, %v862_v15 }
 0x2e0   :  { %v8598_v29 = vpop.eup %7842  ;;  %v918_v34 = vsel %vm803_vm5, %v8596_v9, 0.0  ;;  %v848_v44 = vpop.xlane.xlu0 %847  ;;  %v893_v50 = vmul.f32 1.442695, %v863_v19 }
 0x2e1   :  { %v921_v45 = vsel %vm799_vm4, %v8598_v29, 0.0  ;;  %7852 = vpow2.f32 %v891_v25  ;;  %v864_v32 = vsub.f32 %v8538_v31, %v848_v44  ;;  %v8642_v19 = vpop.permute.xlu1 %7512 }
 0x2e2   :  { %919 = vadd.xlane.f32.xlu0 %v918_v34  ;;  %922 = vadd.xlane.f32.xlu1 %v921_v45  ;;  %7854 = vpow2.f32 %v893_v50 }
 0x2e3   :  { %v8605_v60 = vpop.eup %7844  ;;  %v895_v48 = vmul.f32 1.442695, %v864_v32  ;;  %v10528_v32 = vunpack.i.h.bf16 %v8548_v2 }
 0x2e4   :  { %v8607_v16 = vpop.eup %7846  ;;  %v927_v33 = vsel %vm799_vm4, %v8605_v60, 0.0  ;;  %v8656_v44 = vpop.permute.xlu0 %7507 }
 0x2e5   :  { %v924_v17 = vsel %vm803_vm5, %v8607_v16, 0.0  ;;  %7856 = vpow2.f32 %v895_v48  ;;  %v8648_v25 = vpop.permute.xlu1 %7517 }
 0x2e6   :  { %928 = vadd.xlane.f32.xlu1 %v927_v33  ;;  %925 = vadd.xlane.f32.xlu0 %v924_v17  ;;  %v7504_v17 = vunpack.i.l.bf16 %v8548_v2 }
 0x2e8   :  { %v8614_v26 = vpop.eup %7848 }
 0x2e9   :  { %v933_v46 = vsel %vm799_vm4, %v8614_v26, 0.0  ;;  %v8618_v1 = vpop.eup %7850 }
 0x2ea   :  { %934 = vadd.xlane.f32.xlu0 %v933_v46  ;;  %v930_v20 = vsel %vm803_vm5, %v8618_v1, 0.0  ;;  %v987_v46 = vpack.c.bf16 %v10528_v32, %v7504_v17  ;;  %v7509_v17 = vunpack.i.l.bf16 %v8656_v44 }
 0x2eb   :  { %v8622_v31 = vpop.eup %7852 }
 0x2ec   :  { %v936_v51 = vsel %vm803_vm5, %v8622_v31, 0.0  ;;  %v8626_v15 = vpop.eup %7854 }
 0x2ed   :  { %v939_v28 = vsel %vm799_vm4, %v8626_v15, 0.0 }
 0x2ee   :  { %931 = vadd.xlane.f32.xlu0 %v930_v20 }
 0x2ef   :  { %v8630_v6 = vpop.eup %7856 }
 0x2f0   :  { %v942_v34 = vsel %vm803_vm5, %v8630_v6, 0.0 }
 0x2f2   :  { %937 = vadd.xlane.f32.xlu0 %v936_v51 }
 0x2f6   :  { %940 = vadd.xlane.f32.xlu0 %v939_v28  ;;  %v1095_v28 = vand.u32 %v8440_v21, %v987_v46 }
 0x2f7   :  { %1459 = vrot.lane.b32.xlu1 %v8281_v37, %s8113_s19 }
 0x2fa   :  { %943 = vadd.xlane.f32.xlu0 %v942_v34 }
 0x2fb   :  { %1462 = vrot.lane.b32.xlu1 %v8281_v37, %s8114_s20  ;;  %v8654_v37 = vpop.permute.xlu1 %7522 }
 0x2ff   :  { %1442 = vrot.lane.b32.xlu1 %v8279_v36, %s8114_s20  ;;  %v8660_v45 = vpop.permute.xlu1 %1456 }
 0x303   :  { %1469 = vrot.lane.b32.xlu1 %v8290_v40, %s8113_s19 }
 0x307   :  { %1472 = vrot.lane.b32.xlu1 %v8290_v40, %s8114_s20 }
 0x30b   :  { %1452 = vrot.lane.b32.xlu1 %v8293_v41, %s8114_s20 }
 0x30f   :  { %1476 = vrot.lane.b32.xlu1 %v8334_v55, %s8112_s18 }
 0x310   :  { %1436 = vrot.lane.b32.xlu0 %v8279_v36, %s8112_s18 }
 0x314   :  { %1439 = vrot.lane.b32.xlu0 %v8279_v36, %s8113_s19 }
 0x315   :  { %v902_v33 = vpop.xlane.xlu0 %901 }
 0x316   :  { %7858 = vrcp.f32 %v902_v33 }
 0x318   :  { %1466 = vrot.lane.b32.xlu0 %v8290_v40, %s8112_s18 }
 0x31c   :  { %1446 = vrot.lane.b32.xlu0 %v8293_v41, %s8112_s18 }
 0x31d   :  { %v899_v50 = vpop.xlane.xlu1 %898 }
 0x31e   :  { %7860 = vrcp.f32 %v899_v50 }
 0x320   :  { %1449 = vrot.lane.b32.xlu0 %v8293_v41, %s8113_s19  ;;  %v7859_v36 = vpop.eup %7858 }
 0x321   :  { %v962_v40 = vmul.f32 %v7859_v36, %v8556_v22 }
 0x328   :  { %v7861_v48 = vpop.eup %7860 }
 0x329   :  { %v961_v20 = vmul.f32 %v7861_v48, %v8560_v52  ;;  %v7510_v52 = vunpack.i.h.bf16 %v8656_v44  ;;  %v2410_v44 = vshll.u32 %v8344_v58, 16 }
 0x32b   :  { %v977_v51 = vpack.c.bf16 %v962_v40, %v961_v20  ;;  %v988_v40 = vpack.c.bf16 %v7510_v52, %v7509_v17 }
 0x32d   :  { %7032 = vmatmul.mubr.msk.bf16.vlgmr.msra.gmra.mrb[28].mxu0 %vm799_vm4, %v977_v51  ;;  %v1142_v32 = vand.u32 %v8440_v21, %v988_v40 }
 0x32e   :  { %7042 = vmatpush3.bf16.msra.mxu0 %v1095_v28  ;;  %7043 = vmatprep.mubr.msk.bf16.mxu0 %vm8111_vm1, %v10546_v18 }
 0x32f   :  { %7053 = vmatprep.subr.bf16.mxu0 %v10546_v18 }
 0x362   :  { %v905_v41 = vpop.xlane.xlu1 %904 }
 0x363   :  { %7862 = vrcp.f32 %v905_v41 }
 0x366   :  { %v908_v34 = vpop.xlane.xlu0 %907 }
 0x367   :  { %v911_v33 = vpop.xlane.xlu1 %910  ;;  %7864 = vrcp.f32 %v908_v34 }
 0x368   :  { %7866 = vrcp.f32 %v911_v33 }
 0x36b   :  { %v917_v22 = vpop.xlane.xlu1 %916  ;;  %v914_v50 = vpop.xlane.xlu0 %913 }
 0x36c   :  { %7868 = vrcp.f32 %v914_v50  ;;  %v7514_v50 = vunpack.i.l.bf16 %v8642_v19 }
 0x36d   :  { %7870 = vrcp.f32 %v917_v22  ;;  %v7863_v36 = vpop.eup %7862  ;;  %v7515_v22 = vunpack.i.h.bf16 %v8642_v19 }
 0x36e   :  { %v963_v51 = vmul.f32 %v7863_v36, %v8571_v27 }
 0x36f   :  { %v920_v48 = vpop.xlane.xlu0 %919  ;;  %v923_v20 = vpop.xlane.xlu1 %922 }
 0x370   :  { %7872 = vrcp.f32 %v920_v48 }
 0x371   :  { %v7865_v46 = vpop.eup %7864  ;;  %7874 = vrcp.f32 %v923_v20  ;;  %v990_v20 = vpack.c.bf16 %v7515_v22, %v7514_v50 }
 0x372   :  { %v964_v28 = vmul.f32 %v7865_v46, %v8577_v11  ;;  %v7867_v33 = vpop.eup %7866 }
 0x373   :  { %v926_v41 = vpop.xlane.xlu0 %925  ;;  %v965_v11 = vmul.f32 %v7867_v33, %v8579_v10  ;;  %v929_v36 = vpop.xlane.xlu1 %928  ;;  %v1189_v10 = vand.u32 %v8440_v21, %v989_v54 }
 0x374   :  { %v978_v34 = vpack.c.bf16 %v964_v28, %v963_v51  ;;  %7876 = vrcp.f32 %v926_v41  ;;  %v7519_v41 = vunpack.i.l.bf16 %v8648_v25 }
 0x375   :  { %7878 = vrcp.f32 %v929_v36  ;;  %v7524_v36 = vunpack.i.l.bf16 %v8654_v37 }
 0x376   :  { %7038 = vmatmul.mubr.msk.bf16.vlgmr.msra.gmra.mrb[28].mxu1 %vm799_vm4, %v978_v34  ;;  %v7869_v48 = vpop.eup %7868 }
 0x377   :  { %7048 = vmatpush3.bf16.msra.mxu1 %v1142_v32  ;;  %7049 = vmatprep.mubr.msk.bf16.mxu1 %vm8111_vm1, %v10546_v18  ;;  %v7871_v27 = vpop.eup %7870  ;;  %v966_v17 = vmul.f32 %v7869_v48, %v8589_v0  ;;  %v935_v46 = vpop.xlane.xlu0 %934  ;;  %v10529_v0 = vunpack.i.h.bf16 %v8648_v25 }
 0x378   :  { %7059 = vmatprep.subr.bf16.mxu1 %v10546_v18  ;;  %v967_v28 = vmul.f32 %v7871_v27, %v8587_v12  ;;  %v1460_v54 = vpop.permute.xlu1 %1459 }
 0x379   :  { %v979_v51 = vpack.c.bf16 %v966_v17, %v965_v11  ;;  %v991_v53 = vpack.c.bf16 %v10529_v0, %v7519_v41  ;;  %v1521_v11 = vshll.u32 %v8287_v39, 16  ;;  %v7525_v17 = vunpack.i.h.bf16 %v8654_v37 }
 0x37a   :  { %v7873_v40 = vpop.eup %7872 }
 0x37b   :  { %v968_v32 = vmul.f32 %v7873_v40, %v8596_v9  ;;  %7044 = vmatmul.mubr.msk.bf16.vlgmr.msra.gmra.mrb[32].mxu0 %vm799_vm4, %v979_v51  ;;  %v932_v34 = vpop.xlane.xlu0 %931  ;;  %v7875_v12 = vpop.eup %7874  ;;  %v1236_v9 = vand.u32 %v8440_v21, %v990_v20  ;;  %v1283_v40 = vand.u32 %v8440_v21, %v991_v53 }
 0x37c   :  { %7054 = vmatpush3.bf16.msra.mxu0 %v1189_v10  ;;  %7880 = vrcp.f32 %v932_v34  ;;  %7055 = vmatprep.mubr.msk.bf16.mxu0 %vm8111_vm1, %v10546_v18  ;;  %v969_v48 = vmul.f32 %v7875_v12, %v8598_v29  ;;  %v1504_v10 = vpack.c.bf16 %v8660_v45, %v7440_v63  ;;  %v1505_v34 = vpack.c.bf16 %v1460_v54, %v7445_v5 }
 0x37d   :  { %v980_v33 = vpack.c.bf16 %v968_v32, %v967_v28  ;;  %7065 = vmatprep.subr.bf16.mxu0 %v10546_v18  ;;  %7882 = vrcp.f32 %v935_v46  ;;  %v1463_v28 = vpop.permute.xlu1 %1462  ;;  %v1523_v32 = vrot.slane %v1521_v11, 1 }
 0x37e   :  { %v7877_v49 = vpop.eup %7876  ;;  %v1582_v61 = vshll.u32 %v1504_v10, 16  ;;  %v1643_v11 = vshll.u32 %v1505_v34, 16  ;;  %v1506_v45 = vpack.c.bf16 %v1463_v28, %v7455_v7  ;;  %v10550_v7 = vunpack.i.h.bf16 %v8367_v13 }
 0x37f   :  { %7050 = vmatmul.mubr.msk.bf16.vlgmr.msra.gmra.mrb[32].mxu1 %vm799_vm4, %v980_v33  ;;  %v938_v50 = vpop.xlane.xlu0 %937  ;;  %v970_v27 = vmul.f32 %v7877_v49, %v8607_v16  ;;  %v7879_v51 = vpop.eup %7878  ;;  %v992_v16 = vpack.c.bf16 %v7525_v17, %v7524_v36  ;;  %v1519_v49 = vshrl.u32 %v8287_v39, 16 }
 0x380   :  { %7060 = vmatpush3.bf16.msra.mxu1 %v1236_v9  ;;  %7061 = vmatprep.mubr.msk.bf16.mxu1 %vm8111_vm1, %v10546_v18  ;;  %7884 = vrcp.f32 %v938_v50  ;;  %v971_v41 = vmul.f32 %v7879_v51, %v8605_v60  ;;  %v1584_v54 = vrot.slane %v1582_v61, 1  ;;  %v1641_v51 = vshrl.u32 %v1505_v34, 16 }
 0x381   :  { %7071 = vmatprep.subr.bf16.mxu1 %v10546_v18  ;;  %v981_v46 = vpack.c.bf16 %v970_v27, %v969_v48  ;;  %v1330_v48 = vand.u32 %v8440_v21, %v992_v16  ;;  %v1524_v27 = vor.u32 %v1523_v32, %v1519_v49  ;;  %v1443_v60 = vpop.permute.xlu1 %1442  ;;  %v10549_v16 = vunpack.i.h.bf16 %v8348_v62 }
 0x383   :  { %v941_v20 = vpop.xlane.xlu0 %940  ;;  %7056 = vmatmul.mubr.msk.bf16.vlgmr.msra.gmra.mrb[36].mxu0 %vm799_vm4, %v981_v46 }
 0x384   :  { %7066 = vmatpush3.bf16.msra.mxu0 %v1283_v40  ;;  %7067 = vmatprep.mubr.msk.bf16.mxu0 %vm8111_vm1, %v10546_v18  ;;  %7886 = vrcp.f32 %v941_v20  ;;  %v1580_v20 = vshrl.u32 %v1504_v10, 16 }
 0x385   :  { %7077 = vmatprep.subr.bf16.mxu0 %v10546_v18 }
 0x386   :  { %v7881_v29 = vpop.eup %7880 }
 0x387   :  { %v972_v33 = vmul.f32 %v7881_v29, %v8618_v1  ;;  %v944_v12 = vpop.xlane.xlu0 %943  ;;  %v7883_v9 = vpop.eup %7882  ;;  %v1514_v1 = vshll.u32 %v8284_v38, 16 }
 0x388   :  { %7888 = vrcp.f32 %v944_v12  ;;  %v973_v63 = vmul.f32 %v7883_v9, %v8614_v26  ;;  %v1645_v26 = vrot.slane %v1643_v11, 1  ;;  %v1470_v29 = vpop.permute.xlu1 %1469  ;;  %v1704_v12 = vshll.u32 %v1506_v45, 16 }
 0x389   :  { %v982_v53 = vpack.c.bf16 %v972_v33, %v971_v41  ;;  %v1516_v40 = vrot.slane %v1514_v1, 1  ;;  %v1512_v41 = vshrl.u32 %v8284_v38, 16  ;;  %v1765_v33 = vshll.u32 %v8297_v42, 16 }
 0x38a   :  { %v7885_v50 = vpop.eup %7884  ;;  %v1646_v49 = vor.u32 %v1645_v26, %v1641_v51  ;;  %v10551_v11 = vunpack.i.h.bf16 %v8382_v24  ;;  %v1702_v1 = vshrl.u32 %v1506_v45, 16  ;;  %v1763_v24 = vshrl.u32 %v8297_v42, 16 }
 0x38b   :  { %v974_v3 = vmul.f32 %v7885_v50, %v8622_v31  ;;  %v1437_v5 = vpop.permute.xlu0 %1436  ;;  %7062 = vmatmul.mubr.msk.bf16.vlgmr.msra.gmra.mrb[36].mxu1 %vm799_vm4, %v982_v53  ;;  %v1529_v31 = vsel %vm127_vm0, %v1524_v27, 0  ;;  %v1585_v53 = vor.u32 %v1584_v54, %v1580_v20  ;;  %v1517_v62 = vor.u32 %v1516_v40, %v1512_v41 }
 0x38c   :  { %7072 = vmatpush3.bf16.msra.mxu1 %v1330_v48  ;;  %7073 = vmatprep.mubr.msk.bf16.mxu1 %vm8111_vm1, %v10546_v18  ;;  %v1496_v4 = vpack.c.bf16 %v1437_v5, %v10549_v16  ;;  %v1706_v27 = vrot.slane %v1704_v12, 1  ;;  %v1767_v61 = vrot.slane %v1765_v33, 1  ;;  %v1473_v38 = vpop.permute.xlu1 %1472  ;;  %v1758_v42 = vshll.u32 %v8301_v43, 16 }
 0x38d   :  { %v983_v39 = vpack.c.bf16 %v974_v3, %v973_v63  ;;  %7083 = vmatprep.subr.bf16.mxu1 %v10546_v18  ;;  %v1509_v63 = vpack.c.bf16 %v1470_v29, %v10551_v11  ;;  %v10552_v3 = vunpack.i.h.bf16 %v8379_v23  ;;  %v10554_v33 = vunpack.i.h.bf16 %v8404_v47 }
 0x38e   :  { %v7887_v46 = vpop.eup %7886  ;;  %v1575_v50 = vshll.u32 %v1496_v4, 16  ;;  %v1707_v45 = vor.u32 %v1706_v27, %v1702_v1 }
 0x38f   :  { %7068 = vmatmul.mubr.msk.bf16.vlgmr.msra.gmra.mrb[40].mxu0 %vm799_vm4, %v983_v39  ;;  %v1440_v36 = vpop.permute.xlu0 %1439  ;;  %v975_v9 = vmul.f32 %v7887_v46, %v8626_v15  ;;  %v1651_v15 = vsel %vm127_vm0, %v1646_v49, 0  ;;  %v10553_v39 = vunpack.i.h.bf16 %v8369_v14  ;;  %v1768_v14 = vor.u32 %v1767_v61, %v1763_v24 }
 0x390   :  { %7078 = vmatpush3.bf16.xpose.msra.mxu0 %v1529_v31  ;;  %7079 = vmatprep.mubr.msk.bf16.mxu0 %vm8111_vm1, %v10546_v18  ;;  %v1497_v28 = vpack.c.bf16 %v1440_v36, %v10550_v7  ;;  %v1577_v31 = vrot.slane %v1575_v50, 1  ;;  %v1573_v36 = vshrl.u32 %v1496_v4, 16  ;;  %v1453_v51 = vpop.permute.xlu1 %1452  ;;  %v1510_v12 = vpack.c.bf16 %v1473_v38, %v10554_v33 }
 0x391   :  { %7089 = vmatprep.subr.bf16.mxu0 %v10546_v18  ;;  %v1498_v54 = vpack.c.bf16 %v1443_v60, %v10553_v39  ;;  %v1887_v60 = vshll.u32 %v1509_v63, 16  ;;  %v1712_v4 = vsel %vm127_vm0, %v1707_v45, 0  ;;  %v10556_v50 = vunpack.i.h.bf16 %v8424_v8 }
 0x392   :  { %v7889_v32 = vpop.eup %7888  ;;  %v1636_v48 = vshll.u32 %v1497_v28, 16  ;;  %v1634_v46 = vshrl.u32 %v1497_v28, 16  ;;  %v1578_v29 = vor.u32 %v1577_v31, %v1573_v36  ;;  %v1760_v28 = vrot.slane %v1758_v42, 1 }
 0x393   :  { %v976_v10 = vmul.f32 %v7889_v32, %v8630_v6  ;;  %v1467_v34 = vpop.permute.xlu0 %1466  ;;  %v1590_v6 = vsel %vm127_vm0, %v1585_v53, 0  ;;  %v1697_v20 = vshll.u32 %v1498_v54, 16  ;;  %v1773_v32 = vsel %vm127_vm0, %v1768_v14, 0 }
 0x394   :  { %v1508_v5 = vpack.c.bf16 %v1467_v34, %v10552_v3  ;;  %v1638_v23 = vrot.slane %v1636_v48, 1  ;;  %v1889_v41 = vrot.slane %v1887_v60, 1  ;;  %v1885_v34 = vshrl.u32 %v1509_v63, 16  ;;  %v1477_v61 = vpop.permute.xlu1 %1476 }
 0x395   :  { %v984_v13 = vpack.c.bf16 %v976_v10, %v975_v9  ;;  %v1699_v10 = vrot.slane %v1697_v20, 1  ;;  %v10555_v53 = vunpack.i.h.bf16 %v8406_v59  ;;  %v1756_v48 = vshrl.u32 %v8301_v43, 16 }
 0x396   :  { %v1826_v40 = vshll.u32 %v1508_v5, 16  ;;  %v1639_v16 = vor.u32 %v1638_v23, %v1634_v46  ;;  %v1824_v49 = vshrl.u32 %v1508_v5, 16  ;;  %v1695_v27 = vshrl.u32 %v1498_v54, 16 }
 0x397   :  { %7080 = vmatmul.mubr.msk.bf16.vlgmr.msra.gmra.mrb[44].mxu0 %vm127_vm0, %v1517_v62  ;;  %7074 = vmatmul.mubr.msk.bf16.vlgmr.msra.gmra.mrb[40].mxu1 %vm799_vm4, %v984_v13  ;;  %v1447_v26 = vpop.permute.xlu0 %1446  ;;  %v2194_v13 = vshll.u32 %v8338_v56, 16  ;;  %v1948_v59 = vshll.u32 %v1510_v12, 16  ;;  %v1890_v8 = vor.u32 %v1889_v41, %v1885_v34  ;;  %v1761_v63 = vor.u32 %v1760_v28, %v1756_v48 }
 0x398   :  { %7090 = vmatpush3.bf16.xpose.msra.mxu0 %v1651_v15  ;;  %7084 = vmatpush3.bf16.xpose.msra.mxu1 %v1590_v6  ;;  %v1828_v9 = vrot.slane %v1826_v40, 1  ;;  %v1500_v62 = vpack.c.bf16 %v1447_v26, %v10555_v53  ;;  %v1700_v38 = vor.u32 %v1699_v10, %v1695_v27  ;;  %v2192_v15 = vshrl.u32 %v8338_v56, 16 }
 0x399   :  { %7085 = vmatprep.mubr.msk.bf16.mxu1 %vm8111_vm1, %v10546_v18  ;;  %7091 = vmatprep.mubr.msk.bf16.mxu0 %vm8111_vm1, %v10546_v18  ;;  %v2196_v6 = vrot.slane %v2194_v13, 1  ;;  %v10557_v43 = vunpack.i.h.bf16 %v8478_v35  ;;  %v1950_v39 = vrot.slane %v1948_v59, 1  ;;  %v1895_v26 = vsel %vm127_vm0, %v1890_v8, 0 }
 0x39a   :  { %7095 = vmatprep.subr.bf16.mxu1 %v10546_v18  ;;  %7101 = vmatprep.subr.bf16.mxu0 %v10546_v18  ;;  %v1829_v11 = vor.u32 %v1828_v9, %v1824_v49  ;;  %v1819_v3 = vshll.u32 %v1500_v62, 16  ;;  %v1946_v24 = vshrl.u32 %v1510_v12, 16  ;;  %v10558_v31 = vunpack.i.h.bf16 %v8442_v30 }
 0x39b   :  { %v1450_v7 = vpop.permute.xlu0 %1449  ;;  %v2184_v1 = vpack.c.bf16 %v1477_v61, %v10557_v43  ;;  %v2197_v14 = vor.u32 %v2196_v6, %v2192_v15  ;;  %v1817_v60 = vshrl.u32 %v1500_v62, 16 }
 0x39c   :  { %v1501_v47 = vpack.c.bf16 %v1450_v7, %v10556_v50  ;;  %v1834_v54 = vsel %vm127_vm0, %v1829_v11, 0  ;;  %v1502_v23 = vpack.c.bf16 %v1453_v51, %v10558_v31  ;;  %v1821_v56 = vrot.slane %v1819_v3, 1 }
 0x39d   :  { %v2248_v35 = vshll.u32 %v2184_v1, 16  ;;  %v1951_v46 = vor.u32 %v1950_v39, %v1946_v24  ;;  %v2202_v51 = vand.u32 %v2197_v14, %v8440_v21 }
 0x39e   :  { %v1880_v5 = vshll.u32 %v1501_v47, 16  ;;  %v1878_v36 = vshrl.u32 %v1501_v47, 16  ;;  %v1941_v40 = vshll.u32 %v1502_v23, 16  ;;  %v1822_v30 = vor.u32 %v1821_v56, %v1817_v60 }
 0x39f   :  { %7086 = vmatmul.mubr.msk.bf16.vlgmr.msra.gmra.mrb[44].mxu1 %vm127_vm0, %v1578_v29  ;;  %7092 = vmatmul.mubr.msk.bf16.vlgmr.msra.gmra.mrb[48].mxu0 %vm127_vm0, %v1639_v16  ;;  %v2250_v20 = vrot.slane %v2248_v35, 1  ;;  %v1956_v29 = vsel %vm127_vm0, %v1951_v46, 0  ;;  %v2246_v16 = vshrl.u32 %v2184_v1, 16  ;;  %v1939_v41 = vshrl.u32 %v1502_v23, 16 }
 0x3a0   :  { %7096 = vmatpush3.bf16.xpose.msra.mxu1 %v1712_v4  ;;  %7102 = vmatpush3.bf16.xpose.msra.mxu0 %v1773_v32  ;;  %v1882_v45 = vrot.slane %v1880_v5, 1  ;;  %v1943_v7 = vrot.slane %v1941_v40, 1 }
 0x3a1   :  { %7097 = vmatprep.mubr.msk.bf16.mxu1 %vm8111_vm1, %v10546_v18  ;;  %7103 = vmatprep.mubr.msk.bf16.mxu0 %vm8111_vm1, %v10546_v18  ;;  %v2251_v32 = vor.u32 %v2250_v20, %v2246_v16 }
 0x3a2   :  { %7107 = vmatprep.subr.bf16.mxu1 %v10546_v18  ;;  %7113 = vmatprep.subr.bf16.mxu0 %v10546_v18  ;;  %v1883_v42 = vor.u32 %v1882_v45, %v1878_v36  ;;  %v1944_v33 = vor.u32 %v1943_v7, %v1939_v41 }
 0x3a3   :  { %v2256_v12 = vand.u32 %v2251_v32, %v8440_v21 }
 0x3a7   :  { %7098 = vmatmul.mubr.msk.bf16.vlgmr.msra.gmra.mrb[48].mxu1 %vm127_vm0, %v1700_v38  ;;  %7104 = vmatmul.mubr.msk.bf16.vlgmr.msra.gmra.mrb[52].mxu0 %vm127_vm0, %v1761_v63 }
 0x3a8   :  { %7108 = vmatpush3.bf16.xpose.msra.mxu1 %v1834_v54  ;;  %7114 = vmatpush3.bf16.xpose.msra.mxu0 %v1895_v26 }
 0x3a9   :  { %7109 = vmatprep.mubr.msk.bf16.mxu1 %vm8111_vm1, %v10546_v18  ;;  %7115 = vmatprep.mubr.msk.bf16.mxu0 %vm8111_vm1, %v10546_v18 }
 0x3aa   :  { %7119 = vmatprep.subr.bf16.mxu1 %v10546_v18  ;;  %7125 = vmatprep.subr.bf16.mxu0 %v10546_v18 }
 0x3af   :  { %7110 = vmatmul.mubr.msk.bf16.vlgmr.msra.gmra.mrb[52].mxu1 %vm127_vm0, %v1822_v30  ;;  %7116 = vmatmul.mubr.msk.bf16.vlgmr.msra.gmra.mrb[56].mxu0 %vm127_vm0, %v1883_v42 }
 0x3b0   :  { %7120 = vmatpush3.bf16.xpose.msra.mxu1 %v1956_v29  ;;  %7126 = vmatpush3.bf16.msra.mxu0 %v2202_v51 }
 0x3b1   :  { %7121 = vmatprep.mubr.msk.bf16.mxu1 %vm8111_vm1, %v10546_v18  ;;  %7131 = vmatprep.subr.bf16.mxu1 %v10546_v18 }
 0x3b2   :  { %7127 = vmatprep.mubr.msk.bf16.mxu0 %vm8111_vm1, %v10546_v18  ;;  %7137 = vmatprep.subr.bf16.mxu0 %v10546_v18 }
 0x3b7   :  { %7122 = vmatmul.mubr.msk.bf16.vlgmr.msra.gmra.mrb[56].mxu1 %vm127_vm0, %v1944_v33 }
 0x3b8   :  { %7132 = vmatpush3.bf16.msra.mxu1 %v2256_v12  ;;  %7133 = vmatprep.mubr.msk.bf16.mxu1 %vm8111_vm1, %v10546_v18 }
 0x3b9   :  { %7143 = vmatprep.subr.bf16.mxu1 %v10546_v18 }
 0x400   :  { %v8824_v9 = vpop.f32.mrb[28].mxu0 }
 0x401   :  { %v7033_v4 = vpop.f32.mrb[29].mxu0 }
 0x402   :  { %v8826_v28 = vpop.f32.mrb[30].mxu0 }
 0x403   :  { %v7034_v10 = vpop.f32.mrb[31].mxu0 }
 0x449   :  { %v8828_v34 = vpop.f32.mrb[28].mxu1 }
 0x44a   :  { %v7039_v49 = vpop.f32.mrb[29].mxu1 }
 0x44b   :  { %v8830_v53 = vpop.f32.mrb[30].mxu1 }
 0x44c   :  { %v7040_v62 = vpop.f32.mrb[31].mxu1 }
 0x44e   :  { %v8832_v50 = vpop.f32.mrb[32].mxu0 }
 0x44f   :  { %v7045_v47 = vpop.f32.mrb[33].mxu0 }
 0x450   :  { %v8834_v48 = vpop.f32.mrb[34].mxu0 }
 0x451   :  { %v7046_v13 = vpop.f32.mrb[35].mxu0 }
 0x452   :  { %v8836_v27 = vpop.f32.mrb[32].mxu1 }
 0x453   :  { %v7051_v59 = vpop.f32.mrb[33].mxu1 }
 0x454   :  { %v8838_v61 = vpop.f32.mrb[34].mxu1 }
 0x455   :  { %v7052_v11 = vpop.f32.mrb[35].mxu1 }
 0x456   :  { %v8840_v8 = vpop.f32.mrb[36].mxu0 }
 0x457   :  { %v7057_v63 = vpop.f32.mrb[37].mxu0 }
 0x458   :  { %v8842_v38 = vpop.f32.mrb[38].mxu0 }
 0x459   :  { %v7058_v3 = vpop.f32.mrb[39].mxu0 }
 0x45e   :  { %v8844_v5 = vpop.f32.mrb[36].mxu1 }
 0x45f   :  { %v7531_v15 = vpack.i.bf16 %v8828_v34, %v8844_v5  ;;  %v7063_v6 = vpop.f32.mrb[37].mxu1 }
 0x460   :  { %v8848_v43 = vpop.f32.mrb[38].mxu1 }
 0x461   :  { %v7526_v1 = vpack.i.bf16 %v8830_v53, %v8848_v43  ;;  %v7064_v39 = vpop.f32.mrb[39].mxu1 }
 0x462   :  { %v8852_v54 = vpop.f32.mrb[40].mxu0 }
 0x463   :  { %v7541_v26 = vpack.i.bf16 %v8832_v50, %v8852_v54  ;;  %v7069_v24 = vpop.f32.mrb[41].mxu0 }
 0x464   :  { %v8856_v31 = vpop.f32.mrb[42].mxu0 }
 0x465   :  { %v7536_v23 = vpack.i.bf16 %v8834_v48, %v8856_v31  ;;  %v7070_v56 = vpop.f32.mrb[43].mxu0 }
 0x46a   :  { %v8860_v45 = vpop.f32.mrb[40].mxu1  ;;  %v8862_v35 = vpop.f32.mrb[44].mxu0 }
 0x46b   :  { %v7551_v14 = vpack.i.bf16 %v8836_v27, %v8860_v45  ;;  %v7075_v60 = vpop.f32.mrb[41].mxu1  ;;  %v7081_v36 = vpop.f32.mrb[45].mxu0  ;;  %v1999_v46 = vsel %vm799_vm4, %v8862_v35, -inf }
 0x46c   :  { %v8868_v40 = vpop.f32.mrb[42].mxu1  ;;  %2000 = vmax.xlane.f32.xlu0 %v1999_v46  ;;  %v8870_v30 = vpop.f32.mrb[46].mxu0 }
 0x46d   :  { %v7546_v42 = vpack.i.bf16 %v8838_v61, %v8868_v40  ;;  %v7076_v20 = vpop.f32.mrb[43].mxu1  ;;  %v7082_v51 = vpop.f32.mrb[47].mxu0  ;;  %v2002_v29 = vsel %vm803_vm5, %v8870_v30, -inf }
 0x46e   :  { %2003 = vmax.xlane.f32.xlu1 %v2002_v29 }
 0x472   :  { %v8876_v16 = vpop.f32.mrb[44].mxu1  ;;  %v8878_v7 = vpop.f32.mrb[48].mxu0 }
 0x473   :  { %v7087_v32 = vpop.f32.mrb[45].mxu1  ;;  %v7093_v41 = vpop.f32.mrb[49].mxu0  ;;  %v2005_v33 = vsel %vm799_vm4, %v8876_v16, -inf  ;;  %v2011_v12 = vsel %vm799_vm4, %v8878_v7, -inf }
 0x474   :  { %v8884_v4 = vpop.f32.mrb[46].mxu1  ;;  %2006 = vmax.xlane.f32.xlu0 %v2005_v33  ;;  %2012 = vmax.xlane.f32.xlu1 %v2011_v12  ;;  %v8886_v10 = vpop.f32.mrb[50].mxu0 }
 0x475   :  { %v7088_v49 = vpop.f32.mrb[47].mxu1  ;;  %v7094_v62 = vpop.f32.mrb[51].mxu0  ;;  %v2008_v47 = vsel %vm803_vm5, %v8884_v4, -inf  ;;  %v2014_v6 = vsel %vm803_vm5, %v8886_v10, -inf }
 0x478   :  { %2009 = vmax.xlane.f32.xlu0 %v2008_v47 }
 0x47a   :  { %v8890_v13 = vpop.f32.mrb[48].mxu1  ;;  %v8892_v59 = vpop.f32.mrb[52].mxu0 }
 0x47b   :  { %v7099_v11 = vpop.f32.mrb[49].mxu1  ;;  %v7105_v63 = vpop.f32.mrb[53].mxu0  ;;  %v2017_v3 = vsel %vm799_vm4, %v8890_v13, -inf  ;;  %v2023_v46 = vsel %vm799_vm4, %v8892_v59, -inf }
 0x47c   :  { %v8898_v39 = vpop.f32.mrb[50].mxu1  ;;  %2018 = vmax.xlane.f32.xlu1 %v2017_v3  ;;  %2015 = vmax.xlane.f32.xlu0 %v2014_v6  ;;  %v8900_v24 = vpop.f32.mrb[54].mxu0 }
 0x47d   :  { %v7100_v56 = vpop.f32.mrb[51].mxu1  ;;  %v7106_v60 = vpop.f32.mrb[55].mxu0  ;;  %v2020_v36 = vsel %vm803_vm5, %v8898_v39, -inf  ;;  %v2026_v33 = vsel %vm803_vm5, %v8900_v24, -inf }
 0x480   :  { %2021 = vmax.xlane.f32.xlu0 %v2020_v36  ;;  %2024 = vmax.xlane.f32.xlu1 %v2023_v46 }
 0x482   :  { %v8906_v20 = vpop.f32.mrb[52].mxu1  ;;  %v8908_v51 = vpop.f32.mrb[56].mxu0 }
 0x483   :  { %v7111_v29 = vpop.f32.mrb[53].mxu1  ;;  %v7117_v32 = vpop.f32.mrb[57].mxu0  ;;  %v2029_v41 = vsel %vm799_vm4, %v8906_v20, -inf  ;;  %v2035_v63 = vsel %vm799_vm4, %v8908_v51, -inf }
 0x484   :  { %v8914_v12 = vpop.f32.mrb[54].mxu1  ;;  %2030 = vmax.xlane.f32.xlu1 %v2029_v41  ;;  %2027 = vmax.xlane.f32.xlu0 %v2026_v33  ;;  %v8916_v49 = vpop.f32.mrb[58].mxu0 }
 0x485   :  { %v7112_v62 = vpop.f32.mrb[55].mxu1  ;;  %v7118_v47 = vpop.f32.mrb[59].mxu0  ;;  %v2032_v11 = vsel %vm803_vm5, %v8914_v12, -inf  ;;  %v2038_v60 = vsel %vm803_vm5, %v8916_v49, -inf }
 0x488   :  { %2033 = vmax.xlane.f32.xlu0 %v2032_v11  ;;  %2036 = vmax.xlane.f32.xlu1 %v2035_v63 }
 0x48a   :  { %v8922_v3 = vpop.f32.mrb[56].mxu1 }
 0x48b   :  { %v7123_v6 = vpop.f32.mrb[57].mxu1  ;;  %v2041_v56 = vsel %vm799_vm4, %v8922_v3, -inf }
 0x48c   :  { %v8928_v36 = vpop.f32.mrb[58].mxu1  ;;  %2042 = vmax.xlane.f32.xlu1 %v2041_v56  ;;  %2039 = vmax.xlane.f32.xlu0 %v2038_v60 }
 0x48d   :  { %v7124_v46 = vpop.f32.mrb[59].mxu1  ;;  %v2044_v29 = vsel %vm803_vm5, %v8928_v36, -inf }
 0x490   :  { %2045 = vmax.xlane.f32.xlu0 %v2044_v29 }
 0x49d   :  { %1482 = vrot.lane.b32.xlu1 %v8334_v55, %s8114_s20 }
 0x4a1   :  { %1486 = vrot.lane.b32.xlu1 %v8340_v57, %s8112_s18 }
 0x4a6   :  { %1479 = vrot.lane.b32.xlu0 %v8334_v55, %s8113_s19 }
 0x4f9   :  { %v2001_v32 = vpop.xlane.xlu0 %2000 }
 0x4fa   :  { %v2047_v41 = vsub.f32 %v8862_v35, %v2001_v32 }
 0x4fb   :  { %v2004_v33 = vpop.xlane.xlu1 %2003 }
 0x4fc   :  { %v2063_v62 = vmul.f32 1.442695, %v2047_v41  ;;  %v2048_v47 = vsub.f32 %v8870_v30, %v2004_v33 }
 0x4fe   :  { %7890 = vpow2.f32 %v2063_v62  ;;  %v2065_v11 = vmul.f32 1.442695, %v2048_v47 }
 0x500   :  { %7892 = vpow2.f32 %v2065_v11 }
 0x501   :  { %v2007_v63 = vpop.xlane.xlu0 %2006  ;;  %v2013_v6 = vpop.xlane.xlu1 %2012 }
 0x502   :  { %v2049_v56 = vsub.f32 %v8876_v16, %v2007_v63  ;;  %v2051_v60 = vsub.f32 %v8878_v7, %v2013_v6 }
 0x504   :  { %v2067_v46 = vmul.f32 1.442695, %v2049_v56  ;;  %v2071_v29 = vmul.f32 1.442695, %v2051_v60 }
 0x505   :  { %v2010_v0 = vpop.xlane.xlu0 %2009 }
 0x506   :  { %7894 = vpow2.f32 %v2067_v46  ;;  %v2050_v55 = vsub.f32 %v8884_v4, %v2010_v0 }
 0x507   :  { %7896 = vpow2.f32 %v2071_v29 }
 0x508   :  { %v8943_v35 = vpop.eup %7890  ;;  %v2069_v32 = vmul.f32 1.442695, %v2050_v55 }
 0x509   :  { %v2019_v30 = vpop.xlane.xlu1 %2018  ;;  %v2016_v41 = vpop.xlane.xlu0 %2015  ;;  %v2095_v33 = vsel %vm799_vm4, %v8943_v35, 0.0 }
 0x50a   :  { %v8947_v62 = vpop.eup %7892  ;;  %7898 = vpow2.f32 %v2069_v32  ;;  %v2053_v16 = vsub.f32 %v8890_v13, %v2019_v30  ;;  %v2052_v7 = vsub.f32 %v8886_v10, %v2016_v41  ;;  %2096 = vadd.xlane.f32.xlu1 %v2095_v33 }
 0x50b   :  { %v2098_v0 = vsel %vm803_vm5, %v8947_v62, 0.0 }
 0x50c   :  { %v2075_v4 = vmul.f32 1.442695, %v2053_v16  ;;  %v2073_v47 = vmul.f32 1.442695, %v2052_v7  ;;  %2099 = vadd.xlane.f32.xlu0 %v2098_v0 }
 0x50d   :  { %v2022_v11 = vpop.xlane.xlu0 %2021  ;;  %v2025_v63 = vpop.xlane.xlu1 %2024 }
 0x50e   :  { %7900 = vpow2.f32 %v2075_v4  ;;  %v2054_v6 = vsub.f32 %v8898_v39, %v2022_v11  ;;  %v2055_v56 = vsub.f32 %v8892_v59, %v2025_v63 }
 0x50f   :  { %7902 = vpow2.f32 %v2073_v47 }
 0x510   :  { %v8955_v60 = vpop.eup %7894  ;;  %v2077_v13 = vmul.f32 1.442695, %v2054_v6  ;;  %v2079_v46 = vmul.f32 1.442695, %v2055_v56 }
 0x511   :  { %v2031_v10 = vpop.xlane.xlu1 %2030  ;;  %v2028_v29 = vpop.xlane.xlu0 %2027  ;;  %v2101_v55 = vsel %vm799_vm4, %v8955_v60, 0.0 }
 0x512   :  { %v8959_v32 = vpop.eup %7896  ;;  %7904 = vpow2.f32 %v2077_v13  ;;  %v2057_v30 = vsub.f32 %v8906_v20, %v2031_v10  ;;  %v2056_v41 = vsub.f32 %v8900_v24, %v2028_v29  ;;  %2102 = vadd.xlane.f32.xlu1 %v2101_v55 }
 0x513   :  { %7906 = vpow2.f32 %v2079_v46  ;;  %v2107_v7 = vsel %vm799_vm4, %v8959_v32, 0.0 }
 0x514   :  { %v8963_v59 = vpop.eup %7898  ;;  %v2081_v39 = vmul.f32 1.442695, %v2056_v41  ;;  %v2083_v4 = vmul.f32 1.442695, %v2057_v30 }
 0x515   :  { %v2034_v33 = vpop.xlane.xlu0 %2033  ;;  %v2037_v16 = vpop.xlane.xlu1 %2036  ;;  %v2104_v0 = vsel %vm803_vm5, %v8963_v59, 0.0 }
 0x516   :  { %v2058_v47 = vsub.f32 %v8914_v12, %v2034_v33  ;;  %v2059_v20 = vsub.f32 %v8908_v51, %v2037_v16  ;;  %2108 = vadd.xlane.f32.xlu1 %v2107_v7  ;;  %2105 = vadd.xlane.f32.xlu0 %v2104_v0  ;;  %7908 = vpow2.f32 %v2081_v39 }
 0x517   :  { %7910 = vpow2.f32 %v2083_v4 }
 0x518   :  { %v8971_v24 = vpop.eup %7900  ;;  %v2087_v11 = vmul.f32 1.442695, %v2059_v20  ;;  %v2085_v13 = vmul.f32 1.442695, %v2058_v47 }
 0x519   :  { %v8973_v63 = vpop.eup %7902  ;;  %v2040_v6 = vpop.xlane.xlu0 %2039  ;;  %v2113_v56 = vsel %vm799_vm4, %v8971_v24, 0.0 }
 0x51a   :  { %v2060_v46 = vsub.f32 %v8916_v49, %v2040_v6  ;;  %2114 = vadd.xlane.f32.xlu1 %v2113_v56  ;;  %v2110_v51 = vsel %vm803_vm5, %v8973_v63, 0.0  ;;  %7912 = vpow2.f32 %v2087_v11  ;;  %v2043_v12 = vpop.xlane.xlu1 %2042 }
 0x51b   :  { %2111 = vadd.xlane.f32.xlu0 %v2110_v51  ;;  %7914 = vpow2.f32 %v2085_v13  ;;  %v2061_v30 = vsub.f32 %v8922_v3, %v2043_v12 }
 0x51c   :  { %v8980_v10 = vpop.eup %7904  ;;  %v2089_v41 = vmul.f32 1.442695, %v2060_v46 }
 0x51d   :  { %v8982_v29 = vpop.eup %7906  ;;  %v2116_v55 = vsel %vm803_vm5, %v8980_v10, 0.0  ;;  %v2046_v39 = vpop.xlane.xlu0 %2045  ;;  %v2091_v16 = vmul.f32 1.442695, %v2061_v30 }
 0x51e   :  { %v2119_v49 = vsel %vm799_vm4, %v8982_v29, 0.0  ;;  %7916 = vpow2.f32 %v2089_v41  ;;  %v2062_v7 = vsub.f32 %v8928_v36, %v2046_v39  ;;  %v1483_v53 = vpop.permute.xlu1 %1482 }
 0x51f   :  { %2120 = vadd.xlane.f32.xlu1 %v2119_v49  ;;  %2117 = vadd.xlane.f32.xlu0 %v2116_v55  ;;  %7918 = vpow2.f32 %v2091_v16 }
 0x520   :  { %v8989_v33 = vpop.eup %7908  ;;  %v2093_v47 = vmul.f32 1.442695, %v2062_v7 }
 0x521   :  { %v2122_v0 = vsel %vm803_vm5, %v8989_v33, 0.0  ;;  %v8994_v4 = vpop.eup %7910  ;;  %v1480_v61 = vpop.permute.xlu0 %1479 }
 0x522   :  { %v2125_v11 = vsel %vm799_vm4, %v8994_v4, 0.0  ;;  %7920 = vpow2.f32 %v2093_v47  ;;  %v1487_v48 = vpop.permute.xlu1 %1486 }
 0x523   :  { %2123 = vadd.xlane.f32.xlu0 %v2122_v0 }
 0x524   :  { %v8996_v3 = vpop.eup %7912 }
 0x525   :  { %v2131_v20 = vsel %vm799_vm4, %v8996_v3, 0.0  ;;  %v9002_v6 = vpop.eup %7914 }
 0x526   :  { %2132 = vadd.xlane.f32.xlu1 %v2131_v20  ;;  %v2128_v36 = vsel %vm803_vm5, %v9002_v6, 0.0  ;;  %v2408_v20 = vshrl.u32 %v8344_v58, 16 }
 0x527   :  { %2126 = vadd.xlane.f32.xlu0 %v2125_v11  ;;  %v2412_v11 = vrot.slane %v2410_v44, 1 }
 0x528   :  { %v9006_v56 = vpop.eup %7916 }
 0x529   :  { %v2134_v13 = vsel %vm803_vm5, %v9006_v56, 0.0  ;;  %v9010_v46 = vpop.eup %7918 }
 0x52a   :  { %v2137_v51 = vsel %vm799_vm4, %v9010_v46, 0.0 }
 0x52b   :  { %2129 = vadd.xlane.f32.xlu0 %v2128_v36 }
 0x52c   :  { %v9014_v12 = vpop.eup %7920 }
 0x52d   :  { %v2140_v55 = vsel %vm803_vm5, %v9014_v12, 0.0 }
 0x52f   :  { %2135 = vadd.xlane.f32.xlu0 %v2134_v13 }
 0x533   :  { %2138 = vadd.xlane.f32.xlu0 %v2137_v51 }
 0x537   :  { %2141 = vadd.xlane.f32.xlu0 %v2140_v55  ;;  %1492 = vrot.lane.b32.xlu1 %v8340_v57, %s8114_s20 }
 0x53b   :  { %7527 = vrot.lane.b32.xlu1 %v7526_v1, %s8114_s20 }
 0x53f   :  { %7537 = vrot.lane.b32.xlu1 %v7536_v23, %s8113_s19 }
 0x543   :  { %7547 = vrot.lane.b32.xlu1 %v7546_v42, %s8112_s18 }
 0x54d   :  { %1489 = vrot.lane.b32.xlu0 %v8340_v57, %s8113_s19  ;;  %v10559_v57 = vunpack.i.h.bf16 %v8548_v2 }
 0x54f   :  { %v2185_v1 = vpack.c.bf16 %v1480_v61, %v10559_v57 }
 0x551   :  { %7532 = vrot.lane.b32.xlu0 %v7531_v15, %s8114_s20  ;;  %v2302_v5 = vshll.u32 %v2185_v1, 16  ;;  %v2300_v54 = vshrl.u32 %v2185_v1, 16 }
 0x553   :  { %v2304_v31 = vrot.slane %v2302_v5, 1 }
 0x555   :  { %7542 = vrot.lane.b32.xlu0 %v7541_v26, %s8113_s19  ;;  %v2186_v26 = vpack.c.bf16 %v1483_v53, %v7510_v52 }
 0x557   :  { %v2356_v42 = vshll.u32 %v2186_v26, 16  ;;  %v2354_v7 = vshrl.u32 %v2186_v26, 16 }
 0x559   :  { %7552 = vrot.lane.b32.xlu0 %v7551_v14, %s8112_s18  ;;  %v2305_v14 = vor.u32 %v2304_v31, %v2300_v54  ;;  %v2358_v52 = vrot.slane %v2356_v42, 1 }
 0x55b   :  { %v2310_v39 = vand.u32 %v2305_v14, %v8440_v21  ;;  %v2359_v36 = vor.u32 %v2358_v52, %v2354_v7 }
 0x55d   :  { %v2364_v61 = vand.u32 %v2359_v36, %v8440_v21 }
 0x597   :  { %v2097_v43 = vpop.xlane.xlu1 %2096 }
 0x598   :  { %7922 = vrcp.f32 %v2097_v43  ;;  %v2413_v43 = vor.u32 %v2412_v11, %v2408_v20 }
 0x599   :  { %v2100_v34 = vpop.xlane.xlu0 %2099 }
 0x59a   :  { %7924 = vrcp.f32 %v2100_v34  ;;  %v2418_v31 = vand.u32 %v2413_v43, %v8440_v21 }
 0x59f   :  { %v2103_v15 = vpop.xlane.xlu1 %2102 }
 0x5a0   :  { %7926 = vrcp.f32 %v2103_v15 }
 0x5a2   :  { %v7923_v50 = vpop.eup %7922 }
 0x5a3   :  { %v2109_v27 = vpop.xlane.xlu1 %2108  ;;  %v2106_v23 = vpop.xlane.xlu0 %2105  ;;  %v2159_v40 = vmul.f32 %v7923_v50, %v8943_v35  ;;  %v2188_v35 = vpack.c.bf16 %v1487_v48, %v7515_v22 }
 0x5a4   :  { %v7925_v45 = vpop.eup %7924  ;;  %7928 = vrcp.f32 %v2106_v23 }
 0x5a5   :  { %v2160_v2 = vmul.f32 %v7925_v45, %v8947_v62  ;;  %7930 = vrcp.f32 %v2109_v27  ;;  %v2464_v13 = vshll.u32 %v2188_v35, 16  ;;  %v2462_v5 = vshrl.u32 %v2188_v35, 16 }
 0x5a7   :  { %v2115_v30 = vpop.xlane.xlu1 %2114  ;;  %v2175_v41 = vpack.c.bf16 %v2160_v2, %v2159_v40  ;;  %v2466_v57 = vrot.slane %v2464_v13, 1 }
 0x5a8   :  { %v2112_v49 = vpop.xlane.xlu0 %2111 }
 0x5a9   :  { %7932 = vrcp.f32 %v2112_v49  ;;  %7128 = vmatmul.mubr.msk.bf16.vlgmr.msra.gmra.mrb[60].mxu0 %vm799_vm4, %v2175_v41  ;;  %v2467_v54 = vor.u32 %v2466_v57, %v2462_v5  ;;  %v7754_v57 = vld [vmem:[%s10502_s2 + $0x40] sm:$0xff]  }
 0x5aa   :  { %7138 = vmatpush3.bf16.msra.mxu0 %v2310_v39  ;;  %7139 = vmatprep.mubr.msk.bf16.mxu0 %vm8111_vm1, %v10546_v18  ;;  %7934 = vrcp.f32 %v2115_v30  ;;  %v7927_v16 = vpop.eup %7926 }
 0x5ab   :  { %7149 = vmatprep.subr.bf16.mxu0 %v10546_v18  ;;  %v2161_v51 = vmul.f32 %v7927_v16, %v8955_v60  ;;  %v2472_v42 = vand.u32 %v2467_v54, %v8440_v21 }
 0x5ac   :  { %v2118_v62 = vpop.xlane.xlu0 %2117  ;;  %v2121_v0 = vpop.xlane.xlu1 %2120 }
 0x5ad   :  { %7936 = vrcp.f32 %v2118_v62 }
 0x5ae   :  { %v7929_v47 = vpop.eup %7928  ;;  %7938 = vrcp.f32 %v2121_v0  ;;  %v10560_v0 = vunpack.i.h.bf16 %v8648_v25 }
 0x5af   :  { %v2162_v55 = vmul.f32 %v7929_v47, %v8963_v59  ;;  %v7931_v53 = vpop.eup %7930 }
 0x5b0   :  { %v2124_v19 = vpop.xlane.xlu0 %2123  ;;  %v2163_v1 = vmul.f32 %v7931_v53, %v8959_v32 }
 0x5b1   :  { %7940 = vrcp.f32 %v2124_v19  ;;  %v2176_v22 = vpack.c.bf16 %v2162_v55, %v2161_v51 }
 0x5b3   :  { %v7933_v48 = vpop.eup %7932  ;;  %v2133_v34 = vpop.xlane.xlu1 %2132  ;;  %7134 = vmatmul.mubr.msk.bf16.vlgmr.msra.gmra.mrb[60].mxu1 %vm799_vm4, %v2176_v22 }
 0x5b4   :  { %v2164_v58 = vmul.f32 %v7933_v48, %v8973_v63  ;;  %7144 = vmatpush3.bf16.msra.mxu1 %v2364_v61  ;;  %v2127_v60 = vpop.xlane.xlu0 %2126  ;;  %7145 = vmatprep.mubr.msk.bf16.mxu1 %vm8111_vm1, %v10546_v18  ;;  %v7935_v59 = vpop.eup %7934 }
 0x5b5   :  { %7155 = vmatprep.subr.bf16.mxu1 %v10546_v18  ;;  %7942 = vrcp.f32 %v2127_v60  ;;  %v2165_v63 = vmul.f32 %v7935_v59, %v8971_v24 }
 0x5b6   :  { %v2177_v15 = vpack.c.bf16 %v2164_v58, %v2163_v1 }
 0x5b7   :  { %v7937_v50 = vpop.eup %7936  ;;  %v1493_v32 = vpop.permute.xlu1 %1492 }
 0x5b8   :  { %7140 = vmatmul.mubr.msk.bf16.vlgmr.msra.gmra.mrb[64].mxu0 %vm799_vm4, %v2177_v15  ;;  %v2166_v26 = vmul.f32 %v7937_v50, %v8980_v10  ;;  %v2190_v27 = vpack.c.bf16 %v1493_v32, %v7525_v17  ;;  %v2130_v23 = vpop.xlane.xlu0 %2129  ;;  %v7939_v45 = vpop.eup %7938  ;;  %v7756_v32 = vld [vmem:[%s10502_s2 + $0x48] sm:$0xff]  }
 0x5b9   :  { %7150 = vmatpush3.bf16.msra.mxu0 %v2418_v31  ;;  %7151 = vmatprep.mubr.msk.bf16.mxu0 %vm8111_vm1, %v10546_v18  ;;  %7944 = vrcp.f32 %v2130_v23  ;;  %v2167_v24 = vmul.f32 %v7939_v45, %v8982_v29 }
 0x5ba   :  { %7161 = vmatprep.subr.bf16.mxu0 %v10546_v18  ;;  %v2178_v14 = vpack.c.bf16 %v2166_v26, %v2165_v63  ;;  %v2572_v2 = vshll.u32 %v2190_v27, 16  ;;  %v2570_v39 = vshrl.u32 %v2190_v27, 16  ;;  %v7757_v26 = vld [vmem:[%s10502_s2 + $0x8] sm:$0xff]  }
 0x5bb   :  { %v7941_v40 = vpop.eup %7940 }
 0x5bc   :  { %v2168_v10 = vmul.f32 %v7941_v40, %v8989_v33  ;;  %7146 = vmatmul.mubr.msk.bf16.vlgmr.msra.gmra.mrb[64].mxu1 %vm799_vm4, %v2178_v14  ;;  %v2136_v37 = vpop.xlane.xlu0 %2135  ;;  %v2574_v30 = vrot.slane %v2572_v2, 1  ;;  %v7758_v14 = vld [vmem:[%s10502_s2 + $0x50] sm:$0xff]   ;;  %v7760_v2 = vld [vmem:[%s10502_s2 + $0x58] sm:$0xff]  }
 0x5bd   :  { %7156 = vmatpush3.bf16.msra.mxu1 %v2472_v42  ;;  %7157 = vmatprep.mubr.msk.bf16.mxu1 %vm8111_vm1, %v10546_v18  ;;  %7946 = vrcp.f32 %v2136_v37  ;;  %v7759_v40 = vld [vmem:[%s10502_s2 + $0x10] sm:$0xff]   ;;  %v7761_v37 = vld [vmem:[%s10502_s2 + $0x18] sm:$0xff]  }
 0x5be   :  { %v2179_v17 = vpack.c.bf16 %v2168_v10, %v2167_v24  ;;  %7167 = vmatprep.subr.bf16.mxu1 %v10546_v18  ;;  %v2575_v33 = vor.u32 %v2574_v30, %v2570_v39  ;;  %v7763_v30 = vld [vmem:[%s10502_s2 + $0x20] sm:$0xff]  }
 0x5bf   :  { %v7943_v49 = vpop.eup %7942 }
 0x5c0   :  { %7152 = vmatmul.mubr.msk.bf16.vlgmr.msra.gmra.mrb[68].mxu0 %vm799_vm4, %v2179_v17  ;;  %v2139_v41 = vpop.xlane.xlu0 %2138  ;;  %v2169_v44 = vmul.f32 %v7943_v49, %v8994_v4  ;;  %v2580_v16 = vand.u32 %v2575_v33, %v8440_v21  ;;  %v7762_v17 = vld [vmem:[%s10502_s2 + $0x60] sm:$0xff]  }
 0x5c1   :  { %7163 = vmatprep.mubr.msk.bf16.mxu0 %vm8111_vm1, %v10546_v18  ;;  %7948 = vrcp.f32 %v2139_v41 }
 0x5c2   :  { %7950 = vrcp.f32 %v2133_v34 }
 0x5c3   :  { %v7945_v29 = vpop.eup %7944 }
 0x5c4   :  { %v2170_v52 = vmul.f32 %v7945_v29, %v9002_v6  ;;  %v2142_v35 = vpop.xlane.xlu0 %2141 }
 0x5c5   :  { %7952 = vrcp.f32 %v2142_v35  ;;  %v7765_v35 = vld [vmem:[%s10502_s2 + $0x28] sm:$0xff]  }
 0x5c6   :  { %v2180_v62 = vpack.c.bf16 %v2170_v52, %v2169_v44  ;;  %v7764_v52 = vld [vmem:[%s10502_s2 + $0x68] sm:$0xff]  }
 0x5c7   :  { %v7947_v11 = vpop.eup %7946 }
 0x5c8   :  { %7158 = vmatmul.mubr.msk.bf16.vlgmr.msra.gmra.mrb[68].mxu1 %vm799_vm4, %v2180_v62  ;;  %v1490_v7 = vpop.permute.xlu0 %1489  ;;  %v2172_v53 = vmul.f32 %v7947_v11, %v9006_v56  ;;  %v7755_v56 = vld [vmem:[%s10502_s2] sm:$0xff]   ;;  %v7766_v62 = vld [vmem:[%s10502_s2 + $0x70] sm:$0xff]   ;;  %v7769_v11 = vld [vmem:[%s10502_s2 + $0x38] sm:$0xff]  }
 0x5c9   :  { %7168 = vmatpush3.bf16.msra.mxu1 %v2580_v16  ;;  %v2189_v47 = vpack.c.bf16 %v1490_v7, %v10560_v0  ;;  %7169 = vmatprep.mubr.msk.bf16.mxu1 %vm8111_vm1, %v10546_v18  ;;  %v7767_v16 = vld [vmem:[%s10502_s2 + $0x30] sm:$0xff]   ;;  %v7768_v0 = vld [vmem:[%s10502_s2 + $0x78] sm:$0xff]  }
 0x5cb   :  { %v2518_v20 = vshll.u32 %v2189_v47, 16  ;;  %v7949_v4 = vpop.eup %7948  ;;  %v2516_v36 = vshrl.u32 %v2189_v47, 16 }
 0x5cc   :  { %v7951_v13 = vpop.eup %7950  ;;  %v2173_v19 = vmul.f32 %v7949_v4, %v9010_v46 }
 0x5cd   :  { %v2520_v6 = vrot.slane %v2518_v20, 1  ;;  %v2171_v48 = vmul.f32 %v7951_v13, %v8996_v3 }
 0x5cf   :  { %v7953_v51 = vpop.eup %7952  ;;  %v2521_v55 = vor.u32 %v2520_v6, %v2516_v36  ;;  %v2181_v43 = vpack.c.bf16 %v2172_v53, %v2171_v48 }
 0x5d0   :  { %v2174_v22 = vmul.f32 %v7953_v51, %v9014_v12 }
 0x5d1   :  { %v2526_v25 = vand.u32 %v2521_v55, %v8440_v21 }
 0x5d2   :  { %v2182_v61 = vpack.c.bf16 %v2174_v22, %v2173_v19 }
 0x5d3   :  { %7162 = vmatpush3.bf16.msra.mxu0 %v2526_v25  ;;  %v7528_v25 = vpop.permute.xlu1 %7527 }
 0x5d4   :  { %7170 = vmatmul.mubr.msk.bf16.vlgmr.msra.gmra.mrb[72].mxu1 %vm799_vm4, %v2182_v61  ;;  %6829 = vmatprep.subr.bf16.mxu0 %v7754_v57  ;;  %v7533_v61 = vpop.permute.xlu0 %7532 }
 0x5d6   :  { %7164 = vmatmul.mubr.msk.bf16.vlgmr.msra.gmra.mrb[72].mxu0 %vm799_vm4, %v2181_v43 }
 0x5d7   :  { %6830 = vmatpush3.bf16.msra.mxu0 %v7755_v56  ;;  %v7538_v48 = vpop.permute.xlu1 %7537  ;;  %v7530_v56 = vunpack.i.h.bf16 %v7528_v25 }
 0x5d8   :  { %6831 = vmatprep.subr.bf16.mxu0 %v7756_v32 }
 0x5db   :  { %6832 = vmatpush3.bf16.msra.mxu0 %v7757_v26  ;;  %v7548_v43 = vpop.permute.xlu1 %7547 }
 0x5dc   :  { %6833 = vmatprep.subr.bf16.mxu0 %v7758_v14 }
 0x5df   :  { %6834 = vmatpush3.bf16.msra.mxu0 %v7759_v40  ;;  %v7535_v40 = vunpack.i.h.bf16 %v7533_v61 }
 0x5e0   :  { %6835 = vmatprep.subr.bf16.mxu0 %v7760_v2  ;;  %v7534_v2 = vunpack.i.l.bf16 %v7533_v61 }
 0x5e3   :  { %6836 = vmatpush3.bf16.msra.mxu0 %v7761_v37 }
 0x5e4   :  { %6837 = vmatprep.subr.bf16.mxu0 %v7762_v17 }
 0x5e7   :  { %6838 = vmatpush3.bf16.msra.mxu0 %v7763_v30 }
 0x5e8   :  { %6839 = vmatprep.subr.bf16.mxu0 %v7764_v52 }
 0x5eb   :  { %6840 = vmatpush3.bf16.msra.mxu0 %v7765_v35 }
 0x5ec   :  { %6841 = vmatprep.subr.bf16.mxu0 %v7766_v62 }
 0x5ef   :  { %6842 = vmatpush3.bf16.msra.mxu0 %v7767_v16 }
 0x5f0   :  { %6843 = vmatprep.subr.bf16.mxu0 %v7768_v0 }
 0x5f3   :  { %6844 = vmatpush3.bf16.msra.mxu0 %v7769_v11 }
 0x67c   :  { %v9110_v46 = vpop.f32.mrb[60].mxu0 }
 0x67d   :  { %v7129_v3 = vpop.f32.mrb[61].mxu0 }
 0x67e   :  { %v9112_v12 = vpop.f32.mrb[62].mxu0  ;;  %v7543_v3 = vpop.permute.xlu0 %7542 }
 0x67f   :  { %v7130_v1 = vpop.f32.mrb[63].mxu0 }
 0x680   :  { %v7529_v1 = vunpack.i.l.bf16 %v7528_v25 }
 0x682   :  { %v7553_v14 = vpop.permute.xlu0 %7552 }
 0x686   :  { %v2292_v58 = vpop.f32.mrb[60].mxu1 }
 0x687   :  { %v7135_v34 = vpop.f32.mrb[61].mxu1 }
 0x688   :  { %v9114_v60 = vpop.f32.mrb[62].mxu1  ;;  %v7539_v34 = vunpack.i.l.bf16 %v7538_v48 }
 0x689   :  { %v7136_v59 = vpop.f32.mrb[63].mxu1 }
 0x68b   :  { %v2346_v5 = vpop.f32.mrb[64].mxu0 }
 0x68c   :  { %v7141_v15 = vpop.f32.mrb[65].mxu0 }
 0x68d   :  { %v2349_v31 = vpop.f32.mrb[66].mxu0 }
 0x68e   :  { %v7142_v50 = vpop.f32.mrb[67].mxu0 }
 0x68f   :  { %v2400_v54 = vpop.f32.mrb[64].mxu1  ;;  %v1430_v50 = vsel %vm127_vm0, %v8842_v38, %v7529_v1 }
 0x690   :  { %v7147_v63 = vpop.f32.mrb[65].mxu1  ;;  %v1432_v26 = vsel %vm1423_vm6, %v1430_v50, %v7539_v34 }
 0x691   :  { %v2403_v27 = vpop.f32.mrb[66].mxu1 }
 0x692   :  { %v7148_v23 = vpop.f32.mrb[67].mxu1 }
 0x693   :  { %v9122_v45 = vpop.f32.mrb[68].mxu0 }
 0x694   :  { %v7153_v42 = vpop.f32.mrb[69].mxu0 }
 0x695   :  { %v9133_v24 = vpop.f32.mrb[70].mxu0  ;;  %v7545_v42 = vunpack.i.h.bf16 %v7543_v3 }
 0x696   :  { %v7154_v10 = vpop.f32.mrb[71].mxu0 }
 0x697   :  { %v7544_v10 = vunpack.i.l.bf16 %v7543_v3 }
 0x69b   :  { %v2508_v41 = vpop.f32.mrb[68].mxu1 }
 0x69c   :  { %v7556_v49 = vpack.i.bf16 %v2292_v58, %v2508_v41  ;;  %v7159_v39 = vpop.f32.mrb[69].mxu1  ;;  %v7540_v58 = vunpack.i.h.bf16 %v7538_v48  ;;  %v7555_v41 = vunpack.i.h.bf16 %v7553_v14 }
 0x69d   :  { %v2511_v29 = vpop.f32.mrb[70].mxu1 }
 0x69e   :  { %v7571_v33 = vpack.i.bf16 %v9114_v60, %v2511_v29  ;;  %7557 = vrot.lane.b32.xlu1 %v7556_v49, %s8114_s20  ;;  %v7160_v44 = vpop.f32.mrb[71].mxu1  ;;  %v7550_v60 = vunpack.i.h.bf16 %v7548_v43  ;;  %v7554_v49 = vunpack.i.l.bf16 %v7553_v14 }
 0x6a7   :  { %v2616_v7 = vpop.f32.mrb[72].mxu1 }
 0x6a8   :  { %v7566_v47 = vpack.i.bf16 %v2400_v54, %v2616_v7  ;;  %v7171_v20 = vpop.f32.mrb[73].mxu1 }
 0x6a9   :  { %v2562_v4 = vpop.f32.mrb[72].mxu0  ;;  %v2619_v36 = vpop.f32.mrb[74].mxu1 }
 0x6aa   :  { %v7561_v6 = vpack.i.bf16 %v2346_v5, %v2562_v4  ;;  %v7581_v13 = vpack.i.bf16 %v2403_v27, %v2619_v36  ;;  %v7165_v51 = vpop.f32.mrb[73].mxu0  ;;  %v7172_v55 = vpop.f32.mrb[75].mxu1  ;;  %v1422_v5 = vsel %vm127_vm0, %v8826_v28, %v7530_v56  ;;  %v7549_v27 = vunpack.i.l.bf16 %v7548_v43 }
 0x6ab   :  { %v2565_v53 = vpop.f32.mrb[74].mxu0  ;;  %v1425_v54 = vsel %vm1423_vm6, %v1422_v5, %v7540_v58  ;;  %v6553_v5 = vld [vmem:[%s10503_s3] ss:$0 sm:$0xff] }
 0x6ac   :  { %v7576_v19 = vpack.i.bf16 %v2349_v31, %v2565_v53  ;;  %7562 = vrot.lane.b32.xlu1 %v7561_v6, %s8113_s19  ;;  %v7166_v22 = vpop.f32.mrb[75].mxu0  ;;  %v1428_v23 = vsel %vm1426_vm7, %v1425_v54, %v7550_v60  ;;  %v1434_v52 = vsel %vm1426_vm7, %v1432_v26, %v7549_v27  ;;  %v10561_v60 = vmov 0   ;;  %v8106_v27 = vld [vmem:[%s10501_s0] sm:$0xff] }
 0x6ae   :  { %7577 = vrot.lane.b32.xlu0 %v7576_v19, %s8113_s19 }
 0x6b0   :  { %7567 = vrot.lane.b32.xlu1 %v7566_v47, %s8112_s18 }
 0x6b4   :  { %7572 = vrot.lane.b32.xlu1 %v7571_v33, %s8114_s20 }
 0x6b8   :  { %7582 = vrot.lane.b32.xlu1 %v7581_v13, %s8112_s18 }
 0x710   :  { %v7558_v57 = vpop.permute.xlu1 %7557 }
 0x711   :  { %v7560_v15 = vunpack.i.h.bf16 %v7558_v57  ;;  %v7559_v31 = vunpack.i.l.bf16 %v7558_v57 }
 0x713   :  { %v2671_v37 = vsel %vm127_vm0, %v9110_v46, %v7560_v15  ;;  %v2677_v38 = vsel %vm127_vm0, %v9122_v45, %v7559_v31  ;;  %v1421_v46 = vsel %vm127_vm0, %v8824_v9, %v7535_v40  ;;  %v1429_v45 = vsel %vm127_vm0, %v8840_v8, %v7534_v2  ;;  %v8107_v2 = vld [vmem:[%s10501_s0 + $0x8] sm:$0xff] }
 0x714   :  { %v1424_v7 = vsel %vm1423_vm6, %v1421_v46, %v7545_v42  ;;  %v1431_v11 = vsel %vm1423_vm6, %v1429_v45, %v7544_v10 }
 0x715   :  { %v1427_v4 = vsel %vm1426_vm7, %v1424_v7, %v7555_v41  ;;  %v1433_v36 = vsel %vm1426_vm7, %v1431_v11, %v7554_v49  ;;  %v8108_v41 = vld [vmem:[%s10501_s0 + $0x10] sm:$0x3] }
 0x71e   :  { %v7563_v59 = vpop.permute.xlu1 %7562 }
 0x71f   :  { %v7565_v32 = vunpack.i.h.bf16 %v7563_v59  ;;  %v7564_v63 = vunpack.i.l.bf16 %v7563_v59 }
 0x720   :  { %v7578_v0 = vpop.permute.xlu0 %7577 }
 0x721   :  { %v2673_v39 = vsel %vm1423_vm6, %v2671_v37, %v7565_v32  ;;  %v2679_v29 = vsel %vm1423_vm6, %v2677_v38, %v7564_v63  ;;  %v7580_v53 = vunpack.i.h.bf16 %v7578_v0  ;;  %v7579_v19 = vunpack.i.l.bf16 %v7578_v0 }
 0x722   :  { %v7568_v28 = vpop.permute.xlu1 %7567 }
 0x723   :  { %v7570_v17 = vunpack.i.h.bf16 %v7568_v28  ;;  %v7569_v30 = vunpack.i.l.bf16 %v7568_v28 }
 0x725   :  { %v2675_v33 = vsel %vm1426_vm7, %v2673_v39, %v7570_v17  ;;  %v2681_v44 = vsel %vm1426_vm7, %v2679_v29, %v7569_v30 }
 0x726   :  { %v2688_v35 = vrot.slane %v2675_v33, 7  ;;  %v2689_v62 = vrot.slane %v2681_v44, 7  ;;  %v7573_v16 = vpop.permute.xlu1 %7572 }
 0x727   :  { %v7575_v47 = vunpack.i.h.bf16 %v7573_v16  ;;  %v7574_v20 = vunpack.i.l.bf16 %v7573_v16 }
 0x728   :  { %v2699_v6 = vsel %vm2687_vm8, %v1434_v52, %v2689_v62  ;;  %v2698_v9 = vsel %vm2687_vm8, %v1428_v23, %v2688_v35 }
 0x729   :  { %v2672_v8 = vsel %vm127_vm0, %v9112_v12, %v7575_v47  ;;  %v2678_v13 = vsel %vm127_vm0, %v9133_v24, %v7574_v20  ;;  %v2701_v51 = vpack.c.bf16 %v2699_v6, %v1433_v36  ;;  %v2700_v55 = vpack.c.bf16 %v2698_v9, %v1427_v4  ;;  %v7770_v36 = vld [vmem:[%s10504_s6] sm:$0xff]   ;;  %v7771_v6 = vld [vmem:[%s10504_s6 + $0x8] sm:$0xff]  }
 0x72a   :  { %v7583_v22 = vpop.permute.xlu1 %7582  ;;  %v2674_v61 = vsel %vm1423_vm6, %v2672_v8, %v7580_v53  ;;  %v2680_v43 = vsel %vm1423_vm6, %v2678_v13, %v7579_v19  ;;  %7173 = vmatprep.subr.bf16.mxu1 %v7770_v36  ;;  %v7772_v9 = vld [vmem:[%s10505_s8] sm:$0xff]  }
 0x72b   :  { %v7585_v25 = vunpack.i.h.bf16 %v7583_v22  ;;  %v7584_v48 = vunpack.i.l.bf16 %v7583_v22  ;;  %2871 = vmatprep.mubr.bf16.mxu0 %v2701_v51  ;;  %7174 = vmatpush3.bf16.msra.mxu1 %v7770_v36 }
 0x72c   :  { %2872 = vmatmul.mubr.bf16.vlgmr.msra.gmra.mrb[76].mxu0 %v2700_v55  ;;  %7175 = vmatprep.subr.bf16.mxu1 %v7771_v6 }
 0x72d   :  { %v2676_v57 = vsel %vm1426_vm7, %v2674_v61, %v7585_v25  ;;  %v2682_v12 = vsel %vm1426_vm7, %v2680_v43, %v7584_v48  ;;  %v6570_v43 = vld [vmem:[%s10506_s4] ss:$0 sm:$0xff] }
 0x72e   :  { %v2690_v56 = vrot.slane %v2676_v57, 7  ;;  %v2692_v3 = vrot.slane %v2682_v12, 7 }
 0x72f   :  { %7176 = vmatpush3.bf16.msra.mxu1 %v7771_v6 }
 0x730   :  { %v2693_v24 = vsel %vm2687_vm8, %v2689_v62, %v2692_v3  ;;  %v2691_v1 = vsel %vm2687_vm8, %v2688_v35, %v2690_v56  ;;  %7181 = vmatprep.subr.bf16.mxu1 %v7772_v9 }
 0x731   :  { %v2703_v58 = vpack.c.bf16 %v2693_v24, %v2693_v24  ;;  %v2702_v34 = vpack.c.bf16 %v2691_v1, %v2691_v1  ;;  %v6571_v24 = vld [vmem:[%s10507_s5] ss:$0 sm:$0xff] }
 0x733   :  { %2879 = vmatprep.mubr.bf16.mxu0 %v2703_v58 }
 0x734   :  { %2880 = vmatmul.mubr.bf16.gmra.mrb[80].mxu0 %v2702_v34 }
 0x735   :  { %3329 = vmatprep.mubr.bf16.mxu0 %v10561_v60 }
 0x7ff   :  { %v6845_v59 = vpop.f32.mrb[76].mxu0 }
 0x800   :  { %v6846_v15 = vpop.f32.mrb[77].mxu0 }
 0x801   :  { %v6847_v31 = vadd.f32 %v6846_v15, %v6845_v59  ;;  %v6848_v50 = vpop.f32.mrb[78].mxu0 }
 0x802   :  { %v6849_v54 = vpop.f32.mrb[79].mxu0 }
 0x803   :  { %v2874_v32 = vadd.f32 %v6847_v31, %v6553_v5  ;;  %v6850_v63 = vadd.f32 %v6849_v54, %v6848_v50 }
 0x805   :  { %v2877_v26 = vadd.f32 %v6850_v63, %v6553_v5  ;;  %v2887_v23 = vadd.f32 %v8106_v27, %v2874_v32  ;;  %v7773_v32 = vld [vmem:[%s10505_s8 + $0x8] sm:$0xff]   ;;  %v7774_v63 = vld [vmem:[%s10505_s8 + $0x10] sm:$0xff]   ;;  %v7776_v27 = vld [vmem:[%s10505_s8 + $0x20] sm:$0xff]  }
 0x807   :  { %v6851_v14 = vpop.f32.mrb[80].mxu0  ;;  %v2890_v40 = vsel %vm127_vm0, %v2887_v23, 0.0  ;;  %v2888_v42 = vadd.f32 %v8107_v2, %v2877_v26  ;;  %v7775_v26 = vld [vmem:[%s10505_s8 + $0x18] sm:$0xff]   ;;  %v6572_v2 = vld [vmem:[%s10508_s7] ss:$0 sm:$0xff] }
 0x808   :  { %v6852_v10 = vpop.f32.mrb[81].mxu0  ;;  %2891 = vadd.xlane.f32.xlu0 %v2890_v40  ;;  %v7779_v40 = vld [vmem:[%s10505_s8 + $0x38] sm:$0xff]  }
 0x809   :  { %v6853_v28 = vadd.f32 %v6852_v10, %v6851_v14  ;;  %v6854_v37 = vpop.f32.mrb[82].mxu0  ;;  %v2893_v38 = vsel %vm127_vm0, %v2888_v42, 0.0  ;;  %v7778_v14 = vld [vmem:[%s10505_s8 + $0x30] sm:$0xff]  }
 0x80a   :  { %v6855_v17 = vpop.f32.mrb[83].mxu0  ;;  %2894 = vadd.xlane.f32.xlu1 %v2893_v38 }
 0x80b   :  { %v2882_v30 = vadd.f32 %v6853_v28, %v6553_v5 }
 0x80d   :  { %v2889_v49 = vadd.f32 %v8108_v41, %v2882_v30 }
 0x80f   :  { %v2897_v39 = vsel %vm2896_vm9, %v2889_v49, 0.0 }
 0x810   :  { %2898 = vadd.xlane.f32.xlu0 %v2897_v39 }
 0x895   :  { %v2892_v29 = vpop.xlane.xlu0 %2891 }
 0x896   :  { %v2901_v33 = vmul.f32 0.03125, %v2892_v29 }
 0x897   :  { %v2895_v44 = vpop.xlane.xlu1 %2894 }
 0x898   :  { %v2904_v52 = vsub.f32 %v2887_v23, %v2901_v33  ;;  %v2902_v46 = vmul.f32 0.03125, %v2895_v44  ;;  %v7777_v23 = vld [vmem:[%s10505_s8 + $0x28] sm:$0xff]   ;;  %v6577_v44 = vld [vmem:[%s10509_s9] ss:$0 sm:$0xff] }
 0x89a   :  { %v2905_v45 = vsub.f32 %v2888_v42, %v2902_v46  ;;  %v2907_v35 = vmul.f32 %v2904_v52, %v2904_v52 }
 0x89c   :  { %v2910_v62 = vsel %vm127_vm0, %v2907_v35, 0.0  ;;  %v2908_v16 = vmul.f32 %v2905_v45, %v2905_v45 }
 0x89d   :  { %2911 = vadd.xlane.f32.xlu0 %v2910_v62  ;;  %v2899_v7 = vpop.xlane.xlu0 %2898 }
 0x89e   :  { %v2903_v0 = vmul.f32 0.03125, %v2899_v7  ;;  %v2913_v47 = vsel %vm127_vm0, %v2908_v16, 0.0 }
 0x89f   :  { %2914 = vadd.xlane.f32.xlu1 %v2913_v47 }
 0x8a0   :  { %v2906_v20 = vsub.f32 %v2889_v49, %v2903_v0 }
 0x8a2   :  { %v2909_v11 = vmul.f32 %v2906_v20, %v2906_v20 }
 0x8a4   :  { %v2916_v4 = vsel %vm2896_vm9, %v2909_v11, 0.0 }
 0x8a5   :  { %2917 = vadd.xlane.f32.xlu0 %v2916_v4 }
 0x92a   :  { %v2912_v8 = vpop.xlane.xlu0 %2911 }
 0x92b   :  { %v2919_v13 = vmul.f32 0.03125, %v2912_v8 }
 0x92c   :  { %v2915_v51 = vpop.xlane.xlu1 %2914 }
 0x92d   :  { %v2922_v55 = vadd.f32 1e-05, %v2919_v13  ;;  %v2920_v53 = vmul.f32 0.03125, %v2915_v51 }
 0x92f   :  { %7954 = vrsqrt.f32 %v2922_v55  ;;  %v2923_v19 = vadd.f32 1e-05, %v2920_v53 }
 0x931   :  { %7956 = vrsqrt.f32 %v2923_v19 }
 0x932   :  { %v2918_v22 = vpop.xlane.xlu0 %2917 }
 0x933   :  { %v2921_v25 = vmul.f32 0.03125, %v2918_v22 }
 0x935   :  { %v2924_v48 = vadd.f32 1e-05, %v2921_v25 }
 0x937   :  { %7958 = vrsqrt.f32 %v2924_v48  ;;  %v7782_v48 = vld [vmem:[%s10500_s1 + $0x64] ss:$24 sps:$4 sm:$0xff]  }
 0x938   :  { %3297 = vmatprep.subr.bf16.mxu0 %v7782_v48 }
 0x939   :  { %v7955_v61 = vpop.eup %7954 }
 0x93a   :  { %v2928_v57 = vmul.f32 %v7955_v61, %v2904_v52  ;;  %v7785_v61 = vld [vmem:[%s10500_s1 + $0x6c] ss:$24 sps:$4 sm:$0xff]  }
 0x93b   :  { %v7957_v12 = vpop.eup %7956 }
 0x93c   :  { %v2929_v56 = vmul.f32 %v7957_v12, %v2905_v45  ;;  %v2938_v3 = vmul.f32 %v6570_v43, %v2928_v57  ;;  %v7783_v57 = vld [vmem:[%s10500_s1 + $0x68] ss:$24 sps:$4 sm:$0xff]   ;;  %v7788_v12 = vld [vmem:[%s10500_s1 + $0x94] ss:$24 sps:$4 sm:$0xff]  }
 0x93e   :  { %v2939_v1 = vmul.f32 %v6570_v43, %v2929_v56  ;;  %v2948_v58 = vadd.f32 %v6571_v24, %v2938_v3  ;;  %v7791_v56 = vld [vmem:[%s10500_s1 + $0x9c] ss:$24 sps:$4 sm:$0xff]   ;;  %v7786_v3 = vld [vmem:[%s10500_s1 + $0x90] ss:$24 sps:$4 sm:$0xff]  }
 0x940   :  { %v2949_v34 = vadd.f32 %v6571_v24, %v2939_v1 }
 0x941   :  { %v7959_v59 = vpop.eup %7958 }
 0x942   :  { %v2930_v5 = vmul.f32 %v7959_v59, %v2906_v20  ;;  %v2951_v15 = vpack.c.bf16 %v2949_v34, %v2948_v58 }
 0x944   :  { %7177 = vmatprep.mubr.msk.bf16.mxu1 %vm127_vm0, %v2951_v15  ;;  %v2940_v31 = vmul.f32 %v6570_v43, %v2930_v5  ;;  %v7780_v43 = vld [vmem:[%s10500_s1 + $0x60] ss:$24 sps:$4 sm:$0xff]  }
 0x945   :  { %3298 = vmatpush1.bf16.msra.mxu0 %v7780_v43 }
 0x946   :  { %v9240_v50 = vadd.f32 %v6571_v24, %v2940_v31  ;;  %v7789_v24 = vld [vmem:[%s10500_s1 + $0x98] ss:$24 sps:$4 sm:$0xff]   ;;  %3299 = vmatprep.subr.bf16.mxu0 %v7788_v12 }
 0x948   :  { %v2952_v54 = vpack.c.bf16 %v9240_v50, %v9240_v50 }
 0x949   :  { %3300 = vmatpush1.bf16.msra.mxu0 %v7786_v3 }
 0x94a   :  { %7178 = vmatmul.mubr.msk.bf16.vlgmr.msra.gmra.mrb[76].mxu1 %vm127_vm0, %v2952_v54 }
 0x94b   :  { %7182 = vmatpush3.bf16.msra.mxu1 %v7772_v9 }
 0x94c   :  { %7183 = vmatprep.subr.bf16.mxu1 %v7773_v32 }
 0x94f   :  { %7184 = vmatpush3.bf16.msra.mxu1 %v7773_v32 }
 0x950   :  { %7185 = vmatprep.subr.bf16.mxu1 %v7774_v63 }
 0x953   :  { %7186 = vmatpush3.bf16.msra.mxu1 %v7774_v63 }
 0x954   :  { %7187 = vmatprep.subr.bf16.mxu1 %v7775_v26 }
 0x957   :  { %7188 = vmatpush3.bf16.msra.mxu1 %v7775_v26 }
 0x958   :  { %7189 = vmatprep.subr.bf16.mxu1 %v7776_v27 }
 0x95b   :  { %7190 = vmatpush3.bf16.msra.mxu1 %v7776_v27  ;;  %v6586_v27 = vld [vmem:[%s10510_s10] ss:$0 sm:$0xff] }
 0x95c   :  { %7191 = vmatprep.subr.bf16.mxu1 %v7777_v23 }
 0x95f   :  { %7192 = vmatpush3.bf16.msra.mxu1 %v7777_v23 }
 0x960   :  { %7193 = vmatprep.subr.bf16.mxu1 %v7778_v14 }
 0x963   :  { %7194 = vmatpush3.bf16.msra.mxu1 %v7778_v14 }
 0x964   :  { %7195 = vmatprep.subr.bf16.mxu1 %v7779_v40 }
 0x967   :  { %7196 = vmatpush3.bf16.msra.mxu1 %v7779_v40 }
 0x968   :  { %3348 = vmatprep.subr.bf16.mxu1 %v7785_v61 }
 0xa1d   :  { %v7179_v42 = vpop.f32.mrb[76].mxu1 }
 0xa1e   :  { %v3025_v10 = vadd.f32 %v7179_v42, %v6572_v2  ;;  %v3016_v28 = vpop.f32.mrb[77].mxu1  ;;  %v6587_v42 = vld [vmem:[%s10511_s11] ss:$0 sm:$0xff] }
 0xa1f   :  { %v3017_v37 = vadd.f32 %v6572_v2, %v3016_v28  ;;  %v7180_v38 = vpop.f32.mrb[78].mxu1 }
 0xa20   :  { %v3019_v17 = vpop.f32.mrb[79].mxu1  ;;  %v3032_v41 = vmax.f32 %v3025_v10, 0.0 }
 0xa21   :  { %v3020_v30 = vadd.f32 %v6572_v2, %v3019_v17  ;;  %v3030_v49 = vmax.f32 %v3017_v37, 0.0  ;;  %v7794_v17 = vld [vmem:[%s10500_s1 + $0x74] ss:$24 sps:$4 sm:$0xff]  }
 0xa22   :  { %v3034_v33 = vpack.c.bf16 %v3032_v41, %v3032_v41  ;;  %v7797_v41 = vld [vmem:[%s10500_s1 + $0xa4] ss:$24 sps:$4 sm:$0xff]   ;;  %3399 = vmatprep.subr.bf16.mxu0 %v7794_v17 }
 0xa23   :  { %v3031_v39 = vmax.f32 %v3020_v30, 0.0  ;;  %v7792_v30 = vld [vmem:[%s10500_s1 + $0x70] ss:$24 sps:$4 sm:$0xff]  }
 0xa25   :  { %v3033_v29 = vpack.c.bf16 %v3031_v39, %v3030_v49  ;;  %v7795_v49 = vld [vmem:[%s10500_s1 + $0xa0] ss:$24 sps:$4 sm:$0xff]  }
 0xa27   :  { %7197 = vmatprep.mubr.bf16.mxu1 %v3033_v29 }
 0xa28   :  { %7198 = vmatmul.mubr.bf16.vlgmr.msra.gmra.mrb[80].mxu1 %v3034_v33 }
 0xa29   :  { %3380 = vmatprep.mubr.bf16.mxu1 %v10561_v60  ;;  %3349 = vmatpush1.bf16.msra.mxu1 %v7783_v57 }
 0xa2a   :  { %3350 = vmatprep.subr.bf16.mxu1 %v7791_v56 }
 0xa2d   :  { %3351 = vmatpush1.bf16.msra.mxu1 %v7789_v24 }
 0xa2e   :  { %7201 = vmatprep.subr.bf16.mxu1 %v10546_v18 }
 0xafb   :  { %v7199_v52 = vpop.f32.mrb[80].mxu1 }
 0xafc   :  { %v3149_v46 = vadd.f32 %v7199_v52, %v6577_v44  ;;  %v3140_v45 = vpop.f32.mrb[81].mxu1 }
 0xafd   :  { %v3141_v35 = vadd.f32 %v6577_v44, %v3140_v45  ;;  %v7200_v62 = vpop.f32.mrb[82].mxu1 }
 0xafe   :  { %v3143_v16 = vpop.f32.mrb[83].mxu1  ;;  %v3156_v55 = vadd.f32 %v3149_v46, %v9240_v50 }
 0xaff   :  { %v3154_v7 = vadd.f32 %v3141_v35, %v2948_v58  ;;  %v3144_v0 = vadd.f32 %v6577_v44, %v3143_v16 }
 0xb00   :  { %v3163_v25 = vsel %vm2896_vm9, %v3156_v55, 0.0 }
 0xb01   :  { %v3155_v47 = vadd.f32 %v3144_v0, %v2949_v34  ;;  %v3157_v20 = vsel %vm127_vm0, %v3154_v7, 0.0 }
 0xb02   :  { %3158 = vadd.xlane.f32.xlu1 %v3157_v20 }
 0xb03   :  { %v3160_v11 = vsel %vm127_vm0, %v3155_v47, 0.0 }
 0xb04   :  { %3161 = vadd.xlane.f32.xlu0 %v3160_v11 }
 0xb8f   :  { %v3159_v4 = vpop.xlane.xlu1 %3158 }
 0xb90   :  { %v3166_v36 = vmul.f32 0.03125, %v3159_v4 }
 0xb91   :  { %v3162_v6 = vpop.xlane.xlu0 %3161 }
 0xb92   :  { %v3169_v9 = vsub.f32 %v3154_v7, %v3166_v36  ;;  %v3167_v8 = vmul.f32 0.03125, %v3162_v6 }
 0xb94   :  { %v3170_v13 = vsub.f32 %v3155_v47, %v3167_v8  ;;  %v3172_v51 = vmul.f32 %v3169_v9, %v3169_v9 }
 0xb96   :  { %v3175_v53 = vsel %vm127_vm0, %v3172_v51, 0.0  ;;  %v3173_v19 = vmul.f32 %v3170_v13, %v3170_v13 }
 0xb97   :  { %3176 = vadd.xlane.f32.xlu1 %v3175_v53 }
 0xb98   :  { %v3178_v22 = vsel %vm127_vm0, %v3173_v19, 0.0 }
 0xb99   :  { %3179 = vadd.xlane.f32.xlu0 %v3178_v22 }
 0xb9b   :  { %3164 = vadd.xlane.f32.xlu1 %v3163_v25 }
 0xc24   :  { %v3177_v1 = vpop.xlane.xlu1 %3176 }
 0xc25   :  { %v3184_v58 = vmul.f32 0.03125, %v3177_v1 }
 0xc26   :  { %v3180_v34 = vpop.xlane.xlu0 %3179 }
 0xc27   :  { %v3187_v59 = vadd.f32 1e-05, %v3184_v58  ;;  %v3185_v5 = vmul.f32 0.03125, %v3180_v34 }
 0xc28   :  { %v3165_v15 = vpop.xlane.xlu1 %3164 }
 0xc29   :  { %7960 = vrsqrt.f32 %v3187_v59  ;;  %v3188_v31 = vadd.f32 1e-05, %v3185_v5  ;;  %v3168_v50 = vmul.f32 0.03125, %v3165_v15 }
 0xc2b   :  { %7962 = vrsqrt.f32 %v3188_v31  ;;  %v3171_v54 = vsub.f32 %v3156_v55, %v3168_v50 }
 0xc2d   :  { %v3174_v32 = vmul.f32 %v3171_v54, %v3171_v54 }
 0xc2f   :  { %v3181_v63 = vsel %vm2896_vm9, %v3174_v32, 0.0 }
 0xc30   :  { %3182 = vadd.xlane.f32.xlu0 %v3181_v63 }
 0xc33   :  { %v7961_v26 = vpop.eup %7960 }
 0xc34   :  { %v3193_v23 = vmul.f32 %v7961_v26, %v3169_v9 }
 0xc35   :  { %v7963_v14 = vpop.eup %7962 }
 0xc36   :  { %v3203_v40 = vmul.f32 %v6586_v27, %v3193_v23  ;;  %v3194_v2 = vmul.f32 %v7963_v14, %v3170_v13 }
 0xc38   :  { %v3204_v10 = vmul.f32 %v6586_v27, %v3194_v2  ;;  %v9311_v28 = vadd.f32 %v6587_v42, %v3203_v40 }
 0xc3a   :  { %v9313_v37 = vadd.f32 %v6587_v42, %v3204_v10 }
 0xc3c   :  { %v3216_v38 = vpack.c.bf16 %v9313_v37, %v9311_v28 }
 0xc3e   :  { %6612 = vmatmul.mubr.msk.bf16.vlgmr.msra.gmra.mrb[84].mxu0 %vm127_vm0, %v3216_v38  ;;  %6614 = vmatmul.mubr.msk.bf16.vlgmr.msra.gmra.mrb[84].mxu1 %vm127_vm0, %v3216_v38 }
 0xc3f   :  { %3339 = vmatprep.mubr.bf16.mxu0 %v10561_v60  ;;  %3390 = vmatprep.mubr.bf16.mxu1 %v10561_v60 }
 0xc40   :  { %3400 = vmatpush1.bf16.msra.mxu0 %v7792_v30 }
 0xc41   :  { %3401 = vmatprep.subr.bf16.mxu0 %v7797_v41 }
 0xc44   :  { %3402 = vmatpush1.bf16.msra.mxu0 %v7795_v49 }
 0xc45   :  { %7213 = vmatprep.subr.bf16.mxu0 %v10546_v18 }
 0xcbd   :  { %v3183_v39 = vpop.xlane.xlu0 %3182 }
 0xcbe   :  { %v3186_v29 = vmul.f32 0.03125, %v3183_v39 }
 0xcc0   :  { %v3189_v33 = vadd.f32 1e-05, %v3186_v29 }
 0xcc2   :  { %7964 = vrsqrt.f32 %v3189_v33 }
 0xccc   :  { %v7965_v44 = vpop.eup %7964 }
 0xccd   :  { %v3195_v52 = vmul.f32 %v7965_v44, %v3171_v54 }
 0xccf   :  { %v3205_v46 = vmul.f32 %v6586_v27, %v3195_v52 }
 0xcd1   :  { %v9334_v45 = vadd.f32 %v6587_v42, %v3205_v46 }
 0xcd3   :  { %v3217_v35 = vpack.c.bf16 %v9334_v45, %v9334_v45 }
 0xcd5   :  { %6613 = vmatmul.mubr.msk.bf16.gmra.mrb[88].mxu0 %vm127_vm0, %v3217_v35  ;;  %6615 = vmatmul.mubr.msk.bf16.gmra.mrb[88].mxu1 %vm127_vm0, %v3217_v35 }
 0xcd6   :  { %3431 = vmatprep.mubr.bf16.mxu0 %v10561_v60  ;;  %7203 = vmatprep.mubr.msk.bf16.mxu1 %vm8111_vm1, %v10546_v18 }
 0xcdd   :  { %6616 = vmatmul.mubr.msk.bf16.vlgmr.msra.gmra.mrb[92].mxu0 %vm127_vm0, %v3216_v38 }
 0xcde   :  { %3441 = vmatprep.mubr.bf16.mxu0 %v10561_v60 }
 0xce5   :  { %6617 = vmatmul.mubr.msk.bf16.gmra.mrb[96].mxu0 %vm127_vm0, %v3217_v35 }
 0xce6   :  { %7215 = vmatprep.mubr.msk.bf16.mxu0 %vm8111_vm1, %v10546_v18 }
 0xd11   :  { %v3331_v62 = vpop.f32.mrb[84].mxu0  ;;  %v3382_v16 = vpop.f32.mrb[84].mxu1 }
 0xd12   :  { %v9348_v7 = vpop.f32.mrb[85].mxu0  ;;  %v9350_v0 = vpop.f32.mrb[85].mxu1 }
 0xd13   :  { %v9352_v47 = vpop.f32.mrb[86].mxu0  ;;  %v9354_v20 = vpop.f32.mrb[86].mxu1 }
 0xd14   :  { %v3570_v11 = vpack.c.bf16 %v9352_v47, %v3331_v62  ;;  %v9357_v4 = vpop.f32.mrb[87].mxu0  ;;  %v9359_v60 = vpop.f32.mrb[87].mxu1  ;;  %v7586_v36 = vpack.i.bf16 %v9354_v20, %v3382_v16  ;;  %v3578_v6 = vpack.c.bf16 %v9354_v20, %v3382_v16  ;;  %v7596_v8 = vpack.i.bf16 %v9352_v47, %v3331_v62 }
 0xd15   :  { %v3574_v9 = vpack.c.bf16 %v9357_v4, %v9348_v7  ;;  %v7616_v51 = vpack.i.bf16 %v9359_v60, %v9350_v0  ;;  %v7626_v55 = vpack.i.bf16 %v9357_v4, %v9348_v7  ;;  %v3582_v53 = vpack.c.bf16 %v9359_v60, %v9350_v0 }
 0xd16   :  { %7587 = vrot.lane.b32.xlu1 %v7586_v36, %s8112_s18  ;;  %7592 = vrot.lane.b32.xlu0 %v7586_v36, %s8113_s19  ;;  %v3590_v13 = vsel %vm127_vm0, %v3578_v6, 0 }
 0xd17   :  { %7202 = vmatpush3.bf16.xpose.msra.mxu1 %v3590_v13  ;;  %v3778_v2 = vsel %vm127_vm0, %v3582_v53, 0 }
 0xd18   :  { %7207 = vmatprep.subr.bf16.mxu1 %v10546_v18 }
 0xd1a   :  { %7597 = vrot.lane.b32.xlu1 %v7596_v8, %s8112_s18  ;;  %7607 = vrot.lane.b32.xlu0 %v7596_v8, %s8113_s19 }
 0xd1e   :  { %7602 = vrot.lane.b32.xlu1 %v7586_v36, %s8114_s20  ;;  %7617 = vrot.lane.b32.xlu0 %v7616_v51, %s8112_s18 }
 0xd1f   :  { %7204 = vmatmul.mubr.msk.bf16.vlgmr.msra.gmra.mrb[92].mxu1 %vm127_vm0, %v3570_v11 }
 0xd20   :  { %7209 = vmatprep.mubr.msk.bf16.mxu1 %vm8111_vm1, %v10546_v18 }
 0xd22   :  { %7612 = vrot.lane.b32.xlu1 %v7596_v8, %s8114_s20  ;;  %7627 = vrot.lane.b32.xlu0 %v7626_v55, %s8112_s18 }
 0xd26   :  { %7622 = vrot.lane.b32.xlu1 %v7616_v51, %s8113_s19  ;;  %7637 = vrot.lane.b32.xlu0 %v7626_v55, %s8113_s19 }
 0xd2a   :  { %7632 = vrot.lane.b32.xlu1 %v7616_v51, %s8114_s20 }
 0xd2e   :  { %7642 = vrot.lane.b32.xlu1 %v7626_v55, %s8114_s20 }
 0xd88   :  { %v9389_v19 = vpop.permute.xlu0 %7592  ;;  %v9391_v22 = vpop.permute.xlu1 %7587 }
 0xd89   :  { %v10541_v25 = vunpack.i.h.bf16 %v9389_v19  ;;  %v7594_v48 = vunpack.i.l.bf16 %v9389_v19  ;;  %v10542_v61 = vunpack.i.h.bf16 %v9391_v22  ;;  %v7589_v43 = vunpack.i.l.bf16 %v9391_v22 }
 0xd8b   :  { %v3579_v57 = vpack.c.bf16 %v10542_v61, %v7589_v43  ;;  %v3580_v12 = vpack.c.bf16 %v10541_v25, %v7594_v48 }
 0xd8c   :  { %v9401_v56 = vpop.permute.xlu0 %7607  ;;  %v9403_v3 = vpop.permute.xlu1 %7597 }
 0xd8d   :  { %v3637_v24 = vsel %vm127_vm0, %v3579_v57, 0  ;;  %v3684_v1 = vsel %vm127_vm0, %v3580_v12, 0  ;;  %v10538_v58 = vunpack.i.h.bf16 %v9401_v56  ;;  %v7609_v34 = vunpack.i.l.bf16 %v9401_v56 }
 0xd8e   :  { %7208 = vmatpush3.bf16.xpose.msra.mxu1 %v3637_v24  ;;  %7214 = vmatpush3.bf16.xpose.msra.mxu0 %v3684_v1  ;;  %v10539_v59 = vunpack.i.h.bf16 %v9403_v3  ;;  %v7599_v5 = vunpack.i.l.bf16 %v9403_v3 }
 0xd8f   :  { %7219 = vmatprep.subr.bf16.mxu1 %v10546_v18  ;;  %7225 = vmatprep.subr.bf16.mxu0 %v10546_v18  ;;  %v3572_v63 = vpack.c.bf16 %v10538_v58, %v7609_v34 }
 0xd90   :  { %v9411_v15 = vpop.permute.xlu1 %7602  ;;  %v9415_v31 = vpop.permute.xlu0 %7617  ;;  %v3571_v26 = vpack.c.bf16 %v10539_v59, %v7599_v5 }
 0xd91   :  { %v10540_v50 = vunpack.i.h.bf16 %v9411_v15  ;;  %v7604_v54 = vunpack.i.l.bf16 %v9411_v15  ;;  %v10536_v23 = vunpack.i.h.bf16 %v9415_v31  ;;  %v7619_v14 = vunpack.i.l.bf16 %v9415_v31 }
 0xd93   :  { %v3581_v32 = vpack.c.bf16 %v10540_v50, %v7604_v54  ;;  %v3583_v49 = vpack.c.bf16 %v10536_v23, %v7619_v14 }
 0xd94   :  { %v9425_v27 = vpop.permute.xlu1 %7612  ;;  %v9433_v42 = vpop.permute.xlu0 %7627 }
 0xd95   :  { %7210 = vmatmul.mubr.msk.bf16.vlgmr.msra.gmra.mrb[96].mxu1 %vm127_vm0, %v3571_v26  ;;  %7216 = vmatmul.mubr.msk.bf16.vlgmr.msra.gmra.mrb[100].mxu0 %vm127_vm0, %v3572_v63  ;;  %v3731_v40 = vsel %vm127_vm0, %v3581_v32, 0  ;;  %v10535_v10 = vunpack.i.h.bf16 %v9425_v27  ;;  %v7614_v38 = vunpack.i.l.bf16 %v9425_v27  ;;  %v3825_v62 = vsel %vm127_vm0, %v3583_v49, 0 }
 0xd96   :  { %7220 = vmatpush3.bf16.xpose.msra.mxu1 %v3731_v40  ;;  %7226 = vmatpush3.bf16.xpose.msra.mxu0 %v3778_v2  ;;  %v10533_v16 = vunpack.i.h.bf16 %v9433_v42  ;;  %v7629_v0 = vunpack.i.l.bf16 %v9433_v42 }
 0xd97   :  { %7227 = vmatprep.mubr.msk.bf16.mxu0 %vm8111_vm1, %v10546_v18  ;;  %7221 = vmatprep.mubr.msk.bf16.mxu1 %vm8111_vm1, %v10546_v18  ;;  %v3573_v29 = vpack.c.bf16 %v10535_v10, %v7614_v38 }
 0xd98   :  { %v9437_v17 = vpop.permute.xlu1 %7622  ;;  %7231 = vmatprep.subr.bf16.mxu1 %v10546_v18  ;;  %7237 = vmatprep.subr.bf16.mxu0 %v10546_v18  ;;  %v9455_v44 = vpop.permute.xlu0 %7637  ;;  %v3575_v6 = vpack.c.bf16 %v10533_v16, %v7629_v0 }
 0xd99   :  { %v10537_v30 = vunpack.i.h.bf16 %v9437_v17  ;;  %v7624_v41 = vunpack.i.l.bf16 %v9437_v17  ;;  %v10532_v11 = vunpack.i.h.bf16 %v9455_v44  ;;  %v7639_v36 = vunpack.i.l.bf16 %v9455_v44 }
 0xd9b   :  { %v3584_v39 = vpack.c.bf16 %v10537_v30, %v7624_v41 }
 0xd9c   :  { %v9453_v33 = vpop.permute.xlu1 %7632 }
 0xd9d   :  { %v3872_v52 = vsel %vm127_vm0, %v3584_v39, 0  ;;  %v10534_v46 = vunpack.i.h.bf16 %v9453_v33  ;;  %v7634_v35 = vunpack.i.l.bf16 %v9453_v33  ;;  %7222 = vmatmul.mubr.msk.bf16.vlgmr.msra.gmra.mrb[100].mxu1 %vm127_vm0, %v3573_v29  ;;  %7228 = vmatmul.mubr.msk.bf16.vlgmr.msra.gmra.mrb[104].mxu0 %vm127_vm0, %v3574_v9  ;;  %v3576_v9 = vpack.c.bf16 %v10532_v11, %v7639_v36 }
 0xd9e   :  { %7232 = vmatpush3.bf16.xpose.msra.mxu1 %v3825_v62  ;;  %7238 = vmatpush3.bf16.xpose.msra.mxu0 %v3872_v52 }
 0xd9f   :  { %7233 = vmatprep.mubr.msk.bf16.mxu1 %vm8111_vm1, %v10546_v18  ;;  %7239 = vmatprep.mubr.msk.bf16.mxu0 %vm8111_vm1, %v10546_v18  ;;  %v3585_v7 = vpack.c.bf16 %v10534_v46, %v7634_v35 }
 0xda0   :  { %7243 = vmatprep.subr.bf16.mxu1 %v10546_v18  ;;  %7249 = vmatprep.subr.bf16.mxu0 %v10546_v18  ;;  %v9482_v8 = vpop.permute.xlu1 %7642 }
 0xda1   :  { %v3919_v13 = vsel %vm127_vm0, %v3585_v7, 0  ;;  %v10530_v51 = vunpack.i.h.bf16 %v9482_v8  ;;  %v7644_v55 = vunpack.i.l.bf16 %v9482_v8 }
 0xda5   :  { %7234 = vmatmul.mubr.msk.bf16.vlgmr.msra.gmra.mrb[104].mxu1 %vm127_vm0, %v3575_v6  ;;  %7240 = vmatmul.mubr.msk.bf16.vlgmr.msra.gmra.mrb[108].mxu0 %vm127_vm0, %v3576_v9 }
 0xda6   :  { %7244 = vmatpush3.bf16.xpose.msra.mxu1 %v3919_v13  ;;  %7245 = vmatprep.mubr.msk.bf16.mxu1 %vm8111_vm1, %v10546_v18 }
 0xda7   :  { %7255 = vmatprep.subr.bf16.mxu1 %v10546_v18  ;;  %7251 = vmatprep.mubr.msk.bf16.mxu0 %vm8111_vm1, %v10546_v18 }
 0xda8   :  { %v9491_v53 = vpop.f32.mrb[88].mxu0  ;;  %v9493_v48 = vpop.f32.mrb[88].mxu1 }
 0xda9   :  { %v9500_v43 = vpack.c.bf16 %v9491_v53, %v9352_v47  ;;  %v9504_v57 = vpack.c.bf16 %v9493_v48, %v9354_v20  ;;  %v9506_v12 = vpop.f32.mrb[89].mxu0  ;;  %v9508_v24 = vpop.f32.mrb[89].mxu1  ;;  %v3577_v20 = vpack.c.bf16 %v10530_v51, %v7644_v55 }
 0xdaa   :  { %v9512_v1 = vpack.c.bf16 %v9506_v12, %v9357_v4  ;;  %v9516_v34 = vpack.c.bf16 %v9508_v24, %v9359_v60  ;;  %v3345_v5 = vpop.f32.mrb[90].mxu0  ;;  %v3396_v54 = vpop.f32.mrb[90].mxu1 }
 0xdab   :  { %v3346_v47 = vpop.f32.mrb[91].mxu0  ;;  %v3397_v32 = vpop.f32.mrb[91].mxu1 }
 0xdad   :  { %7246 = vmatmul.mubr.msk.bf16.vlgmr.msra.gmra.mrb[108].mxu1 %vm127_vm0, %v3577_v20 }
 0xdae   :  { %7257 = vmatprep.mubr.msk.bf16.mxu1 %vm8111_vm1, %v10546_v18 }
 0xdb0   :  { %v3433_v63 = vpop.f32.mrb[92].mxu0 }
 0xdb1   :  { %v9523_v26 = vpop.f32.mrb[93].mxu0 }
 0xdb2   :  { %v3437_v4 = vpop.f32.mrb[94].mxu0 }
 0xdb3   :  { %v4162_v14 = vpack.c.bf16 %v3437_v4, %v3433_v63  ;;  %v9525_v40 = vpop.f32.mrb[95].mxu0  ;;  %v9527_v60 = vpack.i.bf16 %v3437_v4, %v3433_v63 }
 0xdb4   :  { %v9533_v38 = vpack.i.bf16 %v9525_v40, %v9523_v26 }
 0xdb5   :  { %7647 = vrot.lane.b32.xlu1 %v9527_v60, %s8112_s18  ;;  %v4174_v41 = vand.u32 %v4162_v14, %v8440_v21 }
 0xdb7   :  { %7250 = vmatpush3.bf16.msra.mxu0 %v4174_v41 }
 0xdb8   :  { %v9538_v49 = vpop.f32.mrb[96].mxu0  ;;  %7261 = vmatprep.subr.bf16.mxu0 %v10546_v18 }
 0xdb9   :  { %v9542_v39 = vpack.c.bf16 %v9538_v49, %v3437_v4  ;;  %7652 = vrot.lane.b32.xlu1 %v9527_v60, %s8113_s19  ;;  %v9546_v29 = vpop.f32.mrb[97].mxu0 }
 0xdba   :  { %v9550_v52 = vpack.c.bf16 %v9546_v29, %v9525_v40  ;;  %v3447_v35 = vpop.f32.mrb[98].mxu0 }
 0xdbb   :  { %v3448_v62 = vpop.f32.mrb[99].mxu0 }
 0xdf2   :  { %v9552_v0 = vpop.f32.mrb[92].mxu1 }
 0xdf3   :  { %v7205_v36 = vpop.f32.mrb[93].mxu1  ;;  %v3962_v7 = vsel %vm799_vm4, %v9552_v0, -inf }
 0xdf4   :  { %3963 = vmax.xlane.f32.xlu0 %v3962_v7  ;;  %v9556_v6 = vpop.f32.mrb[94].mxu1 }
 0xdf5   :  { %v7206_v9 = vpop.f32.mrb[95].mxu1  ;;  %v3965_v13 = vsel %vm803_vm5, %v9556_v6, -inf }
 0xdf6   :  { %3966 = vmax.xlane.f32.xlu1 %v3965_v13 }
 0xe27   :  { %v9560_v55 = vpop.permute.xlu1 %7647 }
 0xe28   :  { %v10531_v5 = vunpack.i.h.bf16 %v9560_v55  ;;  %v7649_v54 = vunpack.i.l.bf16 %v9560_v55 }
 0xe2a   :  { %v4163_v47 = vpack.c.bf16 %v10531_v5, %v7649_v54 }
 0xe2c   :  { %v4221_v32 = vand.u32 %v4163_v47, %v8440_v21 }
 0xe2e   :  { %7256 = vmatpush3.bf16.msra.mxu1 %v4221_v32 }
 0xe2f   :  { %7267 = vmatprep.subr.bf16.mxu1 %v10546_v18 }
 0xe68   :  { %v9568_v20 = vpop.f32.mrb[96].mxu1  ;;  %v9570_v63 = vpop.f32.mrb[100].mxu0 }
 0xe69   :  { %v7211_v4 = vpop.f32.mrb[97].mxu1  ;;  %v7217_v14 = vpop.f32.mrb[101].mxu0  ;;  %v3974_v41 = vsel %vm799_vm4, %v9570_v63, -inf  ;;  %v3968_v35 = vsel %vm799_vm4, %v9568_v20, -inf }
 0xe6a   :  { %3975 = vmax.xlane.f32.xlu1 %v3974_v41  ;;  %v9576_v62 = vpop.f32.mrb[102].mxu0  ;;  %3969 = vmax.xlane.f32.xlu0 %v3968_v35  ;;  %v9578_v36 = vpop.f32.mrb[98].mxu1 }
 0xe6b   :  { %v7212_v7 = vpop.f32.mrb[99].mxu1  ;;  %v7218_v9 = vpop.f32.mrb[103].mxu0  ;;  %v3971_v13 = vsel %vm803_vm5, %v9578_v36, -inf  ;;  %v3977_v14 = vsel %vm803_vm5, %v9576_v62, -inf }
 0xe6e   :  { %3972 = vmax.xlane.f32.xlu0 %v3971_v13 }
 0xe70   :  { %v9582_v54 = vpop.f32.mrb[100].mxu1  ;;  %v9584_v47 = vpop.f32.mrb[104].mxu0 }
 0xe71   :  { %v7223_v32 = vpop.f32.mrb[101].mxu1  ;;  %v7229_v4 = vpop.f32.mrb[105].mxu0  ;;  %v3980_v41 = vsel %vm799_vm4, %v9582_v54, -inf  ;;  %v3986_v51 = vsel %vm799_vm4, %v9584_v47, -inf }
 0xe72   :  { %v9590_v35 = vpop.f32.mrb[106].mxu0  ;;  %3978 = vmax.xlane.f32.xlu0 %v3977_v14  ;;  %3981 = vmax.xlane.f32.xlu1 %v3980_v41  ;;  %v9592_v7 = vpop.f32.mrb[102].mxu1 }
 0xe73   :  { %v7224_v9 = vpop.f32.mrb[103].mxu1  ;;  %v7230_v13 = vpop.f32.mrb[107].mxu0  ;;  %v3983_v32 = vsel %vm803_vm5, %v9592_v7, -inf  ;;  %v3989_v14 = vsel %vm803_vm5, %v9590_v35, -inf }
 0xe76   :  { %3987 = vmax.xlane.f32.xlu1 %v3986_v51  ;;  %3984 = vmax.xlane.f32.xlu0 %v3983_v32 }
 0xe78   :  { %v9598_v4 = vpop.f32.mrb[104].mxu1  ;;  %v9600_v5 = vpop.f32.mrb[108].mxu0 }
 0xe79   :  { %v7235_v11 = vpop.f32.mrb[105].mxu1  ;;  %v7241_v16 = vpop.f32.mrb[109].mxu0  ;;  %v3992_v41 = vsel %vm799_vm4, %v9598_v4, -inf  ;;  %v3998_v46 = vsel %vm799_vm4, %v9600_v5, -inf }
 0xe7a   :  { %v9606_v9 = vpop.f32.mrb[110].mxu0  ;;  %3990 = vmax.xlane.f32.xlu0 %v3989_v14  ;;  %3993 = vmax.xlane.f32.xlu1 %v3992_v41  ;;  %v9608_v13 = vpop.f32.mrb[106].mxu1 }
 0xe7b   :  { %v7236_v51 = vpop.f32.mrb[107].mxu1  ;;  %v7242_v32 = vpop.f32.mrb[111].mxu0  ;;  %v3995_v16 = vsel %vm803_vm5, %v9608_v13, -inf  ;;  %v4001_v23 = vsel %vm803_vm5, %v9606_v9, -inf }
 0xe7e   :  { %3999 = vmax.xlane.f32.xlu1 %v3998_v46  ;;  %3996 = vmax.xlane.f32.xlu0 %v3995_v16 }
 0xe80   :  { %v9614_v11 = vpop.f32.mrb[108].mxu1 }
 0xe81   :  { %v7247_v10 = vpop.f32.mrb[109].mxu1  ;;  %v4004_v14 = vsel %vm799_vm4, %v9614_v11, -inf }
 0xe82   :  { %4002 = vmax.xlane.f32.xlu0 %v4001_v23  ;;  %4005 = vmax.xlane.f32.xlu1 %v4004_v14  ;;  %v9620_v41 = vpop.f32.mrb[110].mxu1  ;;  %v9632_v23 = vpop.permute.xlu1 %7652 }
 0xe83   :  { %v7248_v51 = vpop.f32.mrb[111].mxu1  ;;  %v4007_v32 = vsel %vm803_vm5, %v9620_v41, -inf  ;;  %v3964_v14 = vpop.xlane.xlu0 %3963 }
 0xe84   :  { %v4010_v51 = vsub.f32 %v9552_v0, %v3964_v14 }
 0xe86   :  { %4008 = vmax.xlane.f32.xlu0 %v4007_v32  ;;  %v3967_v10 = vpop.xlane.xlu1 %3966  ;;  %v4026_v32 = vmul.f32 1.442695, %v4010_v51 }
 0xe87   :  { %v4011_v46 = vsub.f32 %v9556_v6, %v3967_v10 }
 0xe89   :  { %v4028_v16 = vmul.f32 1.442695, %v4011_v46 }
 0xe8b   :  { %7966 = vpow2.f32 %v4028_v16 }
 0xe8c   :  { %7968 = vpow2.f32 %v4026_v32 }
 0xe93   :  { %7662 = vrot.lane.b32.xlu1 %v9533_v38, %s8112_s18 }
 0xe95   :  { %v9638_v30 = vpop.eup %7966 }
 0xe97   :  { %7667 = vrot.lane.b32.xlu1 %v9533_v38, %s8113_s19 }
 0xe9b   :  { %7672 = vrot.lane.b32.xlu1 %v9533_v38, %s8114_s20  ;;  %v9642_v38 = vpop.eup %7968 }
 0xe9c   :  { %7657 = vrot.lane.b32.xlu0 %v9527_v60, %s8114_s20  ;;  %v4061_v60 = vsel %vm803_vm5, %v9638_v30, 0.0  ;;  %v4058_v58 = vsel %vm799_vm4, %v9642_v38, 0.0 }
 0xe9f   :  { %4627 = vrot.lane.b32.xlu1 %v9493_v48, %s8112_s18 }
 0xebb   :  { %4062 = vadd.xlane.f32.xlu0 %v4061_v60 }
 0xec3   :  { %4059 = vadd.xlane.f32.xlu1 %v4058_v58 }
 0xef7   :  { %v3976_v6 = vpop.xlane.xlu1 %3975  ;;  %v3970_v10 = vpop.xlane.xlu0 %3969 }
 0xef8   :  { %v4014_v46 = vsub.f32 %v9570_v63, %v3976_v6  ;;  %v4012_v0 = vsub.f32 %v9568_v20, %v3970_v10 }
 0xefa   :  { %v4030_v16 = vmul.f32 1.442695, %v4012_v0  ;;  %v4034_v14 = vmul.f32 1.442695, %v4014_v46 }
 0xefb   :  { %v3973_v51 = vpop.xlane.xlu0 %3972 }
 0xefc   :  { %v4013_v32 = vsub.f32 %v9578_v36, %v3973_v51  ;;  %7970 = vpow2.f32 %v4030_v16 }
 0xefd   :  { %7972 = vpow2.f32 %v4034_v14 }
 0xefe   :  { %v4032_v59 = vmul.f32 1.442695, %v4013_v32 }
 0xeff   :  { %v3979_v60 = vpop.xlane.xlu0 %3978  ;;  %v3982_v50 = vpop.xlane.xlu1 %3981 }
 0xf00   :  { %7974 = vpow2.f32 %v4032_v59  ;;  %v4015_v25 = vsub.f32 %v9576_v62, %v3979_v60  ;;  %v4016_v58 = vsub.f32 %v9582_v54, %v3982_v50 }
 0xf02   :  { %v4036_v61 = vmul.f32 1.442695, %v4015_v25  ;;  %v4038_v2 = vmul.f32 1.442695, %v4016_v58 }
 0xf03   :  { %v3988_v63 = vpop.xlane.xlu1 %3987  ;;  %v3985_v6 = vpop.xlane.xlu0 %3984 }
 0xf04   :  { %7976 = vpow2.f32 %v4036_v61  ;;  %v4018_v20 = vsub.f32 %v9584_v47, %v3988_v63  ;;  %v4017_v10 = vsub.f32 %v9592_v7, %v3985_v6 }
 0xf05   :  { %7978 = vpow2.f32 %v4038_v2 }
 0xf06   :  { %v4042_v36 = vmul.f32 1.442695, %v4018_v20  ;;  %v4040_v46 = vmul.f32 1.442695, %v4017_v10  ;;  %v9653_v0 = vpop.eup %7970 }
 0xf07   :  { %v3991_v16 = vpop.xlane.xlu0 %3990  ;;  %v3994_v59 = vpop.xlane.xlu1 %3993  ;;  %v4064_v50 = vsel %vm799_vm4, %v9653_v0, 0.0 }
 0xf08   :  { %7980 = vpow2.f32 %v4042_v36  ;;  %v4019_v62 = vsub.f32 %v9590_v35, %v3991_v16  ;;  %v4020_v25 = vsub.f32 %v9598_v4, %v3994_v59  ;;  %v9659_v61 = vpop.eup %7972  ;;  %4065 = vadd.xlane.f32.xlu1 %v4064_v50 }
 0xf09   :  { %7982 = vpow2.f32 %v4040_v46  ;;  %v4070_v32 = vsel %vm799_vm4, %v9659_v61, 0.0 }
 0xf0a   :  { %v9661_v54 = vpop.eup %7974  ;;  %v4044_v2 = vmul.f32 1.442695, %v4019_v62  ;;  %v4046_v47 = vmul.f32 1.442695, %v4020_v25 }
 0xf0b   :  { %v4000_v7 = vpop.xlane.xlu1 %3999  ;;  %v3997_v14 = vpop.xlane.xlu0 %3996  ;;  %v4067_v51 = vsel %vm803_vm5, %v9661_v54, 0.0 }
 0xf0c   :  { %7984 = vpow2.f32 %v4044_v2  ;;  %v4022_v35 = vsub.f32 %v9600_v5, %v4000_v7  ;;  %v4021_v4 = vsub.f32 %v9608_v13, %v3997_v14  ;;  %4068 = vadd.xlane.f32.xlu0 %v4067_v51  ;;  %4071 = vadd.xlane.f32.xlu1 %v4070_v32 }
 0xf0d   :  { %7986 = vpow2.f32 %v4046_v47 }
 0xf0e   :  { %v9669_v60 = vpop.eup %7976  ;;  %v4050_v58 = vmul.f32 1.442695, %v4022_v35  ;;  %v4048_v10 = vmul.f32 1.442695, %v4021_v4 }
 0xf0f   :  { %v9671_v63 = vpop.eup %7978  ;;  %v4003_v6 = vpop.xlane.xlu0 %4002  ;;  %v4073_v20 = vsel %vm803_vm5, %v9669_v60, 0.0 }
 0xf10   :  { %7988 = vpow2.f32 %v4050_v58  ;;  %v4023_v5 = vsub.f32 %v9606_v9, %v4003_v6  ;;  %v4076_v13 = vsel %vm799_vm4, %v9671_v63, 0.0  ;;  %4074 = vadd.xlane.f32.xlu0 %v4073_v20  ;;  %v4006_v36 = vpop.xlane.xlu1 %4005 }
 0xf11   :  { %4077 = vadd.xlane.f32.xlu1 %v4076_v13  ;;  %7990 = vpow2.f32 %v4048_v10  ;;  %v4024_v25 = vsub.f32 %v9614_v11, %v4006_v36 }
 0xf12   :  { %v9678_v46 = vpop.eup %7980  ;;  %v4052_v62 = vmul.f32 1.442695, %v4023_v5 }
 0xf13   :  { %v9680_v16 = vpop.eup %7982  ;;  %v4082_v59 = vsel %vm799_vm4, %v9678_v46, 0.0  ;;  %v4009_v50 = vpop.xlane.xlu0 %4008  ;;  %v4054_v14 = vmul.f32 1.442695, %v4024_v25 }
 0xf14   :  { %v4079_v9 = vsel %vm803_vm5, %v9680_v16, 0.0  ;;  %7992 = vpow2.f32 %v4052_v62  ;;  %v4025_v51 = vsub.f32 %v9620_v41, %v4009_v50 }
 0xf15   :  { %4083 = vadd.xlane.f32.xlu1 %v4082_v59  ;;  %4080 = vadd.xlane.f32.xlu0 %v4079_v9  ;;  %7994 = vpow2.f32 %v4054_v14  ;;  %v9724_v59 = vpop.permute.xlu1 %7662 }
 0xf16   :  { %v9687_v2 = vpop.eup %7984  ;;  %v4056_v32 = vmul.f32 1.442695, %v4025_v51 }
 0xf17   :  { %v9689_v47 = vpop.eup %7986  ;;  %v4085_v7 = vsel %vm803_vm5, %v9687_v2, 0.0 }
 0xf18   :  { %v4088_v11 = vsel %vm799_vm4, %v9689_v47, 0.0  ;;  %7996 = vpow2.f32 %v4056_v32 }
 0xf19   :  { %4089 = vadd.xlane.f32.xlu1 %v4088_v11  ;;  %4086 = vadd.xlane.f32.xlu0 %v4085_v7  ;;  %v9730_v62 = vpop.permute.xlu1 %7667 }
 0xf1a   :  { %v9696_v35 = vpop.eup %7988 }
 0xf1b   :  { %v4094_v4 = vsel %vm799_vm4, %v9696_v35, 0.0  ;;  %v9700_v58 = vpop.eup %7990 }
 0xf1c   :  { %v4091_v6 = vsel %vm803_vm5, %v9700_v58, 0.0 }
 0xf1d   :  { %4095 = vadd.xlane.f32.xlu0 %v4094_v4  ;;  %v9738_v25 = vpop.permute.xlu1 %7672 }
 0xf1e   :  { %v9704_v41 = vpop.eup %7992 }
 0xf1f   :  { %v4097_v20 = vsel %vm803_vm5, %v9704_v41, 0.0  ;;  %v9708_v10 = vpop.eup %7994 }
 0xf20   :  { %v4100_v5 = vsel %vm799_vm4, %v9708_v10, 0.0 }
 0xf21   :  { %4092 = vadd.xlane.f32.xlu0 %v4091_v6  ;;  %v9742_v9 = vpop.permute.xlu1 %4627 }
 0xf22   :  { %v9712_v13 = vpop.eup %7996 }
 0xf23   :  { %v4103_v36 = vsel %vm803_vm5, %v9712_v13, 0.0 }
 0xf25   :  { %4098 = vadd.xlane.f32.xlu0 %v4097_v20 }
 0xf29   :  { %4101 = vadd.xlane.f32.xlu0 %v4100_v5 }
 0xf2a   :  { %4630 = vrot.lane.b32.xlu1 %v9493_v48, %s8113_s19 }
 0xf2d   :  { %4104 = vadd.xlane.f32.xlu0 %v4103_v36 }
 0xf2e   :  { %4633 = vrot.lane.b32.xlu1 %v9493_v48, %s8114_s20  ;;  %v9734_v48 = vpop.permute.xlu0 %7657 }
 0xf32   :  { %4613 = vrot.lane.b32.xlu1 %v9491_v53, %s8114_s20 }
 0xf36   :  { %4640 = vrot.lane.b32.xlu1 %v9508_v24, %s8113_s19 }
 0xf3a   :  { %4643 = vrot.lane.b32.xlu1 %v9508_v24, %s8114_s20 }
 0xf3e   :  { %4623 = vrot.lane.b32.xlu1 %v9506_v12, %s8114_s20 }
 0xf42   :  { %4647 = vrot.lane.b32.xlu1 %v9538_v49, %s8112_s18 }
 0xf43   :  { %4607 = vrot.lane.b32.xlu0 %v9491_v53, %s8112_s18 }
 0xf47   :  { %4610 = vrot.lane.b32.xlu0 %v9491_v53, %s8113_s19  ;;  %v7655_v53 = vunpack.i.h.bf16 %v9632_v23 }
 0xf48   :  { %v4063_v50 = vpop.xlane.xlu0 %4062 }
 0xf49   :  { %7998 = vrcp.f32 %v4063_v50  ;;  %v10548_v50 = vunpack.i.h.bf16 %v9734_v48 }
 0xf4b   :  { %4637 = vrot.lane.b32.xlu0 %v9508_v24, %s8112_s18  ;;  %v7654_v24 = vunpack.i.l.bf16 %v9632_v23 }
 0xf4d   :  { %v4164_v4 = vpack.c.bf16 %v7655_v53, %v7654_v24 }
 0xf4f   :  { %4617 = vrot.lane.b32.xlu0 %v9506_v12, %s8112_s18 }
 0xf50   :  { %v4060_v7 = vpop.xlane.xlu1 %4059 }
 0xf51   :  { %8000 = vrcp.f32 %v4060_v7  ;;  %v7659_v7 = vunpack.i.l.bf16 %v9734_v48 }
 0xf53   :  { %v7999_v14 = vpop.eup %7998  ;;  %4620 = vrot.lane.b32.xlu0 %v9506_v12, %s8113_s19  ;;  %v4268_v12 = vand.u32 %v4164_v4, %v8440_v21 }
 0xf54   :  { %v4123_v51 = vmul.f32 %v7999_v14, %v9638_v30 }
 0xf56   :  { %4139 = vst.msk [vmem:[%s10512_s15 + $0x8] sm:$0x1] %vm803_vm5, %v4123_v51 }
 0xf5b   :  { %v8001_v11 = vpop.eup %8000 }
 0xf5c   :  { %v4122_v32 = vmul.f32 %v8001_v11, %v9642_v38 }
 0xf5e   :  { %4138 = vst.msk [vmem:[%s10512_s15] sm:$0xff] %vm799_vm4, %v4122_v32  ;;  %v4154_v30 = vpack.c.bf16 %v4123_v51, %v4122_v32  ;;  %v4165_v32 = vpack.c.bf16 %v10548_v50, %v7659_v7  ;;  %v10545_v7 = vunpack.i.h.bf16 %v9724_v59 }
 0xf60   :  { %7252 = vmatmul.mubr.msk.bf16.vlgmr.msra.gmra.mrb[112].mxu0 %vm799_vm4, %v4154_v30 }
 0xf61   :  { %7262 = vmatpush3.bf16.msra.mxu0 %v4268_v12  ;;  %7263 = vmatprep.mubr.msk.bf16.mxu0 %vm8111_vm1, %v10546_v18 }
 0xf62   :  { %7273 = vmatprep.subr.bf16.mxu0 %v10546_v18 }
 0xf95   :  { %v4066_v6 = vpop.xlane.xlu1 %4065 }
 0xf96   :  { %8002 = vrcp.f32 %v4066_v6 }
 0xf99   :  { %v4069_v20 = vpop.xlane.xlu0 %4068  ;;  %v4072_v38 = vpop.xlane.xlu1 %4071 }
 0xf9a   :  { %8004 = vrcp.f32 %v4069_v20 }
 0xf9b   :  { %8006 = vrcp.f32 %v4072_v38 }
 0xf9d   :  { %v4075_v5 = vpop.xlane.xlu0 %4074 }
 0xf9e   :  { %v4078_v36 = vpop.xlane.xlu1 %4077  ;;  %8008 = vrcp.f32 %v4075_v5 }
 0xf9f   :  { %8010 = vrcp.f32 %v4078_v36  ;;  %v4315_v36 = vand.u32 %v4165_v32, %v8440_v21 }
 0xfa0   :  { %v8003_v14 = vpop.eup %8002 }
 0xfa1   :  { %v4124_v51 = vmul.f32 %v8003_v14, %v9653_v0  ;;  %v7664_v14 = vunpack.i.l.bf16 %v9724_v59 }
 0xfa2   :  { %v4084_v24 = vpop.xlane.xlu1 %4083  ;;  %v4081_v11 = vpop.xlane.xlu0 %4080 }
 0xfa3   :  { %8012 = vrcp.f32 %v4084_v24  ;;  %4140 = vst.msk [vmem:[%s10512_s15 + $0x10] sm:$0xff] %vm799_vm4, %v4124_v51 }
 0xfa4   :  { %v8005_v4 = vpop.eup %8004  ;;  %8014 = vrcp.f32 %v4081_v11 }
 0xfa5   :  { %v8007_v30 = vpop.eup %8006  ;;  %v4125_v12 = vmul.f32 %v8005_v4, %v9661_v54 }
 0xfa6   :  { %v4126_v6 = vmul.f32 %v8007_v30, %v9659_v61  ;;  %v4090_v0 = vpop.xlane.xlu1 %4089  ;;  %v4087_v20 = vpop.xlane.xlu0 %4086  ;;  %v4167_v30 = vpack.c.bf16 %v10545_v7, %v7664_v14 }
 0xfa7   :  { %4141 = vst.msk [vmem:[%s10512_s15 + $0x18] sm:$0x1] %vm803_vm5, %v4125_v12  ;;  %v4155_v38 = vpack.c.bf16 %v4125_v12, %v4124_v51  ;;  %8016 = vrcp.f32 %v4090_v0  ;;  %v7669_v0 = vunpack.i.l.bf16 %v9730_v62 }
 0xfa8   :  { %v8009_v5 = vpop.eup %8008  ;;  %4142 = vst.msk [vmem:[%s10512_s15 + $0x20] sm:$0xff] %vm799_vm4, %v4126_v6  ;;  %8018 = vrcp.f32 %v4087_v20 }
 0xfa9   :  { %v8011_v54 = vpop.eup %8010  ;;  %v4127_v61 = vmul.f32 %v8009_v5, %v9669_v60  ;;  %7258 = vmatmul.mubr.msk.bf16.vlgmr.msra.gmra.mrb[112].mxu1 %vm799_vm4, %v4155_v38  ;;  %v4409_v38 = vand.u32 %v4167_v30, %v8440_v21 }
 0xfaa   :  { %v4128_v51 = vmul.f32 %v8011_v54, %v9671_v63  ;;  %7268 = vmatpush3.bf16.msra.mxu1 %v4315_v36  ;;  %7269 = vmatprep.mubr.msk.bf16.mxu1 %vm8111_vm1, %v10546_v18  ;;  %v4096_v24 = vpop.xlane.xlu0 %4095  ;;  %v10562_v63 = vpack.c.bf16 %v9525_v40, %v9523_v26  ;;  %v4631_v54 = vpop.permute.xlu1 %4630 }
 0xfab   :  { %4143 = vst.msk [vmem:[%s10512_s15 + $0x28] sm:$0x1] %vm803_vm5, %v4127_v61  ;;  %v4156_v60 = vpack.c.bf16 %v4127_v61, %v4126_v6  ;;  %7279 = vmatprep.subr.bf16.mxu1 %v10546_v18  ;;  %8020 = vrcp.f32 %v4096_v24  ;;  %v10543_v6 = vunpack.i.h.bf16 %v9730_v62  ;;  %v7674_v24 = vunpack.i.l.bf16 %v9738_v25 }
 0xfac   :  { %4144 = vst.msk [vmem:[%s10512_s15 + $0x30] sm:$0xff] %vm799_vm4, %v4128_v51  ;;  %v4362_v11 = vand.u32 %v10562_v63, %v8440_v21 }
 0xfad   :  { %v8013_v4 = vpop.eup %8012  ;;  %7264 = vmatmul.mubr.msk.bf16.vlgmr.msra.gmra.mrb[116].mxu0 %vm799_vm4, %v4156_v60  ;;  %v4692_v60 = vshll.u32 %v9504_v57, 16 }
 0xfae   :  { %v8015_v32 = vpop.eup %8014  ;;  %v4130_v12 = vmul.f32 %v8013_v4, %v9678_v46  ;;  %7274 = vmatpush3.bf16.msra.mxu0 %v4362_v11  ;;  %7275 = vmatprep.mubr.msk.bf16.mxu0 %vm8111_vm1, %v10546_v18  ;;  %v4093_v40 = vpop.xlane.xlu0 %4092 }
 0xfaf   :  { %v4129_v26 = vmul.f32 %v8015_v32, %v9680_v16  ;;  %7285 = vmatprep.subr.bf16.mxu0 %v10546_v18  ;;  %8022 = vrcp.f32 %v4093_v40  ;;  %v4168_v16 = vpack.c.bf16 %v10543_v6, %v7669_v0  ;;  %v4634_v32 = vpop.permute.xlu1 %4633 }
 0xfb0   :  { %4146 = vst.msk [vmem:[%s10512_s15 + $0x40] sm:$0xff] %vm799_vm4, %v4130_v12 }
 0xfb1   :  { %4145 = vst.msk [vmem:[%s10512_s15 + $0x38] sm:$0x1] %vm803_vm5, %v4129_v26  ;;  %v4157_v46 = vpack.c.bf16 %v4129_v26, %v4128_v51  ;;  %v8017_v20 = vpop.eup %8016  ;;  %v4456_v63 = vand.u32 %v4168_v16, %v8440_v21  ;;  %v10564_v26 = vunpack.i.h.bf16 %v9389_v19  ;;  %v4690_v16 = vshrl.u32 %v9504_v57, 16 }
 0xfb2   :  { %v8019_v5 = vpop.eup %8018  ;;  %v4132_v36 = vmul.f32 %v8017_v20, %v9689_v47  ;;  %v4099_v61 = vpop.xlane.xlu0 %4098  ;;  %v10544_v47 = vunpack.i.h.bf16 %v9738_v25 }
 0xfb3   :  { %7270 = vmatmul.mubr.msk.bf16.vlgmr.msra.gmra.mrb[116].mxu1 %vm799_vm4, %v4157_v46  ;;  %v4131_v14 = vmul.f32 %v8019_v5, %v9687_v2  ;;  %8024 = vrcp.f32 %v4099_v61  ;;  %v4676_v40 = vpack.c.bf16 %v4631_v54, %v10564_v26  ;;  %v4614_v19 = vpop.permute.xlu1 %4613 }
 0xfb4   :  { %7280 = vmatpush3.bf16.msra.mxu1 %v4409_v38  ;;  %7281 = vmatprep.mubr.msk.bf16.mxu1 %vm8111_vm1, %v10546_v18  ;;  %4148 = vst.msk [vmem:[%s10512_s15 + $0x50] sm:$0xff] %vm799_vm4, %v4132_v36  ;;  %v4694_v38 = vrot.slane %v4692_v60, 1 }
 0xfb5   :  { %7291 = vmatprep.subr.bf16.mxu1 %v10546_v18  ;;  %v8021_v51 = vpop.eup %8020  ;;  %4147 = vst.msk [vmem:[%s10512_s15 + $0x48] sm:$0x1] %vm803_vm5, %v4131_v14  ;;  %v4158_v2 = vpack.c.bf16 %v4131_v14, %v4130_v12  ;;  %v4169_v12 = vpack.c.bf16 %v10544_v47, %v7674_v24  ;;  %v4814_v14 = vshll.u32 %v4676_v40, 16  ;;  %v4685_v24 = vshll.u32 %v9500_v43, 16 }
 0xfb6   :  { %v4134_v11 = vmul.f32 %v8021_v51, %v9696_v35  ;;  %v4102_v4 = vpop.xlane.xlu0 %4101  ;;  %v10563_v35 = vunpack.i.h.bf16 %v9391_v22  ;;  %v4695_v51 = vor.u32 %v4694_v38, %v4690_v16  ;;  %v4812_v26 = vshrl.u32 %v4676_v40, 16 }
 0xfb7   :  { %7276 = vmatmul.mubr.msk.bf16.vlgmr.msra.gmra.mrb[120].mxu0 %vm799_vm4, %v4158_v2  ;;  %8026 = vrcp.f32 %v4102_v4  ;;  %v4503_v22 = vand.u32 %v4169_v12, %v8440_v21 }
 0xfb8   :  { %4150 = vst.msk [vmem:[%s10512_s15 + $0x60] sm:$0xff] %vm799_vm4, %v4134_v11  ;;  %7286 = vmatpush3.bf16.msra.mxu0 %v4456_v63  ;;  %7287 = vmatprep.mubr.msk.bf16.mxu0 %vm8111_vm1, %v10546_v18  ;;  %v4675_v0 = vpack.c.bf16 %v9742_v9, %v10563_v35  ;;  %v4816_v63 = vrot.slane %v4814_v14, 1  ;;  %v4687_v35 = vrot.slane %v4685_v24, 1  ;;  %v10568_v24 = vunpack.i.h.bf16 %v9437_v17 }
 0xfb9   :  { %v8023_v30 = vpop.eup %8022  ;;  %7297 = vmatprep.subr.bf16.mxu0 %v10546_v18  ;;  %v4934_v17 = vshrl.u32 %v9516_v34, 16 }
 0xfba   :  { %v4133_v46 = vmul.f32 %v8023_v30, %v9700_v58  ;;  %v4105_v20 = vpop.xlane.xlu0 %4104  ;;  %v4753_v9 = vshll.u32 %v4675_v0, 16  ;;  %v4700_v30 = vsel %vm127_vm0, %v4695_v51, 0 }
 0xfbb   :  { %8028 = vrcp.f32 %v4105_v20 }
 0xfbc   :  { %4149 = vst.msk [vmem:[%s10512_s15 + $0x58] sm:$0x1] %vm803_vm5, %v4133_v46  ;;  %v4159_v5 = vpack.c.bf16 %v4133_v46, %v4132_v36  ;;  %v4755_v60 = vrot.slane %v4753_v9, 1  ;;  %v4641_v46 = vpop.permute.xlu1 %4640 }
 0xfbd   :  { %v8025_v61 = vpop.eup %8024 }
 0xfbe   :  { %v4135_v54 = vmul.f32 %v8025_v61, %v9704_v41  ;;  %v4608_v58 = vpop.permute.xlu0 %4607  ;;  %7282 = vmatmul.mubr.msk.bf16.vlgmr.msra.gmra.mrb[120].mxu1 %vm799_vm4, %v4159_v5  ;;  %v10565_v41 = vunpack.i.h.bf16 %v9411_v15  ;;  %v10566_v15 = vunpack.i.h.bf16 %v9403_v3  ;;  %v4936_v5 = vshll.u32 %v9516_v34, 16 }
 0xfbf   :  { %7292 = vmatpush3.bf16.msra.mxu1 %v4503_v22  ;;  %7293 = vmatprep.mubr.msk.bf16.mxu1 %vm8111_vm1, %v10546_v18  ;;  %v4817_v61 = vor.u32 %v4816_v63, %v4812_v26  ;;  %v4929_v34 = vshll.u32 %v9512_v1, 16 }
 0xfc0   :  { %4151 = vst.msk [vmem:[%s10512_s15 + $0x68] sm:$0x1] %vm803_vm5, %v4135_v54  ;;  %v4160_v57 = vpack.c.bf16 %v4135_v54, %v4134_v11  ;;  %7303 = vmatprep.subr.bf16.mxu1 %v10546_v18  ;;  %v4677_v2 = vpack.c.bf16 %v4634_v32, %v10565_v41  ;;  %v4751_v11 = vshrl.u32 %v4675_v0, 16  ;;  %v10567_v32 = vunpack.i.h.bf16 %v9401_v56 }
 0xfc1   :  { %v8027_v36 = vpop.eup %8026  ;;  %v4683_v0 = vshrl.u32 %v9500_v43, 16  ;;  %v4938_v51 = vrot.slane %v4936_v5, 1  ;;  %v4644_v43 = vpop.permute.xlu1 %4643 }
 0xfc2   :  { %v4136_v4 = vmul.f32 %v8027_v36, %v9708_v10  ;;  %7288 = vmatmul.mubr.msk.bf16.vlgmr.msra.gmra.mrb[124].mxu0 %vm799_vm4, %v4160_v57  ;;  %v4611_v12 = vpop.permute.xlu0 %4610  ;;  %v4667_v10 = vpack.c.bf16 %v4608_v58, %v10566_v15  ;;  %v4875_v16 = vshll.u32 %v4677_v2, 16  ;;  %v4756_v40 = vor.u32 %v4755_v60, %v4751_v11 }
 0xfc3   :  { %7298 = vmatpush3.bf16.xpose.msra.mxu0 %v4700_v30  ;;  %7299 = vmatprep.mubr.msk.bf16.mxu0 %vm8111_vm1, %v10546_v18  ;;  %v4668_v20 = vpack.c.bf16 %v4611_v12, %v10567_v32  ;;  %v4688_v14 = vor.u32 %v4687_v35, %v4683_v0  ;;  %v4680_v57 = vpack.c.bf16 %v4641_v46, %v10568_v24  ;;  %v10569_v36 = vunpack.i.h.bf16 %v9415_v31 }
 0xfc4   :  { %4152 = vst.msk [vmem:[%s10512_s15 + $0x70] sm:$0xff] %vm799_vm4, %v4136_v4  ;;  %7309 = vmatprep.subr.bf16.mxu0 %v10546_v18  ;;  %v4746_v56 = vshll.u32 %v4667_v10, 16  ;;  %v4877_v58 = vrot.slane %v4875_v16, 1  ;;  %v4761_v60 = vsel %vm127_vm0, %v4756_v40, 0  ;;  %v4873_v63 = vshrl.u32 %v4677_v2, 16 }
 0xfc5   :  { %v8029_v38 = vpop.eup %8028  ;;  %v4807_v3 = vshll.u32 %v4668_v20, 16  ;;  %v4744_v2 = vshrl.u32 %v4667_v10, 16  ;;  %v4805_v26 = vshrl.u32 %v4668_v20, 16  ;;  %v4624_v32 = vpop.permute.xlu1 %4623  ;;  %v4931_v20 = vrot.slane %v4929_v34, 1 }
 0xfc6   :  { %v4137_v22 = vmul.f32 %v8029_v38, %v9712_v13  ;;  %v4638_v9 = vpop.permute.xlu0 %4637  ;;  %v4822_v13 = vsel %vm127_vm0, %v4817_v61, 0  ;;  %v4748_v35 = vrot.slane %v4746_v56, 1  ;;  %v4878_v11 = vor.u32 %v4877_v58, %v4873_v63 }
 0xfc7   :  { %v4679_v41 = vpack.c.bf16 %v4638_v9, %v10569_v36  ;;  %v4809_v31 = vrot.slane %v4807_v3, 1  ;;  %v10571_v61 = vunpack.i.h.bf16 %v9453_v33  ;;  %v5056_v56 = vshrl.u32 %v4680_v57, 16 }
 0xfc8   :  { %4153 = vst.msk [vmem:[%s10512_s15 + $0x78] sm:$0x1] %vm803_vm5, %v4137_v22  ;;  %v4161_v54 = vpack.c.bf16 %v4137_v22, %v4136_v4  ;;  %v10570_v4 = vunpack.i.h.bf16 %v9425_v27  ;;  %v4939_v27 = vor.u32 %v4938_v51, %v4934_v17  ;;  %v4749_v38 = vor.u32 %v4748_v35, %v4744_v2 }
 0xfc9   :  { %v4997_v46 = vshll.u32 %v4679_v41, 16  ;;  %v4810_v5 = vor.u32 %v4809_v31, %v4805_v26  ;;  %v4681_v22 = vpack.c.bf16 %v4644_v43, %v10571_v61  ;;  %v4883_v10 = vsel %vm127_vm0, %v4878_v11, 0 }
 0xfca   :  { %7300 = vmatmul.mubr.msk.bf16.vlgmr.msra.gmra.mrb[128].mxu0 %vm127_vm0, %v4688_v14  ;;  %7294 = vmatmul.mubr.msk.bf16.vlgmr.msra.gmra.mrb[124].mxu1 %vm799_vm4, %v4161_v54  ;;  %v4669_v30 = vpack.c.bf16 %v4614_v19, %v10570_v4  ;;  %v4618_v12 = vpop.permute.xlu0 %4617  ;;  %v5058_v19 = vshll.u32 %v4680_v57, 16  ;;  %v4944_v0 = vsel %vm127_vm0, %v4939_v27, 0  ;;  %v4995_v3 = vshrl.u32 %v4679_v41, 16  ;;  %v4648_v41 = vpop.permute.xlu1 %4647 }
 0xfcb   :  { %7310 = vmatpush3.bf16.xpose.msra.mxu0 %v4822_v13  ;;  %7304 = vmatpush3.bf16.xpose.msra.mxu1 %v4761_v60  ;;  %v4999_v9 = vrot.slane %v4997_v46, 1  ;;  %v10572_v54 = vunpack.i.h.bf16 %v9433_v42  ;;  %v10573_v51 = vunpack.i.h.bf16 %v9455_v44  ;;  %v4927_v24 = vshrl.u32 %v9512_v1, 16 }
 0xfcc   :  { %7305 = vmatprep.mubr.msk.bf16.mxu1 %vm8111_vm1, %v10546_v18  ;;  %7311 = vmatprep.mubr.msk.bf16.mxu0 %vm8111_vm1, %v10546_v18  ;;  %v4868_v15 = vshll.u32 %v4669_v30, 16  ;;  %v5060_v40 = vrot.slane %v5058_v19, 1  ;;  %v5382_v43 = vshll.u32 %v9542_v39, 16  ;;  %v4866_v57 = vshrl.u32 %v4669_v30, 16 }
 0xfcd   :  { %7315 = vmatprep.subr.bf16.mxu1 %v10546_v18  ;;  %7321 = vmatprep.subr.bf16.mxu0 %v10546_v18  ;;  %v4671_v58 = vpack.c.bf16 %v4618_v12, %v10572_v54  ;;  %v5119_v36 = vshll.u32 %v4681_v22, 16  ;;  %v5000_v44 = vor.u32 %v4999_v9, %v4995_v3  ;;  %v4932_v13 = vor.u32 %v4931_v20, %v4927_v24 }
 0xfce   :  { %v4621_v16 = vpop.permute.xlu0 %4620  ;;  %v4870_v14 = vrot.slane %v4868_v15, 1  ;;  %v5061_v42 = vor.u32 %v5060_v40, %v5056_v56  ;;  %v5384_v12 = vrot.slane %v5382_v43, 1  ;;  %v10574_v17 = vunpack.i.h.bf16 %v9560_v55 }
 0xfcf   :  { %v4672_v33 = vpack.c.bf16 %v4621_v16, %v10573_v51  ;;  %v4990_v63 = vshll.u32 %v4671_v58, 16  ;;  %v5121_v1 = vrot.slane %v5119_v36, 1  ;;  %v5005_v31 = vsel %vm127_vm0, %v5000_v44, 0 }
 0xfd0   :  { %v4871_v60 = vor.u32 %v4870_v14, %v4866_v57  ;;  %v5372_v35 = vpack.c.bf16 %v4648_v41, %v10574_v17  ;;  %v5066_v30 = vsel %vm127_vm0, %v5061_v42, 0  ;;  %v5380_v11 = vshrl.u32 %v9542_v39, 16 }
 0xfd1   :  { %v5051_v4 = vshll.u32 %v4672_v33, 16  ;;  %v5117_v27 = vshrl.u32 %v4681_v22, 16  ;;  %v10575_v19 = vunpack.i.h.bf16 %v9482_v8  ;;  %v4992_v26 = vrot.slane %v4990_v63, 1 }
 0xfd2   :  { %7306 = vmatmul.mubr.msk.bf16.vlgmr.msra.gmra.mrb[128].mxu1 %vm127_vm0, %v4749_v38  ;;  %7312 = vmatmul.mubr.msk.bf16.vlgmr.msra.gmra.mrb[132].mxu0 %vm127_vm0, %v4810_v5  ;;  %v5436_v46 = vshll.u32 %v5372_v35, 16  ;;  %v5385_v39 = vor.u32 %v5384_v12, %v5380_v11  ;;  %v4988_v15 = vshrl.u32 %v4671_v58, 16  ;;  %v5049_v38 = vshrl.u32 %v4672_v33, 16 }
 0xfd3   :  { %7316 = vmatpush3.bf16.xpose.msra.mxu1 %v4883_v10  ;;  %7322 = vmatpush3.bf16.xpose.msra.mxu0 %v4944_v0  ;;  %v4673_v2 = vpack.c.bf16 %v4624_v32, %v10575_v19  ;;  %v5053_v55 = vrot.slane %v5051_v4, 1  ;;  %v5122_v34 = vor.u32 %v5121_v1, %v5117_v27  ;;  %v5434_v61 = vshrl.u32 %v5372_v35, 16 }
 0xfd4   :  { %7317 = vmatprep.mubr.msk.bf16.mxu1 %vm8111_vm1, %v10546_v18  ;;  %7323 = vmatprep.mubr.msk.bf16.mxu0 %vm8111_vm1, %v10546_v18  ;;  %v4993_v8 = vor.u32 %v4992_v26, %v4988_v15  ;;  %v5438_v16 = vrot.slane %v5436_v46, 1  ;;  %v5390_v0 = vand.u32 %v5385_v39, %v8440_v21 }
 0xfd5   :  { %7327 = vmatprep.subr.bf16.mxu1 %v10546_v18  ;;  %7333 = vmatprep.subr.bf16.mxu0 %v10546_v18  ;;  %v5112_v5 = vshll.u32 %v4673_v2, 16  ;;  %v5054_v32 = vor.u32 %v5053_v55, %v5049_v38  ;;  %v5127_v40 = vsel %vm127_vm0, %v5122_v34, 0  ;;  %v5110_v10 = vshrl.u32 %v4673_v2, 16 }
 0xfd6   :  { %v5439_v9 = vor.u32 %v5438_v16, %v5434_v61 }
 0xfd7   :  { %v5114_v22 = vrot.slane %v5112_v5, 1 }
 0xfd8   :  { %v5444_v14 = vand.u32 %v5439_v9, %v8440_v21 }
 0xfd9   :  { %v5115_v20 = vor.u32 %v5114_v22, %v5110_v10 }
 0xfda   :  { %7318 = vmatmul.mubr.msk.bf16.vlgmr.msra.gmra.mrb[132].mxu1 %vm127_vm0, %v4871_v60  ;;  %7324 = vmatmul.mubr.msk.bf16.vlgmr.msra.gmra.mrb[136].mxu0 %vm127_vm0, %v4932_v13 }
 0xfdb   :  { %7328 = vmatpush3.bf16.xpose.msra.mxu1 %v5005_v31  ;;  %7334 = vmatpush3.bf16.xpose.msra.mxu0 %v5066_v30 }
 0xfdc   :  { %7329 = vmatprep.mubr.msk.bf16.mxu1 %vm8111_vm1, %v10546_v18  ;;  %7335 = vmatprep.mubr.msk.bf16.mxu0 %vm8111_vm1, %v10546_v18 }
 0xfdd   :  { %7339 = vmatprep.subr.bf16.mxu1 %v10546_v18  ;;  %7345 = vmatprep.subr.bf16.mxu0 %v10546_v18 }
 0xfe2   :  { %7330 = vmatmul.mubr.msk.bf16.vlgmr.msra.gmra.mrb[136].mxu1 %vm127_vm0, %v4993_v8  ;;  %7336 = vmatmul.mubr.msk.bf16.vlgmr.msra.gmra.mrb[140].mxu0 %vm127_vm0, %v5054_v32 }
 0xfe3   :  { %7340 = vmatpush3.bf16.xpose.msra.mxu1 %v5127_v40  ;;  %7346 = vmatpush3.bf16.msra.mxu0 %v5390_v0 }
 0xfe4   :  { %7341 = vmatprep.mubr.msk.bf16.mxu1 %vm8111_vm1, %v10546_v18  ;;  %7351 = vmatprep.subr.bf16.mxu1 %v10546_v18 }
 0xfe5   :  { %7347 = vmatprep.mubr.msk.bf16.mxu0 %vm8111_vm1, %v10546_v18  ;;  %7357 = vmatprep.subr.bf16.mxu0 %v10546_v18 }
 0xfea   :  { %7342 = vmatmul.mubr.msk.bf16.vlgmr.msra.gmra.mrb[140].mxu1 %vm127_vm0, %v5115_v20 }
 0xfeb   :  { %7352 = vmatpush3.bf16.msra.mxu1 %v5444_v14  ;;  %7353 = vmatprep.mubr.msk.bf16.mxu1 %vm8111_vm1, %v10546_v18 }
 0xfec   :  { %7363 = vmatprep.subr.bf16.mxu1 %v10546_v18 }
0x1033   :  { %v9970_v56 = vpop.f32.mrb[112].mxu0 }
0x1034   :  { %v7253_v3 = vpop.f32.mrb[113].mxu0 }
0x1035   :  { %v9972_v54 = vpop.f32.mrb[114].mxu0 }
0x1036   :  { %v7254_v58 = vpop.f32.mrb[115].mxu0 }
0x107c   :  { %v9974_v51 = vpop.f32.mrb[112].mxu1 }
0x107d   :  { %v7259_v33 = vpop.f32.mrb[113].mxu1 }
0x107e   :  { %v9976_v24 = vpop.f32.mrb[114].mxu1 }
0x107f   :  { %v7260_v43 = vpop.f32.mrb[115].mxu1 }
0x1080   :  { %v9978_v57 = vpop.f32.mrb[116].mxu0 }
0x1081   :  { %v7265_v42 = vpop.f32.mrb[117].mxu0 }
0x1082   :  { %v9980_v36 = vpop.f32.mrb[118].mxu0 }
0x1083   :  { %v7266_v41 = vpop.f32.mrb[119].mxu0 }
0x1086   :  { %v9982_v44 = vpop.f32.mrb[116].mxu1 }
0x1087   :  { %v7271_v13 = vpop.f32.mrb[117].mxu1 }
0x1088   :  { %v9984_v60 = vpop.f32.mrb[118].mxu1 }
0x1089   :  { %v7272_v63 = vpop.f32.mrb[119].mxu1 }
0x108a   :  { %v9986_v4 = vpop.f32.mrb[120].mxu0 }
0x108b   :  { %v7277_v12 = vpop.f32.mrb[121].mxu0 }
0x108c   :  { %v9988_v17 = vpop.f32.mrb[122].mxu0 }
0x108d   :  { %v7278_v35 = vpop.f32.mrb[123].mxu0 }
0x1091   :  { %v9990_v1 = vpop.f32.mrb[120].mxu1 }
0x1092   :  { %v7681_v31 = vpack.i.bf16 %v9974_v51, %v9990_v1  ;;  %v7283_v30 = vpop.f32.mrb[121].mxu1 }
0x1093   :  { %v9994_v11 = vpop.f32.mrb[122].mxu1 }
0x1094   :  { %v7676_v27 = vpack.i.bf16 %v9976_v24, %v9994_v11  ;;  %v7284_v19 = vpop.f32.mrb[123].mxu1 }
0x1095   :  { %v9998_v2 = vpop.f32.mrb[124].mxu0 }
0x1096   :  { %v7691_v26 = vpack.i.bf16 %v9978_v57, %v9998_v2  ;;  %v7289_v55 = vpop.f32.mrb[125].mxu0  ;;  %v10576_v2 = vunpack.i.h.bf16 %v9734_v48 }
0x1097   :  { %v10002_v46 = vpop.f32.mrb[126].mxu0 }
0x1098   :  { %v7686_v39 = vpack.i.bf16 %v9980_v36, %v10002_v46  ;;  %v7290_v34 = vpop.f32.mrb[127].mxu0 }
0x109d   :  { %v10006_v15 = vpop.f32.mrb[124].mxu1  ;;  %v10008_v38 = vpop.f32.mrb[128].mxu0 }
0x109e   :  { %v7701_v5 = vpack.i.bf16 %v9982_v44, %v10006_v15  ;;  %v7295_v8 = vpop.f32.mrb[125].mxu1  ;;  %v7301_v32 = vpop.f32.mrb[129].mxu0  ;;  %v5170_v16 = vsel %vm799_vm4, %v10008_v38, -inf }
0x109f   :  { %5171 = vmax.xlane.f32.xlu0 %v5170_v16  ;;  %v10014_v0 = vpop.f32.mrb[126].mxu1  ;;  %v10016_v40 = vpop.f32.mrb[130].mxu0 }
0x10a0   :  { %v7696_v61 = vpack.i.bf16 %v9984_v60, %v10014_v0  ;;  %v7296_v22 = vpop.f32.mrb[127].mxu1  ;;  %v7302_v9 = vpop.f32.mrb[131].mxu0  ;;  %v5173_v10 = vsel %vm803_vm5, %v10016_v40, -inf }
0x10a1   :  { %5174 = vmax.xlane.f32.xlu1 %v5173_v10 }
0x10a5   :  { %v10022_v20 = vpop.f32.mrb[128].mxu1  ;;  %v10024_v14 = vpop.f32.mrb[132].mxu0 }
0x10a6   :  { %v7307_v3 = vpop.f32.mrb[129].mxu1  ;;  %v7313_v58 = vpop.f32.mrb[133].mxu0  ;;  %v5182_v33 = vsel %vm799_vm4, %v10024_v14, -inf  ;;  %v5176_v43 = vsel %vm799_vm4, %v10022_v20, -inf }
0x10a7   :  { %5183 = vmax.xlane.f32.xlu1 %v5182_v33  ;;  %v10030_v42 = vpop.f32.mrb[134].mxu0  ;;  %5177 = vmax.xlane.f32.xlu0 %v5176_v43  ;;  %v10032_v41 = vpop.f32.mrb[130].mxu1 }
0x10a8   :  { %v7308_v13 = vpop.f32.mrb[131].mxu1  ;;  %v7314_v63 = vpop.f32.mrb[135].mxu0  ;;  %v5179_v12 = vsel %vm803_vm5, %v10032_v41, -inf  ;;  %v5185_v34 = vsel %vm803_vm5, %v10030_v42, -inf }
0x10ab   :  { %5180 = vmax.xlane.f32.xlu0 %v5179_v12 }
0x10ad   :  { %v10036_v35 = vpop.f32.mrb[132].mxu1  ;;  %v10038_v30 = vpop.f32.mrb[136].mxu0 }
0x10ae   :  { %v7319_v19 = vpop.f32.mrb[133].mxu1  ;;  %v7325_v55 = vpop.f32.mrb[137].mxu0  ;;  %v5188_v8 = vsel %vm799_vm4, %v10036_v35, -inf  ;;  %v5194_v10 = vsel %vm799_vm4, %v10038_v30, -inf }
0x10af   :  { %v10044_v32 = vpop.f32.mrb[138].mxu0  ;;  %5186 = vmax.xlane.f32.xlu0 %v5185_v34  ;;  %5189 = vmax.xlane.f32.xlu1 %v5188_v8  ;;  %v10046_v16 = vpop.f32.mrb[134].mxu1 }
0x10b0   :  { %v7320_v22 = vpop.f32.mrb[135].mxu1  ;;  %v7326_v9 = vpop.f32.mrb[139].mxu0  ;;  %v5191_v3 = vsel %vm803_vm5, %v10046_v16, -inf  ;;  %v5197_v63 = vsel %vm803_vm5, %v10044_v32, -inf }
0x10b3   :  { %5195 = vmax.xlane.f32.xlu1 %v5194_v10  ;;  %5192 = vmax.xlane.f32.xlu0 %v5191_v3 }
0x10b5   :  { %v10052_v58 = vpop.f32.mrb[136].mxu1  ;;  %v10054_v33 = vpop.f32.mrb[140].mxu0 }
0x10b6   :  { %v7331_v43 = vpop.f32.mrb[137].mxu1  ;;  %v7337_v13 = vpop.f32.mrb[141].mxu0  ;;  %v5200_v12 = vsel %vm799_vm4, %v10052_v58, -inf  ;;  %v5206_v22 = vsel %vm799_vm4, %v10054_v33, -inf }
0x10b7   :  { %v10060_v19 = vpop.f32.mrb[142].mxu0  ;;  %5198 = vmax.xlane.f32.xlu0 %v5197_v63  ;;  %5201 = vmax.xlane.f32.xlu1 %v5200_v12  ;;  %v10062_v55 = vpop.f32.mrb[138].mxu1 }
0x10b8   :  { %v7332_v34 = vpop.f32.mrb[139].mxu1  ;;  %v7338_v8 = vpop.f32.mrb[143].mxu0  ;;  %v5203_v9 = vsel %vm803_vm5, %v10062_v55, -inf  ;;  %v5209_v43 = vsel %vm803_vm5, %v10060_v19, -inf }
0x10bb   :  { %5207 = vmax.xlane.f32.xlu1 %v5206_v22  ;;  %5204 = vmax.xlane.f32.xlu0 %v5203_v9 }
0x10bd   :  { %v10068_v10 = vpop.f32.mrb[140].mxu1 }
0x10be   :  { %v7343_v3 = vpop.f32.mrb[141].mxu1  ;;  %v5212_v13 = vsel %vm799_vm4, %v10068_v10, -inf }
0x10bf   :  { %5210 = vmax.xlane.f32.xlu0 %v5209_v43  ;;  %5213 = vmax.xlane.f32.xlu1 %v5212_v13  ;;  %v10074_v63 = vpop.f32.mrb[142].mxu1 }
0x10c0   :  { %v7344_v12 = vpop.f32.mrb[143].mxu1  ;;  %v5215_v34 = vsel %vm803_vm5, %v10074_v63, -inf }
0x10c3   :  { %5216 = vmax.xlane.f32.xlu0 %v5215_v34 }
0x10d0   :  { %4653 = vrot.lane.b32.xlu1 %v9538_v49, %s8114_s20 }
0x10d4   :  { %4657 = vrot.lane.b32.xlu1 %v9546_v29, %s8112_s18 }
0x10d9   :  { %4650 = vrot.lane.b32.xlu0 %v9538_v49, %s8113_s19 }
0x112c   :  { %v5172_v8 = vpop.xlane.xlu0 %5171 }
0x112d   :  { %v5218_v22 = vsub.f32 %v10008_v38, %v5172_v8 }
0x112e   :  { %v5175_v9 = vpop.xlane.xlu1 %5174 }
0x112f   :  { %v5234_v3 = vmul.f32 1.442695, %v5218_v22  ;;  %v5219_v43 = vsub.f32 %v10016_v40, %v5175_v9 }
0x1131   :  { %8030 = vpow2.f32 %v5234_v3  ;;  %v5236_v13 = vmul.f32 1.442695, %v5219_v43 }
0x1133   :  { %8032 = vpow2.f32 %v5236_v13 }
0x1134   :  { %v5184_v12 = vpop.xlane.xlu1 %5183  ;;  %v5178_v34 = vpop.xlane.xlu0 %5177 }
0x1135   :  { %v5222_v6 = vsub.f32 %v10024_v14, %v5184_v12  ;;  %v5220_v47 = vsub.f32 %v10022_v20, %v5178_v34 }
0x1137   :  { %v5238_v7 = vmul.f32 1.442695, %v5220_v47  ;;  %v5242_v18 = vmul.f32 1.442695, %v5222_v6 }
0x1138   :  { %v5181_v50 = vpop.xlane.xlu0 %5180 }
0x1139   :  { %v5221_v49 = vsub.f32 %v10032_v41, %v5181_v50  ;;  %8034 = vpow2.f32 %v5238_v7 }
0x113a   :  { %8036 = vpow2.f32 %v5242_v18 }
0x113b   :  { %v10089_v38 = vpop.eup %8030  ;;  %v5240_v8 = vmul.f32 1.442695, %v5221_v49 }
0x113c   :  { %v5187_v40 = vpop.xlane.xlu0 %5186  ;;  %v5190_v22 = vpop.xlane.xlu1 %5189  ;;  %v5266_v9 = vsel %vm799_vm4, %v10089_v38, 0.0 }
0x113d   :  { %v10093_v3 = vpop.eup %8032  ;;  %8038 = vpow2.f32 %v5240_v8  ;;  %v5223_v20 = vsub.f32 %v10030_v42, %v5187_v40  ;;  %v5224_v6 = vsub.f32 %v10036_v35, %v5190_v22  ;;  %5267 = vadd.xlane.f32.xlu1 %v5266_v9 }
0x113e   :  { %v5269_v50 = vsel %vm803_vm5, %v10093_v3, 0.0 }
0x113f   :  { %v5244_v7 = vmul.f32 1.442695, %v5223_v20  ;;  %v5246_v47 = vmul.f32 1.442695, %v5224_v6  ;;  %5270 = vadd.xlane.f32.xlu0 %v5269_v50 }
0x1140   :  { %v5196_v18 = vpop.xlane.xlu1 %5195  ;;  %v5193_v14 = vpop.xlane.xlu0 %5192 }
0x1141   :  { %8040 = vpow2.f32 %v5244_v7  ;;  %v5226_v41 = vsub.f32 %v10038_v30, %v5196_v18  ;;  %v5225_v43 = vsub.f32 %v10046_v16, %v5193_v14 }
0x1142   :  { %8042 = vpow2.f32 %v5246_v47 }
0x1143   :  { %v5250_v13 = vmul.f32 1.442695, %v5226_v41  ;;  %v5248_v12 = vmul.f32 1.442695, %v5225_v43  ;;  %v10101_v42 = vpop.eup %8034 }
0x1144   :  { %v5199_v35 = vpop.xlane.xlu0 %5198  ;;  %v5202_v34 = vpop.xlane.xlu1 %5201  ;;  %v5272_v40 = vsel %vm799_vm4, %v10101_v42, 0.0 }
0x1145   :  { %8044 = vpow2.f32 %v5250_v13  ;;  %v5227_v49 = vsub.f32 %v10044_v32, %v5199_v35  ;;  %v5228_v8 = vsub.f32 %v10052_v58, %v5202_v34  ;;  %v10107_v22 = vpop.eup %8036  ;;  %5273 = vadd.xlane.f32.xlu1 %v5272_v40 }
0x1146   :  { %8046 = vpow2.f32 %v5248_v12  ;;  %v5278_v7 = vsel %vm799_vm4, %v10107_v22, 0.0 }
0x1147   :  { %v10109_v30 = vpop.eup %8038  ;;  %v5252_v16 = vmul.f32 1.442695, %v5227_v49  ;;  %v5254_v9 = vmul.f32 1.442695, %v5228_v8 }
0x1148   :  { %v5208_v20 = vpop.xlane.xlu1 %5207  ;;  %v5205_v6 = vpop.xlane.xlu0 %5204  ;;  %v5275_v50 = vsel %vm803_vm5, %v10109_v30, 0.0 }
0x1149   :  { %8048 = vpow2.f32 %v5252_v16  ;;  %v5230_v32 = vsub.f32 %v10054_v33, %v5208_v20  ;;  %v5229_v58 = vsub.f32 %v10062_v55, %v5205_v6  ;;  %5276 = vadd.xlane.f32.xlu0 %v5275_v50  ;;  %5279 = vadd.xlane.f32.xlu1 %v5278_v7 }
0x114a   :  { %8050 = vpow2.f32 %v5254_v9 }
0x114b   :  { %v10117_v47 = vpop.eup %8040  ;;  %v5258_v18 = vmul.f32 1.442695, %v5230_v32  ;;  %v5256_v41 = vmul.f32 1.442695, %v5229_v58 }
0x114c   :  { %v10119_v14 = vpop.eup %8042  ;;  %v5211_v43 = vpop.xlane.xlu0 %5210  ;;  %v5281_v13 = vsel %vm803_vm5, %v10117_v47, 0.0 }
0x114d   :  { %8052 = vpow2.f32 %v5258_v18  ;;  %v5231_v33 = vsub.f32 %v10060_v19, %v5211_v43  ;;  %v5214_v55 = vpop.xlane.xlu1 %5213  ;;  %v5284_v12 = vsel %vm799_vm4, %v10119_v14, 0.0  ;;  %5282 = vadd.xlane.f32.xlu0 %v5281_v13 }
0x114e   :  { %5285 = vadd.xlane.f32.xlu1 %v5284_v12  ;;  %8054 = vpow2.f32 %v5256_v41  ;;  %v5232_v8 = vsub.f32 %v10068_v10, %v5214_v55 }
0x114f   :  { %v10126_v35 = vpop.eup %8044  ;;  %v5260_v49 = vmul.f32 1.442695, %v5231_v33 }
0x1150   :  { %v10128_v34 = vpop.eup %8046  ;;  %v5290_v40 = vsel %vm799_vm4, %v10126_v35, 0.0  ;;  %v5217_v16 = vpop.xlane.xlu0 %5216  ;;  %v5262_v20 = vmul.f32 1.442695, %v5232_v8 }
0x1151   :  { %v5287_v19 = vsel %vm803_vm5, %v10128_v34, 0.0  ;;  %8056 = vpow2.f32 %v5260_v49  ;;  %v5233_v6 = vsub.f32 %v10074_v63, %v5217_v16  ;;  %v4654_v24 = vpop.permute.xlu1 %4653 }
0x1152   :  { %5291 = vadd.xlane.f32.xlu1 %v5290_v40  ;;  %5288 = vadd.xlane.f32.xlu0 %v5287_v19  ;;  %8058 = vpow2.f32 %v5262_v20  ;;  %v5598_v40 = vshll.u32 %v9550_v52, 16 }
0x1153   :  { %v10135_v9 = vpop.eup %8048  ;;  %v5264_v58 = vmul.f32 1.442695, %v5233_v6  ;;  %v10578_v6 = vunpack.i.h.bf16 %v9724_v59  ;;  %v5596_v59 = vshrl.u32 %v9550_v52, 16 }
0x1154   :  { %v5293_v50 = vsel %vm803_vm5, %v10135_v9, 0.0  ;;  %v10140_v32 = vpop.eup %8050  ;;  %v4651_v60 = vpop.permute.xlu0 %4650 }
0x1155   :  { %v5296_v18 = vsel %vm799_vm4, %v10140_v32, 0.0  ;;  %8060 = vpow2.f32 %v5264_v58  ;;  %v4658_v36 = vpop.permute.xlu1 %4657 }
0x1156   :  { %5294 = vadd.xlane.f32.xlu0 %v5293_v50  ;;  %v5376_v50 = vpack.c.bf16 %v4658_v36, %v10578_v6 }
0x1157   :  { %v10142_v10 = vpop.eup %8052 }
0x1158   :  { %v5302_v7 = vsel %vm799_vm4, %v10142_v10, 0.0  ;;  %v10148_v41 = vpop.eup %8054  ;;  %v5652_v36 = vshll.u32 %v5376_v50, 16 }
0x1159   :  { %5303 = vadd.xlane.f32.xlu1 %v5302_v7  ;;  %v5299_v63 = vsel %vm803_vm5, %v10148_v41, 0.0 }
0x115a   :  { %5297 = vadd.xlane.f32.xlu0 %v5296_v18 }
0x115b   :  { %v10152_v43 = vpop.eup %8056 }
0x115c   :  { %v5305_v13 = vsel %vm803_vm5, %v10152_v43, 0.0  ;;  %v10156_v33 = vpop.eup %8058 }
0x115d   :  { %v5308_v55 = vsel %vm799_vm4, %v10156_v33, 0.0 }
0x115e   :  { %5300 = vadd.xlane.f32.xlu0 %v5299_v63 }
0x115f   :  { %v10160_v12 = vpop.eup %8060 }
0x1160   :  { %v5311_v49 = vsel %vm803_vm5, %v10160_v12, 0.0 }
0x1162   :  { %5306 = vadd.xlane.f32.xlu0 %v5305_v13  ;;  %v5600_v13 = vrot.slane %v5598_v40, 1 }
0x1164   :  { %v5601_v52 = vor.u32 %v5600_v13, %v5596_v59 }
0x1166   :  { %5309 = vadd.xlane.f32.xlu0 %v5308_v55 }
0x116a   :  { %5312 = vadd.xlane.f32.xlu0 %v5311_v49  ;;  %4663 = vrot.lane.b32.xlu1 %v9546_v29, %s8114_s20 }
0x116e   :  { %7677 = vrot.lane.b32.xlu1 %v7676_v27, %s8114_s20 }
0x1172   :  { %7687 = vrot.lane.b32.xlu1 %v7686_v39, %s8113_s19 }
0x1176   :  { %7697 = vrot.lane.b32.xlu1 %v7696_v61, %s8112_s18 }
0x1180   :  { %4660 = vrot.lane.b32.xlu0 %v9546_v29, %s8113_s19  ;;  %v5373_v29 = vpack.c.bf16 %v4651_v60, %v7655_v53 }
0x1182   :  { %v5490_v1 = vshll.u32 %v5373_v29, 16  ;;  %v5488_v44 = vshrl.u32 %v5373_v29, 16 }
0x1184   :  { %7682 = vrot.lane.b32.xlu0 %v7681_v31, %s8114_s20  ;;  %v5492_v31 = vrot.slane %v5490_v1, 1 }
0x1188   :  { %7692 = vrot.lane.b32.xlu0 %v7691_v26, %s8113_s19  ;;  %v5374_v26 = vpack.c.bf16 %v4654_v24, %v10576_v2 }
0x118a   :  { %v5544_v53 = vshll.u32 %v5374_v26, 16  ;;  %v5542_v20 = vshrl.u32 %v5374_v26, 16 }
0x118c   :  { %7702 = vrot.lane.b32.xlu0 %v7701_v5, %s8112_s18  ;;  %v5493_v5 = vor.u32 %v5492_v31, %v5488_v44  ;;  %v5546_v16 = vrot.slane %v5544_v53, 1  ;;  %v5654_v31 = vrot.slane %v5652_v36, 1 }
0x118e   :  { %v5547_v55 = vor.u32 %v5546_v16, %v5542_v20 }
0x11ca   :  { %v5268_v11 = vpop.xlane.xlu1 %5267 }
0x11cb   :  { %8062 = vrcp.f32 %v5268_v11 }
0x11cc   :  { %v5271_v51 = vpop.xlane.xlu0 %5270 }
0x11cd   :  { %8064 = vrcp.f32 %v5271_v51  ;;  %v5552_v51 = vand.u32 %v5547_v55, %v8440_v21 }
0x11d2   :  { %v5274_v27 = vpop.xlane.xlu1 %5273 }
0x11d3   :  { %8066 = vrcp.f32 %v5274_v27 }
0x11d5   :  { %v8063_v57 = vpop.eup %8062 }
0x11d6   :  { %v5330_v46 = vmul.f32 %v8063_v57, %v10089_v38  ;;  %v5277_v39 = vpop.xlane.xlu0 %5276  ;;  %v5280_v0 = vpop.xlane.xlu1 %5279  ;;  %v5498_v38 = vand.u32 %v5493_v5, %v8440_v21  ;;  %v10579_v5 = vunpack.i.h.bf16 %v9738_v25 }
0x11d7   :  { %v8065_v15 = vpop.eup %8064  ;;  %8068 = vrcp.f32 %v5277_v39 }
0x11d8   :  { %6642 = vst.msk [vmem:[%s10512_s15 + $0x80] sm:$0xff] %vm799_vm4, %v5330_v46  ;;  %v5331_v23 = vmul.f32 %v8065_v15, %v10093_v3  ;;  %8070 = vrcp.f32 %v5280_v0  ;;  %v10577_v3 = vmov 0.0  }
0x11da   :  { %6643 = vst.msk [vmem:[%s10512_s15 + $0x88] sm:$0x1] %vm803_vm5, %v5331_v23  ;;  %v5283_v48 = vpop.xlane.xlu0 %5282  ;;  %v5363_v61 = vpack.c.bf16 %v5331_v23, %v5330_v46 }
0x11db   :  { %v5286_v8 = vpop.xlane.xlu1 %5285  ;;  %8072 = vrcp.f32 %v5283_v48 }
0x11dc   :  { %8074 = vrcp.f32 %v5286_v8  ;;  %7348 = vmatmul.mubr.msk.bf16.vlgmr.msra.gmra.mrb[144].mxu0 %vm799_vm4, %v5363_v61 }
0x11dd   :  { %7358 = vmatpush3.bf16.msra.mxu0 %v5498_v38  ;;  %7359 = vmatprep.mubr.msk.bf16.mxu0 %vm8111_vm1, %v10577_v3  ;;  %v8067_v19 = vpop.eup %8066 }
0x11de   :  { %7369 = vmatprep.subr.bf16.mxu0 %v10577_v3  ;;  %v5332_v58 = vmul.f32 %v8067_v19, %v10101_v42 }
0x11df   :  { %v5292_v7 = vpop.xlane.xlu1 %5291  ;;  %v5289_v18 = vpop.xlane.xlu0 %5288 }
0x11e0   :  { %8076 = vrcp.f32 %v5292_v7  ;;  %6644 = vst.msk [vmem:[%s10512_s15 + $0x90] sm:$0xff] %vm799_vm4, %v5332_v58 }
0x11e1   :  { %v8069_v63 = vpop.eup %8068  ;;  %8078 = vrcp.f32 %v5289_v18 }
0x11e2   :  { %v8071_v49 = vpop.eup %8070  ;;  %v5333_v24 = vmul.f32 %v8069_v63, %v10109_v30 }
0x11e3   :  { %v5334_v42 = vmul.f32 %v8071_v49, %v10107_v22  ;;  %v5295_v60 = vpop.xlane.xlu0 %5294 }
0x11e4   :  { %6645 = vst.msk [vmem:[%s10512_s15 + $0x98] sm:$0x1] %vm803_vm5, %v5333_v24  ;;  %8080 = vrcp.f32 %v5295_v60  ;;  %v5364_v11 = vpack.c.bf16 %v5333_v24, %v5332_v58  ;;  %v10580_v24 = vunpack.i.h.bf16 %v9730_v62 }
0x11e5   :  { %v8073_v29 = vpop.eup %8072  ;;  %6646 = vst.msk [vmem:[%s10512_s15 + $0xa0] sm:$0xff] %vm799_vm4, %v5334_v42 }
0x11e6   :  { %v8075_v30 = vpop.eup %8074  ;;  %v5335_v22 = vmul.f32 %v8073_v29, %v10117_v47  ;;  %v5304_v1 = vpop.xlane.xlu1 %5303  ;;  %7354 = vmatmul.mubr.msk.bf16.vlgmr.msra.gmra.mrb[144].mxu1 %vm799_vm4, %v5364_v11  ;;  %v5650_v47 = vshrl.u32 %v5376_v50, 16 }
0x11e7   :  { %v5336_v27 = vmul.f32 %v8075_v30, %v10119_v14  ;;  %8082 = vrcp.f32 %v5304_v1  ;;  %7364 = vmatpush3.bf16.msra.mxu1 %v5552_v51  ;;  %v5298_v57 = vpop.xlane.xlu0 %5297  ;;  %7365 = vmatprep.mubr.msk.bf16.mxu1 %vm8111_vm1, %v10577_v3  ;;  %v5606_v14 = vand.u32 %v5601_v52, %v8440_v21  ;;  %v7798_v52 = vld [vmem:[%s10502_s2 + $0xc0] sm:$0xff]  }
0x11e8   :  { %6647 = vst.msk [vmem:[%s10512_s15 + $0xa8] sm:$0x1] %vm803_vm5, %v5335_v22  ;;  %8084 = vrcp.f32 %v5298_v57  ;;  %v5365_v2 = vpack.c.bf16 %v5335_v22, %v5334_v42  ;;  %7375 = vmatprep.subr.bf16.mxu1 %v10577_v3  ;;  %v5655_v39 = vor.u32 %v5654_v31, %v5650_v47 }
0x11e9   :  { %6648 = vst.msk [vmem:[%s10512_s15 + $0xb0] sm:$0xff] %vm799_vm4, %v5336_v27 }
0x11ea   :  { %v8077_v26 = vpop.eup %8076  ;;  %v4664_v44 = vpop.permute.xlu1 %4663  ;;  %7360 = vmatmul.mubr.msk.bf16.vlgmr.msra.gmra.mrb[148].mxu0 %vm799_vm4, %v5365_v2  ;;  %v5660_v61 = vand.u32 %v5655_v39, %v8440_v21 }
0x11eb   :  { %v8079_v46 = vpop.eup %8078  ;;  %v5338_v15 = vmul.f32 %v8077_v26, %v10126_v35  ;;  %v5378_v0 = vpack.c.bf16 %v4664_v44, %v10579_v5  ;;  %7370 = vmatpush3.bf16.msra.mxu0 %v5606_v14  ;;  %v5301_v23 = vpop.xlane.xlu0 %5300  ;;  %7371 = vmatprep.mubr.msk.bf16.mxu0 %vm8111_vm1, %v10577_v3  ;;  %v7801_v5 = vld [vmem:[%s10502_s2 + $0x88] sm:$0xff]  }
0x11ec   :  { %v5337_v53 = vmul.f32 %v8079_v46, %v10128_v34  ;;  %8086 = vrcp.f32 %v5301_v23  ;;  %7381 = vmatprep.subr.bf16.mxu0 %v10577_v3 }
0x11ed   :  { %6650 = vst.msk [vmem:[%s10512_s15 + $0xc0] sm:$0xff] %vm799_vm4, %v5338_v15  ;;  %v5760_v25 = vshll.u32 %v5378_v0, 16  ;;  %v5758_v50 = vshrl.u32 %v5378_v0, 16 }
0x11ee   :  { %v8081_v48 = vpop.eup %8080  ;;  %6649 = vst.msk [vmem:[%s10512_s15 + $0xb8] sm:$0x1] %vm803_vm5, %v5337_v53  ;;  %v5366_v35 = vpack.c.bf16 %v5337_v53, %v5336_v27 }
0x11ef   :  { %v5339_v34 = vmul.f32 %v8081_v48, %v10135_v9  ;;  %v5307_v38 = vpop.xlane.xlu0 %5306  ;;  %v5762_v20 = vrot.slane %v5760_v25, 1  ;;  %v7802_v48 = vld [vmem:[%s10502_s2 + $0xd0] sm:$0xff]  }
0x11f0   :  { %7366 = vmatmul.mubr.msk.bf16.vlgmr.msra.gmra.mrb[148].mxu1 %vm799_vm4, %v5366_v35  ;;  %8088 = vrcp.f32 %v5307_v38  ;;  %v7803_v25 = vld [vmem:[%s10502_s2 + $0x90] sm:$0xff]  }
0x11f1   :  { %v8083_v8 = vpop.eup %8082  ;;  %6651 = vst.msk [vmem:[%s10512_s15 + $0xc8] sm:$0x1] %vm803_vm5, %v5339_v34  ;;  %7376 = vmatpush3.bf16.msra.mxu1 %v5660_v61  ;;  %v5367_v40 = vpack.c.bf16 %v5339_v34, %v5338_v15  ;;  %7377 = vmatprep.mubr.msk.bf16.mxu1 %vm8111_vm1, %v10577_v3  ;;  %v7804_v61 = vld [vmem:[%s10502_s2 + $0xd8] sm:$0xff]  }
0x11f2   :  { %v8085_v16 = vpop.eup %8084  ;;  %v5342_v19 = vmul.f32 %v8083_v8, %v10142_v10  ;;  %7387 = vmatprep.subr.bf16.mxu1 %v10577_v3  ;;  %v7805_v8 = vld [vmem:[%s10502_s2 + $0x98] sm:$0xff]  }
0x11f3   :  { %v5340_v9 = vmul.f32 %v8085_v16, %v10140_v32  ;;  %7372 = vmatmul.mubr.msk.bf16.vlgmr.msra.gmra.mrb[152].mxu0 %vm799_vm4, %v5367_v40  ;;  %v5310_v6 = vpop.xlane.xlu0 %5309  ;;  %v5763_v32 = vor.u32 %v5762_v20, %v5758_v50  ;;  %v7806_v40 = vld [vmem:[%s10502_s2 + $0xe0] sm:$0xff]  }
0x11f4   :  { %6654 = vst.msk [vmem:[%s10512_s15 + $0xe0] sm:$0xff] %vm799_vm4, %v5342_v19  ;;  %8090 = vrcp.f32 %v5310_v6  ;;  %7383 = vmatprep.mubr.msk.bf16.mxu0 %vm8111_vm1, %v10577_v3 }
0x11f5   :  { %6652 = vst.msk [vmem:[%s10512_s15 + $0xd0] sm:$0xff] %vm799_vm4, %v5340_v9  ;;  %v5768_v13 = vand.u32 %v5763_v32, %v8440_v21  ;;  %v7808_v32 = vld [vmem:[%s10502_s2 + $0xe8] sm:$0xff]  }
0x11f6   :  { %v8087_v10 = vpop.eup %8086 }
0x11f7   :  { %v5341_v58 = vmul.f32 %v8087_v10, %v10148_v41  ;;  %v5313_v7 = vpop.xlane.xlu0 %5312 }
0x11f8   :  { %8092 = vrcp.f32 %v5313_v7  ;;  %v7810_v7 = vld [vmem:[%s10502_s2 + $0xf0] sm:$0xff]  }
0x11f9   :  { %6653 = vst.msk [vmem:[%s10512_s15 + $0xd8] sm:$0x1] %vm803_vm5, %v5341_v58  ;;  %v5368_v18 = vpack.c.bf16 %v5341_v58, %v5340_v9  ;;  %v7809_v58 = vld [vmem:[%s10502_s2 + $0xa8] sm:$0xff]  }
0x11fa   :  { %v8089_v63 = vpop.eup %8088 }
0x11fb   :  { %v5343_v55 = vmul.f32 %v8089_v63, %v10152_v43  ;;  %7378 = vmatmul.mubr.msk.bf16.vlgmr.msra.gmra.mrb[152].mxu1 %vm799_vm4, %v5368_v18  ;;  %v4661_v49 = vpop.permute.xlu0 %4660  ;;  %v7811_v18 = vld [vmem:[%s10502_s2 + $0xb0] sm:$0xff]  }
0x11fc   :  { %7388 = vmatpush3.bf16.msra.mxu1 %v5768_v13  ;;  %v5377_v41 = vpack.c.bf16 %v4661_v49, %v10580_v24  ;;  %7389 = vmatprep.mubr.msk.bf16.mxu1 %vm8111_vm1, %v10577_v3  ;;  %v7812_v49 = vld [vmem:[%s10502_s2 + $0xf8] sm:$0xff]  }
0x11fd   :  { %6655 = vst.msk [vmem:[%s10512_s15 + $0xe8] sm:$0x1] %vm803_vm5, %v5343_v55 }
0x11fe   :  { %v8091_v59 = vpop.eup %8090  ;;  %v5706_v36 = vshll.u32 %v5377_v41, 16  ;;  %v5704_v43 = vshrl.u32 %v5377_v41, 16 }
0x11ff   :  { %v5344_v42 = vmul.f32 %v8091_v59, %v10156_v33  ;;  %v5369_v33 = vpack.c.bf16 %v5343_v55, %v5342_v19  ;;  %v7807_v19 = vld [vmem:[%s10502_s2 + $0xa0] sm:$0xff]   ;;  %v7813_v59 = vld [vmem:[%s10502_s2 + $0xb8] sm:$0xff]  }
0x1200   :  { %v5708_v60 = vrot.slane %v5706_v36, 1 }
0x1201   :  { %6656 = vst.msk [vmem:[%s10512_s15 + $0xf0] sm:$0xff] %vm799_vm4, %v5344_v42 }
0x1202   :  { %v8093_v62 = vpop.eup %8092  ;;  %v5709_v11 = vor.u32 %v5708_v60, %v5704_v43 }
0x1203   :  { %v5345_v3 = vmul.f32 %v8093_v62, %v10160_v12  ;;  %v7800_v12 = vld [vmem:[%s10502_s2 + $0xc8] sm:$0xff]  }
0x1204   :  { %v5714_v29 = vand.u32 %v5709_v11, %v8440_v21  ;;  %v7799_v21 = vld [vmem:[%s10502_s2 + $0x80] sm:$0xff]  }
0x1205   :  { %6657 = vst.msk [vmem:[%s10512_s15 + $0xf8] sm:$0x1] %vm803_vm5, %v5345_v3  ;;  %v5370_v51 = vpack.c.bf16 %v5345_v3, %v5344_v42 }
0x1206   :  { %7382 = vmatpush3.bf16.msra.mxu0 %v5714_v29  ;;  %v7678_v29 = vpop.permute.xlu1 %7677 }
0x1207   :  { %7390 = vmatmul.mubr.msk.bf16.vlgmr.msra.gmra.mrb[156].mxu1 %vm799_vm4, %v5370_v51  ;;  %6935 = vmatprep.subr.bf16.mxu0 %v7798_v52 }
0x1209   :  { %7384 = vmatmul.mubr.msk.bf16.vlgmr.msra.gmra.mrb[156].mxu0 %vm799_vm4, %v5369_v33  ;;  %v7683_v33 = vpop.permute.xlu0 %7682 }
0x120a   :  { %6936 = vmatpush3.bf16.msra.mxu0 %v7799_v21  ;;  %v7688_v51 = vpop.permute.xlu1 %7687 }
0x120b   :  { %6937 = vmatprep.subr.bf16.mxu0 %v7800_v12 }
0x120d   :  { %v7693_v12 = vpop.permute.xlu0 %7692 }
0x120e   :  { %6938 = vmatpush3.bf16.msra.mxu0 %v7801_v5  ;;  %v7698_v52 = vpop.permute.xlu1 %7697 }
0x120f   :  { %6939 = vmatprep.subr.bf16.mxu0 %v7802_v48 }
0x1211   :  { %v7703_v48 = vpop.permute.xlu0 %7702 }
0x1212   :  { %6940 = vmatpush3.bf16.msra.mxu0 %v7803_v25  ;;  %v7685_v25 = vunpack.i.h.bf16 %v7683_v33 }
0x1213   :  { %6941 = vmatprep.subr.bf16.mxu0 %v7804_v61  ;;  %v7695_v61 = vunpack.i.h.bf16 %v7693_v12 }
0x1216   :  { %6942 = vmatpush3.bf16.msra.mxu0 %v7805_v8 }
0x1217   :  { %6943 = vmatprep.subr.bf16.mxu0 %v7806_v40 }
0x121a   :  { %6944 = vmatpush3.bf16.msra.mxu0 %v7807_v19  ;;  %v7705_v19 = vunpack.i.h.bf16 %v7703_v48 }
0x121b   :  { %6945 = vmatprep.subr.bf16.mxu0 %v7808_v32 }
0x121e   :  { %6946 = vmatpush3.bf16.msra.mxu0 %v7809_v58 }
0x121f   :  { %6947 = vmatprep.subr.bf16.mxu0 %v7810_v7 }
0x1222   :  { %6948 = vmatpush3.bf16.msra.mxu0 %v7811_v18 }
0x1223   :  { %6949 = vmatprep.subr.bf16.mxu0 %v7812_v49 }
0x1226   :  { %6950 = vmatpush3.bf16.msra.mxu0 %v7813_v59 }
0x12af   :  { %v10323_v30 = vpop.f32.mrb[144].mxu0 }
0x12b0   :  { %v7349_v22 = vpop.f32.mrb[145].mxu0 }
0x12b1   :  { %v10325_v1 = vpop.f32.mrb[146].mxu0  ;;  %v7680_v22 = vunpack.i.h.bf16 %v7678_v29 }
0x12b2   :  { %v7350_v31 = vpop.f32.mrb[147].mxu0 }
0x12b3   :  { %v7679_v31 = vunpack.i.l.bf16 %v7678_v29 }
0x12b9   :  { %v5480_v27 = vpop.f32.mrb[144].mxu1 }
0x12ba   :  { %v7355_v57 = vpop.f32.mrb[145].mxu1 }
0x12bb   :  { %v5483_v2 = vpop.f32.mrb[146].mxu1  ;;  %v7689_v57 = vunpack.i.l.bf16 %v7688_v51 }
0x12bc   :  { %v7356_v47 = vpop.f32.mrb[147].mxu1 }
0x12bd   :  { %v5534_v14 = vpop.f32.mrb[148].mxu0 }
0x12be   :  { %v7361_v26 = vpop.f32.mrb[149].mxu0 }
0x12bf   :  { %v5537_v44 = vpop.f32.mrb[150].mxu0  ;;  %v4595_v26 = vsel %vm127_vm0, %v9972_v54, %v7680_v22 }
0x12c0   :  { %v7362_v46 = vpop.f32.mrb[151].mxu0 }
0x12c3   :  { %v5588_v39 = vpop.f32.mrb[148].mxu1 }
0x12c4   :  { %v7367_v15 = vpop.f32.mrb[149].mxu1 }
0x12c5   :  { %v5591_v0 = vpop.f32.mrb[150].mxu1 }
0x12c6   :  { %v7368_v23 = vpop.f32.mrb[151].mxu1  ;;  %v10330_v53 = vpop.f32.mrb[152].mxu0 }
0x12c7   :  { %v7373_v35 = vpop.f32.mrb[153].mxu0  ;;  %v7699_v23 = vunpack.i.l.bf16 %v7698_v52 }
0x12c8   :  { %v10341_v34 = vpop.f32.mrb[154].mxu0  ;;  %v7684_v35 = vunpack.i.l.bf16 %v7683_v33 }
0x12c9   :  { %v7374_v38 = vpop.f32.mrb[155].mxu0 }
0x12ca   :  { %v7694_v38 = vunpack.i.l.bf16 %v7693_v12 }
0x12ce   :  { %v5696_v16 = vpop.f32.mrb[152].mxu1 }
0x12cf   :  { %v7706_v20 = vpack.i.bf16 %v5480_v27, %v5696_v16  ;;  %v7379_v9 = vpop.f32.mrb[153].mxu1  ;;  %v7690_v27 = vunpack.i.h.bf16 %v7688_v51 }
0x12d0   :  { %v5699_v6 = vpop.f32.mrb[154].mxu1 }
0x12d1   :  { %v7721_v50 = vpack.i.bf16 %v5483_v2, %v5699_v6  ;;  %7707 = vrot.lane.b32.xlu1 %v7706_v20, %s8114_s20  ;;  %v7380_v10 = vpop.f32.mrb[155].mxu1  ;;  %v4597_v15 = vsel %vm1423_vm6, %v4595_v26, %v7690_v27  ;;  %v7704_v20 = vunpack.i.l.bf16 %v7703_v48 }
0x12da   :  { %v5804_v63 = vpop.f32.mrb[156].mxu1 }
0x12db   :  { %v7716_v13 = vpack.i.bf16 %v5588_v39, %v5804_v63  ;;  %v7391_v55 = vpop.f32.mrb[157].mxu1 }
0x12dc   :  { %v5750_v24 = vpop.f32.mrb[156].mxu0  ;;  %v5807_v41 = vpop.f32.mrb[158].mxu1 }
0x12dd   :  { %v7711_v36 = vpack.i.bf16 %v5534_v14, %v5750_v24  ;;  %v7731_v42 = vpack.i.bf16 %v5591_v0, %v5807_v41  ;;  %v7385_v43 = vpop.f32.mrb[157].mxu0  ;;  %v7392_v60 = vpop.f32.mrb[159].mxu1  ;;  %v7700_v0 = vunpack.i.h.bf16 %v7698_v52 }
0x12de   :  { %v5753_v62 = vpop.f32.mrb[158].mxu0 }
0x12df   :  { %v7726_v11 = vpack.i.bf16 %v5537_v44, %v5753_v62  ;;  %v7386_v3 = vpop.f32.mrb[159].mxu0  ;;  %7712 = vrot.lane.b32.xlu1 %v7711_v36, %s8113_s19  ;;  %v4601_v44 = vsel %vm127_vm0, %v9988_v17, %v7679_v31 }
0x12e0   :  { %v4603_v5 = vsel %vm1423_vm6, %v4601_v44, %v7689_v57 }
0x12e1   :  { %7727 = vrot.lane.b32.xlu0 %v7726_v11, %s8113_s19  ;;  %v4605_v10 = vsel %vm1426_vm7, %v4603_v5, %v7699_v23 }
0x12e3   :  { %7717 = vrot.lane.b32.xlu1 %v7716_v13, %s8112_s18 }
0x12e7   :  { %7722 = vrot.lane.b32.xlu1 %v7721_v50, %s8114_s20  ;;  %v4599_v50 = vsel %vm1426_vm7, %v4597_v15, %v7700_v0 }
0x12eb   :  { %7732 = vrot.lane.b32.xlu1 %v7731_v42, %s8112_s18 }
0x1343   :  { %v7708_v21 = vpop.permute.xlu1 %7707 }
0x1344   :  { %v7710_v47 = vunpack.i.h.bf16 %v7708_v21  ;;  %v7709_v14 = vunpack.i.l.bf16 %v7708_v21 }
0x1346   :  { %v5859_v54 = vsel %vm127_vm0, %v10323_v30, %v7710_v47  ;;  %v5865_v17 = vsel %vm127_vm0, %v10330_v53, %v7709_v14  ;;  %v4594_v30 = vsel %vm127_vm0, %v9970_v56, %v7685_v25  ;;  %v4600_v53 = vsel %vm127_vm0, %v9986_v4, %v7684_v35  ;;  %v6699_v14 = vld [vmem:[%s10503_s3 + $0x1] ss:$0 sm:$0xff] }
0x1347   :  { %v4596_v13 = vsel %vm1423_vm6, %v4594_v30, %v7695_v61  ;;  %v4602_v55 = vsel %vm1423_vm6, %v4600_v53, %v7694_v38 }
0x1348   :  { %v4598_v59 = vsel %vm1426_vm7, %v4596_v13, %v7705_v19  ;;  %v4604_v36 = vsel %vm1426_vm7, %v4602_v55, %v7704_v20  ;;  %v7814_v13 = vld [vmem:[%s10504_s6 + $0x10] sm:$0xff]   ;;  %v7815_v55 = vld [vmem:[%s10504_s6 + $0x18] sm:$0xff]  }
0x1349   :  { %7393 = vmatprep.subr.bf16.mxu1 %v7814_v13 }
0x134a   :  { %7394 = vmatpush3.bf16.msra.mxu1 %v7814_v13 }
0x134b   :  { %7395 = vmatprep.subr.bf16.mxu1 %v7815_v55 }
0x134e   :  { %7396 = vmatpush3.bf16.msra.mxu1 %v7815_v55 }
0x1351   :  { %v7713_v2 = vpop.permute.xlu1 %7712 }
0x1352   :  { %v7715_v46 = vunpack.i.h.bf16 %v7713_v2  ;;  %v7714_v39 = vunpack.i.l.bf16 %v7713_v2 }
0x1353   :  { %v7728_v49 = vpop.permute.xlu0 %7727 }
0x1354   :  { %v5861_v9 = vsel %vm1423_vm6, %v5859_v54, %v7715_v46  ;;  %v5867_v6 = vsel %vm1423_vm6, %v5865_v17, %v7714_v39  ;;  %v7730_v11 = vunpack.i.h.bf16 %v7728_v49  ;;  %v7729_v3 = vunpack.i.l.bf16 %v7728_v49  ;;  %v7816_v49 = vld [vmem:[%s10505_s8 + $0x40] sm:$0xff]  }
0x1355   :  { %v7718_v8 = vpop.permute.xlu1 %7717  ;;  %7401 = vmatprep.subr.bf16.mxu1 %v7816_v49 }
0x1356   :  { %v7720_v40 = vunpack.i.h.bf16 %v7718_v8  ;;  %v7719_v16 = vunpack.i.l.bf16 %v7718_v8 }
0x1358   :  { %v5863_v32 = vsel %vm1426_vm7, %v5861_v9, %v7720_v40  ;;  %v5869_v58 = vsel %vm1426_vm7, %v5867_v6, %v7719_v16 }
0x1359   :  { %v5875_v7 = vrot.slane %v5863_v32, 7  ;;  %v5876_v18 = vrot.slane %v5869_v58, 7  ;;  %v7723_v63 = vpop.permute.xlu1 %7722 }
0x135a   :  { %v7725_v24 = vunpack.i.h.bf16 %v7723_v63  ;;  %v7724_v41 = vunpack.i.l.bf16 %v7723_v63 }
0x135b   :  { %v5886_v42 = vsel %vm2687_vm8, %v4605_v10, %v5876_v18  ;;  %v5885_v56 = vsel %vm2687_vm8, %v4599_v50, %v5875_v7 }
0x135c   :  { %v5860_v4 = vsel %vm127_vm0, %v10325_v1, %v7725_v24  ;;  %v5866_v43 = vsel %vm127_vm0, %v10341_v34, %v7724_v41  ;;  %v5888_v60 = vpack.c.bf16 %v5886_v42, %v4604_v36  ;;  %v5887_v62 = vpack.c.bf16 %v5885_v56, %v4598_v59 }
0x135d   :  { %v7733_v29 = vpop.permute.xlu1 %7732  ;;  %v5862_v52 = vsel %vm1423_vm6, %v5860_v4, %v7730_v11  ;;  %v5868_v21 = vsel %vm1423_vm6, %v5866_v43, %v7729_v3  ;;  %v6717_v11 = vld [vmem:[%s10506_s4 + $0x1] ss:$0 sm:$0xff] }
0x135e   :  { %v7735_v51 = vunpack.i.h.bf16 %v7733_v29  ;;  %v7734_v33 = vunpack.i.l.bf16 %v7733_v29  ;;  %6060 = vmatprep.mubr.bf16.mxu0 %v5888_v60 }
0x135f   :  { %6061 = vmatmul.mubr.bf16.vlgmr.msra.gmra.mrb[160].mxu0 %v5887_v62 }
0x1360   :  { %v5864_v12 = vsel %vm1426_vm7, %v5862_v52, %v7735_v51  ;;  %v5870_v1 = vsel %vm1426_vm7, %v5868_v21, %v7734_v33  ;;  %v6719_v52 = vld [vmem:[%s10507_s5 + $0x1] ss:$0 sm:$0xff] }
0x1361   :  { %v5877_v22 = vrot.slane %v5864_v12, 7  ;;  %v5879_v31 = vrot.slane %v5870_v1, 7 }
0x1363   :  { %v5880_v34 = vsel %vm2687_vm8, %v5876_v18, %v5879_v31  ;;  %v5878_v27 = vsel %vm2687_vm8, %v5875_v7, %v5877_v22 }
0x1364   :  { %v5890_v57 = vpack.c.bf16 %v5880_v34, %v5880_v34  ;;  %v5889_v2 = vpack.c.bf16 %v5878_v27, %v5878_v27 }
0x1366   :  { %6068 = vmatprep.mubr.bf16.mxu0 %v5890_v57 }
0x1367   :  { %6069 = vmatmul.mubr.bf16.gmra.mrb[164].mxu0 %v5889_v2 }
0x1432   :  { %v6951_v47 = vpop.f32.mrb[160].mxu0 }
0x1433   :  { %v6952_v26 = vpop.f32.mrb[161].mxu0 }
0x1434   :  { %v6953_v44 = vadd.f32 %v6952_v26, %v6951_v47  ;;  %v6954_v46 = vpop.f32.mrb[162].mxu0  ;;  %v7817_v47 = vld [vmem:[%s10505_s8 + $0x48] sm:$0xff]   ;;  %v7819_v26 = vld [vmem:[%s10505_s8 + $0x58] sm:$0xff]  }
0x1435   :  { %v6955_v39 = vpop.f32.mrb[163].mxu0 }
0x1436   :  { %v6063_v15 = vadd.f32 %v6953_v44, %v6699_v14  ;;  %v6956_v5 = vadd.f32 %v6955_v39, %v6954_v46  ;;  %v7820_v44 = vld [vmem:[%s10505_s8 + $0x60] sm:$0xff]   ;;  %v7821_v46 = vld [vmem:[%s10505_s8 + $0x68] sm:$0xff]   ;;  %v7822_v39 = vld [vmem:[%s10505_s8 + $0x70] sm:$0xff]  }
0x1438   :  { %v6066_v0 = vadd.f32 %v6956_v5, %v6699_v14  ;;  %v6076_v23 = vadd.f32 %v6063_v15, %v9311_v28  ;;  %v7823_v15 = vld [vmem:[%s10505_s8 + $0x78] sm:$0xff]   ;;  %v6725_v5 = vld [vmem:[%s10508_s7 + $0x1] ss:$0 sm:$0xff] }
0x143a   :  { %v6957_v48 = vpop.f32.mrb[164].mxu0  ;;  %v6079_v25 = vsel %vm127_vm0, %v6076_v23, 0.0  ;;  %v6077_v35 = vadd.f32 %v6066_v0, %v9313_v37 }
0x143b   :  { %6080 = vadd.xlane.f32.xlu0 %v6079_v25  ;;  %v6958_v61 = vpop.f32.mrb[165].mxu0 }
0x143c   :  { %v6959_v38 = vadd.f32 %v6958_v61, %v6957_v48  ;;  %v6960_v8 = vpop.f32.mrb[166].mxu0  ;;  %v6082_v54 = vsel %vm127_vm0, %v6077_v35, 0.0 }
0x143d   :  { %6083 = vadd.xlane.f32.xlu1 %v6082_v54  ;;  %v6961_v17 = vpop.f32.mrb[167].mxu0 }
0x143e   :  { %v6071_v40 = vadd.f32 %v6959_v38, %v6699_v14  ;;  %v7818_v14 = vld [vmem:[%s10505_s8 + $0x50] sm:$0xff]  }
0x1440   :  { %v6078_v16 = vadd.f32 %v6071_v40, %v9334_v45 }
0x1442   :  { %v6085_v19 = vsel %vm2896_vm9, %v6078_v16, 0.0 }
0x1443   :  { %6086 = vadd.xlane.f32.xlu0 %v6085_v19  ;;  %v6747_v19 = vld [vmem:[%s10509_s9 + $0x1] ss:$0 sm:$0xff] }
0x14c8   :  { %v6081_v28 = vpop.xlane.xlu0 %6080 }
0x14c9   :  { %v6088_v20 = vmul.f32 0.03125, %v6081_v28 }
0x14ca   :  { %v6084_v9 = vpop.xlane.xlu1 %6083 }
0x14cb   :  { %v6091_v6 = vsub.f32 %v6076_v23, %v6088_v20  ;;  %v6089_v50 = vmul.f32 0.03125, %v6084_v9 }
0x14cd   :  { %v6092_v37 = vsub.f32 %v6077_v35, %v6089_v50  ;;  %v6094_v10 = vmul.f32 %v6091_v6, %v6091_v6 }
0x14cf   :  { %v6097_v32 = vsel %vm127_vm0, %v6094_v10, 0.0  ;;  %v6095_v58 = vmul.f32 %v6092_v37, %v6092_v37 }
0x14d0   :  { %6098 = vadd.xlane.f32.xlu0 %v6097_v32  ;;  %v6087_v30 = vpop.xlane.xlu0 %6086 }
0x14d1   :  { %v6090_v53 = vmul.f32 0.03125, %v6087_v30  ;;  %v6100_v7 = vsel %vm127_vm0, %v6095_v58, 0.0 }
0x14d2   :  { %6101 = vadd.xlane.f32.xlu1 %v6100_v7 }
0x14d3   :  { %v6093_v45 = vsub.f32 %v6078_v16, %v6090_v53 }
0x14d5   :  { %v6096_v18 = vmul.f32 %v6093_v45, %v6093_v45 }
0x14d7   :  { %v6103_v63 = vsel %vm2896_vm9, %v6096_v18, 0.0 }
0x14d8   :  { %6104 = vadd.xlane.f32.xlu0 %v6103_v63 }
0x155d   :  { %v6099_v24 = vpop.xlane.xlu0 %6098 }
0x155e   :  { %v6106_v41 = vmul.f32 0.03125, %v6099_v24 }
0x155f   :  { %v6102_v59 = vpop.xlane.xlu1 %6101 }
0x1560   :  { %v6109_v36 = vadd.f32 1e-05, %v6106_v41  ;;  %v6107_v42 = vmul.f32 0.03125, %v6102_v59 }
0x1562   :  { %8094 = vrsqrt.f32 %v6109_v36  ;;  %v6110_v56 = vadd.f32 1e-05, %v6107_v42 }
0x1564   :  { %8096 = vrsqrt.f32 %v6110_v56 }
0x1565   :  { %v6105_v4 = vpop.xlane.xlu0 %6104 }
0x1566   :  { %v6108_v43 = vmul.f32 0.03125, %v6105_v4 }
0x1568   :  { %v6111_v60 = vadd.f32 1e-05, %v6108_v43 }
0x156a   :  { %8098 = vrsqrt.f32 %v6111_v60 }
0x156c   :  { %v8095_v62 = vpop.eup %8094 }
0x156d   :  { %v6115_v3 = vmul.f32 %v8095_v62, %v6091_v6 }
0x156e   :  { %v8097_v29 = vpop.eup %8096 }
0x156f   :  { %v6116_v51 = vmul.f32 %v8097_v29, %v6092_v37  ;;  %v6126_v33 = vmul.f32 %v6717_v11, %v6115_v3  ;;  %v7825_v3 = vld [vmem:[%s10513_s12 + $0x8] sm:$0xff]  }
0x1571   :  { %v6127_v21 = vmul.f32 %v6717_v11, %v6116_v51  ;;  %v6137_v12 = vadd.f32 %v6719_v52, %v6126_v33 }
0x1573   :  { %v6138_v1 = vadd.f32 %v6719_v52, %v6127_v21 }
0x1574   :  { %v8099_v22 = vpop.eup %8098 }
0x1575   :  { %v6117_v31 = vmul.f32 %v8099_v22, %v6093_v45  ;;  %v6140_v34 = vpack.c.bf16 %v6138_v1, %v6137_v12 }
0x1577   :  { %7397 = vmatprep.mubr.msk.bf16.mxu1 %vm127_vm0, %v6140_v34  ;;  %v6128_v27 = vmul.f32 %v6717_v11, %v6117_v31  ;;  %v7824_v11 = vld [vmem:[%s10513_s12] sm:$0xff]  }
0x1578   :  { %7421 = vmatprep.subr.bf16.mxu0 %v7824_v11 }
0x1579   :  { %v6139_v57 = vadd.f32 %v6719_v52, %v6128_v27  ;;  %7422 = vmatpush3.bf16.msra.mxu0 %v7824_v11  ;;  %v6757_v27 = vld [vmem:[%s10510_s10 + $0x1] ss:$0 sm:$0xff] }
0x157a   :  { %7423 = vmatprep.subr.bf16.mxu0 %v7825_v3 }
0x157b   :  { %v6141_v2 = vpack.c.bf16 %v6139_v57, %v6139_v57 }
0x157d   :  { %7398 = vmatmul.mubr.msk.bf16.vlgmr.msra.gmra.mrb[160].mxu1 %vm127_vm0, %v6141_v2  ;;  %7424 = vmatpush3.bf16.msra.mxu0 %v7825_v3 }
0x157e   :  { %7402 = vmatpush3.bf16.msra.mxu1 %v7816_v49 }
0x157f   :  { %7403 = vmatprep.subr.bf16.mxu1 %v7817_v47 }
0x1582   :  { %7404 = vmatpush3.bf16.msra.mxu1 %v7817_v47 }
0x1583   :  { %7405 = vmatprep.subr.bf16.mxu1 %v7818_v14 }
0x1586   :  { %7406 = vmatpush3.bf16.msra.mxu1 %v7818_v14 }
0x1587   :  { %7407 = vmatprep.subr.bf16.mxu1 %v7819_v26 }
0x158a   :  { %7408 = vmatpush3.bf16.msra.mxu1 %v7819_v26 }
0x158b   :  { %7409 = vmatprep.subr.bf16.mxu1 %v7820_v44 }
0x158e   :  { %7410 = vmatpush3.bf16.msra.mxu1 %v7820_v44  ;;  %v6759_v44 = vld [vmem:[%s10511_s11 + $0x1] ss:$0 sm:$0xff] }
0x158f   :  { %7411 = vmatprep.subr.bf16.mxu1 %v7821_v46 }
0x1592   :  { %7412 = vmatpush3.bf16.msra.mxu1 %v7821_v46 }
0x1593   :  { %7413 = vmatprep.subr.bf16.mxu1 %v7822_v39 }
0x1596   :  { %7414 = vmatpush3.bf16.msra.mxu1 %v7822_v39 }
0x1597   :  { %7415 = vmatprep.subr.bf16.mxu1 %v7823_v15 }
0x159a   :  { %7416 = vmatpush3.bf16.msra.mxu1 %v7823_v15 }
0x1650   :  { %v7399_v0 = vpop.f32.mrb[160].mxu1 }
0x1651   :  { %v6216_v23 = vadd.f32 %v7399_v0, %v6725_v5  ;;  %v6207_v48 = vpop.f32.mrb[161].mxu1 }
0x1652   :  { %v6208_v25 = vadd.f32 %v6725_v5, %v6207_v48  ;;  %v7400_v35 = vpop.f32.mrb[162].mxu1 }
0x1653   :  { %v6210_v61 = vpop.f32.mrb[163].mxu1  ;;  %v6223_v8 = vmax.f32 %v6216_v23, 0.0  ;;  %v6760_v35 = vld [vmem:[%s10514_s13] ss:$0 sm:$0xff] }
0x1654   :  { %v6211_v38 = vadd.f32 %v6725_v5, %v6210_v61  ;;  %v6221_v54 = vmax.f32 %v6208_v25, 0.0 }
0x1655   :  { %v6225_v16 = vpack.c.bf16 %v6223_v8, %v6223_v8 }
0x1656   :  { %v6222_v17 = vmax.f32 %v6211_v38, 0.0 }
0x1658   :  { %v6224_v40 = vpack.c.bf16 %v6222_v17, %v6221_v54 }
0x165a   :  { %7417 = vmatprep.mubr.bf16.mxu1 %v6224_v40 }
0x165b   :  { %7418 = vmatmul.mubr.bf16.vlgmr.msra.gmra.mrb[164].mxu1 %v6225_v16 }
0x172e   :  { %v7419_v28 = vpop.f32.mrb[164].mxu1 }
0x172f   :  { %v6333_v20 = vpop.f32.mrb[165].mxu1  ;;  %v6342_v9 = vadd.f32 %v7419_v28, %v6747_v19 }
0x1730   :  { %v6334_v6 = vadd.f32 %v6747_v19, %v6333_v20  ;;  %v7420_v50 = vpop.f32.mrb[166].mxu1 }
0x1731   :  { %v6336_v37 = vpop.f32.mrb[167].mxu1  ;;  %v6349_v58 = vadd.f32 %v6342_v9, %v6139_v57 }
0x1732   :  { %v6347_v10 = vadd.f32 %v6334_v6, %v6137_v12  ;;  %v6337_v32 = vadd.f32 %v6747_v19, %v6336_v37 }
0x1733   :  { %v6356_v45 = vsel %vm2896_vm9, %v6349_v58, 0.0 }
0x1734   :  { %v6348_v30 = vadd.f32 %v6337_v32, %v6138_v1  ;;  %v6350_v53 = vsel %vm127_vm0, %v6347_v10, 0.0 }
0x1735   :  { %6351 = vadd.xlane.f32.xlu1 %v6350_v53 }
0x1736   :  { %v6353_v7 = vsel %vm127_vm0, %v6348_v30, 0.0 }
0x1737   :  { %6354 = vadd.xlane.f32.xlu0 %v6353_v7 }
0x1739   :  { %6357 = vadd.xlane.f32.xlu1 %v6356_v45 }
0x17c2   :  { %v6352_v18 = vpop.xlane.xlu1 %6351 }
0x17c3   :  { %v6359_v63 = vmul.f32 0.03125, %v6352_v18 }
0x17c4   :  { %v6355_v13 = vpop.xlane.xlu0 %6354 }
0x17c5   :  { %v6362_v55 = vsub.f32 %v6347_v10, %v6359_v63  ;;  %v6360_v49 = vmul.f32 0.03125, %v6355_v13 }
0x17c6   :  { %v6358_v24 = vpop.xlane.xlu1 %6357 }
0x17c7   :  { %v6363_v41 = vsub.f32 %v6348_v30, %v6360_v49  ;;  %v6361_v59 = vmul.f32 0.03125, %v6358_v24  ;;  %v6365_v36 = vmul.f32 %v6362_v55, %v6362_v55 }
0x17c9   :  { %v6364_v42 = vsub.f32 %v6349_v58, %v6361_v59  ;;  %v6368_v56 = vsel %vm127_vm0, %v6365_v36, 0.0  ;;  %v6366_v4 = vmul.f32 %v6363_v41, %v6363_v41 }
0x17ca   :  { %6369 = vadd.xlane.f32.xlu0 %v6368_v56 }
0x17cb   :  { %v6371_v43 = vsel %vm127_vm0, %v6366_v4, 0.0  ;;  %v6367_v60 = vmul.f32 %v6364_v42, %v6364_v42 }
0x17cc   :  { %6372 = vadd.xlane.f32.xlu1 %v6371_v43 }
0x17cd   :  { %v6374_v62 = vsel %vm2896_vm9, %v6367_v60, 0.0 }
0x17ce   :  { %6375 = vadd.xlane.f32.xlu0 %v6374_v62 }
0x1857   :  { %v6370_v29 = vpop.xlane.xlu0 %6369 }
0x1858   :  { %v6377_v51 = vmul.f32 0.03125, %v6370_v29 }
0x1859   :  { %v6373_v33 = vpop.xlane.xlu1 %6372 }
0x185a   :  { %v6380_v52 = vadd.f32 1e-05, %v6377_v51  ;;  %v6378_v21 = vmul.f32 0.03125, %v6373_v33 }
0x185b   :  { %v6376_v12 = vpop.xlane.xlu0 %6375 }
0x185c   :  { %8100 = vrsqrt.f32 %v6380_v52  ;;  %v6381_v1 = vadd.f32 1e-05, %v6378_v21  ;;  %v6379_v22 = vmul.f32 0.03125, %v6376_v12 }
0x185e   :  { %8102 = vrsqrt.f32 %v6381_v1  ;;  %v6382_v31 = vadd.f32 1e-05, %v6379_v22 }
0x1860   :  { %8104 = vrsqrt.f32 %v6382_v31 }
0x1866   :  { %v8101_v34 = vpop.eup %8100 }
0x1867   :  { %v6386_v57 = vmul.f32 %v8101_v34, %v6362_v55 }
0x1868   :  { %v8103_v2 = vpop.eup %8102 }
0x1869   :  { %v6387_v47 = vmul.f32 %v8103_v2, %v6363_v41  ;;  %v6397_v14 = vmul.f32 %v6757_v27, %v6386_v57 }
0x186a   :  { %v8105_v26 = vpop.eup %8104 }
0x186b   :  { %v6388_v46 = vmul.f32 %v8105_v26, %v6364_v42  ;;  %v6398_v39 = vmul.f32 %v6757_v27, %v6387_v47  ;;  %v6408_v5 = vadd.f32 %v6759_v44, %v6397_v14 }
0x186d   :  { %v6399_v15 = vmul.f32 %v6757_v27, %v6388_v46  ;;  %v6409_v0 = vadd.f32 %v6759_v44, %v6398_v39 }
0x186f   :  { %v6410_v23 = vadd.f32 %v6759_v44, %v6399_v15  ;;  %v6411_v48 = vpack.c.bf16 %v6409_v0, %v6408_v5 }
0x1871   :  { %v6412_v25 = vpack.c.bf16 %v6410_v23, %v6410_v23  ;;  %7425 = vmatprep.mubr.msk.bf16.mxu0 %vm127_vm0, %v6411_v48 }
0x1873   :  { %7426 = vmatmul.mubr.msk.bf16.vlgmr.msra.gmra.mrb[168].mxu0 %vm127_vm0, %v6412_v25 }
0x1946   :  { %v7427_v61 = vpop.f32.mrb[168].mxu0 }
0x1947   :  { %v6485_v38 = vadd.f32 %v7427_v61, %v6760_v35  ;;  %v6476_v8 = vpop.f32.mrb[169].mxu0 }
0x1948   :  { %v6477_v54 = vadd.f32 %v6760_v35, %v6476_v8  ;;  %v7428_v17 = vpop.f32.mrb[170].mxu0 }
0x1949   :  { %6494 = vst.msk [vmem:[%s10515_s14 + $0x10] sm:$0x3] %vm6493_vm10, %v6485_v38  ;;  %v6479_v40 = vpop.f32.mrb[171].mxu0 }
0x194a   :  { %6491 = vst.msk [vmem:[%s10515_s14] sm:$0xff] %vm6490_vm11, %v6477_v54  ;;  %v6480_v16 = vadd.f32 %v6760_v35, %v6479_v40 }
0x194c   :  { %6492 = vst.msk [vmem:[%s10515_s14 + $0x8] sm:$0xff] %vm6490_vm11, %v6480_v16 }

</bundles_post_ra>
